<compile_context>
chip_gen: v7x
topology: tpu7x:2x2x1
jax: 0.10.0
libtpu: 0.0.40
codegen_flags: <defaults>
</compile_context>

<pallas_src>
import math

import jax
import jax.numpy as jnp
import numpy as np
from jax import lax
from jax.experimental import pallas as pl
from jax.experimental.pallas import tpu as pltpu

# ------------------------- module-consistent config -------------------------
B = 2                         # batch
D = 8                         # feature dim ("dim")
L = 32                        # input_length
BS = 8                        # block_size
CS = 4                        # cover_size
RES = BS - CS                 # residue_size
BLOCK_NUM = (L - BS) // RES   # 6 overlapping blocks (layer_num = 1)
N = B * BLOCK_NUM             # folded batch used inside the fused kernel
OUT_LEN = BS * BLOCK_NUM      # 48
PRED = 16                     # pred_length
KSIZE = 5                     # Conv1d kernel_size
PAD = KSIZE // 2              # circular padding = 2
EPS = 1e-5
DIM_C = BS - 1                # 7 "channels" of the dim branch (padded to CPAD)
CPAD = 8                      # channel count after zero-padding the dim branch
KC = KSIZE * CPAD             # 40: folded conv contraction width

S_FEAT = 1.0 / math.sqrt(D)       # scale for time / block graphs
S_DIM = 1.0 / math.sqrt(BS - 1)   # scale for dim graph


# ------------------------------- the fused Pallas kernel -----------------------------
def fused_kernel(xs_ref, x1_ref, w_ref, g_ref, lw_ref, lb_ref, out_ref):
    # xs_ref : (4, N*BS, KC)  tap-expanded conv inputs  [x1|wt, x1|wb1, diff|wd, x2|wb2]
    # x1_ref : (N*BS, D)      flattened x1 windows (GCN supports / residuals)
    # w_ref  : (4, KC, D)     folded circular-conv weights (K taps folded into contraction)
    # g_ref  : (6, BS, D)     [gbw, gbb, gdw^T, gdb, gtw, gtb] (biases pre-broadcast)
    # lw_ref : (PRED, OUT_LEN)   lb_ref : (PRED, D)
    # out_ref: (B, PRED, D)

    # ---- all four circular convs: ONE batched MXU contraction (taps folded) ----
    proj = jnp.einsum("gmc,gco->gmo", xs_ref[...], w_ref[...],
                      preferred_element_type=jnp.float32)            # (4, N*BS, D)
    proj = proj.reshape(4, N, BS, D)                                  # [pt, p1, pd, p2]

    # ---- fused (x - mean)/sqrt(var + eps), stats over the window axis (unbiased=False) ----
    mean = jnp.mean(proj, axis=2, keepdims=True)
    cent = proj - mean
    var = jnp.mean(cent * cent, axis=2, keepdims=True)
    proj = cent * lax.rsqrt(var + EPS)

    # ---- all three graph score products: ONE batched (3N, BS, BS) matmul ----
    lhs = proj[0:3]                                                   # [pt, p1, pd]  (view)
    rhs = jnp.stack([proj[0] * S_FEAT,                                # time:  pt . pt^T
                     proj[3] * S_FEAT,                                # block: p1 . p2^T
                     proj[2] * S_DIM], axis=0)                        # dim:   pd . pd^T
    scores = jnp.einsum("ble,bse->bls",
                        lhs.reshape(3 * N, BS, D), rhs.reshape(3 * N, BS, D),
                        preferred_element_type=jnp.float32).reshape(3, N, BS, BS)

    # ---- ONE grouped softmax over the TRUE batch axis (F.softmax dim=-3), exact recip ----
    parts = [scores[:, b * BLOCK_NUM:(b + 1) * BLOCK_NUM] for b in range(B)]
    m = parts[0]
    for pb in parts[1:]:
        m = jnp.maximum(m, pb)
    exps = [jnp.exp(pb - m) for pb in parts]
    den = exps[0]
    for eb in exps[1:]:
        den = den + eb
    inv = pl.reciprocal(den)                                          # exact (approx=False)
    graphs = jnp.concatenate([eb * inv for eb in exps], axis=1)       # (3, N, BS, BS)
    time_graph, block_graph, dim_graph = graphs[0], graphs[1], graphs[2]

    # ---- GCN stack (dropout == identity at inference) ----
    x1f = x1_ref[...]                                                 # (N*BS, D)
    x1 = x1f.reshape(N, BS, D)
    g = g_ref[...]
    gbw, gbb, gdwT, gdb, gtw, gtb = g[0], g[1], g[2], g[3], g[4], g[5]

    # GCN_Block + relu + residual
    sup_b = jnp.dot(x1f, gbw, preferred_element_type=jnp.float32).reshape(N, BS, D)
    bv = jnp.maximum(
        jnp.einsum("nsl,nle->nse", block_graph, sup_b,
                   preferred_element_type=jnp.float32) + gbb, 0.0) + x1

    # GCN_Dim + relu + residual, computed directly in (N, BS, D) layout
    gdwT_b = jnp.broadcast_to(gdwT[None], (N, BS, BS))
    sup_d = jnp.einsum("nut,ntd->nud", gdwT_b, bv,
                       preferred_element_type=jnp.float32)            # (N, BS, D)
    out_d = jnp.einsum("nue,nde->nud", sup_d, dim_graph,
                       preferred_element_type=jnp.float32)            # (N, BS, D)
    td = jnp.maximum(out_d + gdb, 0.0) + bv                           # gdb: (BS, D)

    # GCN_Time + relu + residual
    sup_t = jnp.dot(td.reshape(N * BS, D), gtw,
                    preferred_element_type=jnp.float32).reshape(N, BS, D)
    tdb = jnp.maximum(
        jnp.einsum("nsl,nle->nse", time_graph, sup_t,
                   preferred_element_type=jnp.float32) + gtb, 0.0) + td

    # ---- concat blocks along time (free leading-dim merge) + Linear over the time axis ----
    temp = tdb.reshape(B, OUT_LEN, D)                                 # (B, 48, D)
    lw_b = jnp.broadcast_to(lw_ref[...][None], (B, PRED, OUT_LEN))
    out = jnp.einsum("bpt,btd->bpd", lw_b, temp,
                     preferred_element_type=jnp.float32) + lb_ref[...]
    out_ref[...] = out                                                # (B, PRED, D)


# ------------------------------- host-side layout prep --------------------------------
def _fold_conv_weight(w):
    """(K, C_out, C_in) -> zero-pad channels to CPAD -> (K*CPAD, CPAD).

    Layout: out[k*CPAD + c, o] = w[k, o, c], so the K circular taps collapse into one
    MXU contraction.  Zero padding (dim branch: 7 -> 8 channels) is numerically inert.
    """
    k, co, ci = w.shape
    wp = jnp.pad(w, ((0, 0), (0, CPAD - co), (0, CPAD - ci)))
    return jnp.transpose(wp, (0, 2, 1)).reshape(k * CPAD, CPAD)


def _tap_expand(xw):
    """(N, S, C) -> (N, S, KSIZE*C): out[n, s, k*C + c] = xw[n, (s + k - PAD) mod S, c]."""
    S = xw.shape[1]
    xp = jnp.concatenate([xw[:, S - PAD:, :], xw, xw[:, :PAD, :]], axis=1)
    return jnp.concatenate([xp[:, k:k + S, :] for k in range(KSIZE)], axis=2)


@jax.jit
def timedim_graph_layer(x, params):
    (wt, wd, wb1, wb2, gbw, gbb, gdw, gdb, gtw, gtb, lw, lb) = params

    # ---- overlapping time windows, folded (b, block) -> N rows (b-major) ----
    starts = np.arange(BLOCK_NUM) * RES
    tidx = starts[:, None] + np.arange(BS)[None, :]                    # (BLOCK_NUM, BS) static
    x1 = x[:, tidx, :].reshape(N, BS, D)                               # (N, BS, D)
    x2 = x[:, tidx + RES, :].reshape(N, BS, D)

    # ---- dim branch: first difference, channels last, zero-padded 7 -> 8 ----
    diff = x1[:, 1:, :] - x1[:, :-1, :]                                # (N, BS-1, D)
    diff_t = jnp.transpose(diff, (0, 2, 1))                            # (N, D, 7)
    diff_p = jnp.pad(diff_t, ((0, 0), (0, 0), (0, CPAD - DIM_C)))      # (N, D, 8)

    # ---- circular-conv tap expansion done ONCE, outside the kernel ----
    xs1 = _tap_expand(x1)                                              # (N, BS, KC)
    xs2 = _tap_expand(x2)
    xsd = _tap_expand(diff_p)
    xs_all = jnp.stack([xs1, xs1, xsd, xs2], axis=0).reshape(4, N * BS, KC)

    # ---- folded conv weights, stacked to match xs_all group order ----
    w_all = jnp.stack([_fold_conv_weight(wt), _fold_conv_weight(wb1),
                       _fold_conv_weight(wd), _fold_conv_weight(wb2)], axis=0)  # (4, KC, CPAD)

    # ---- six 8x8 GCN params packed into one tensor; biases pre-broadcast to (BS, D) ----
    gcn_pack = jnp.stack([
        gbw,
        jnp.broadcast_to(gbb.reshape(1, D), (BS, D)),
        jnp.transpose(gdw),
        jnp.broadcast_to(gdb.reshape(BS, 1), (BS, D)),
        gtw,
        jnp.broadcast_to(gtb.reshape(1, D), (BS, D)),
    ], axis=0)                                                          # (6, BS, D)

    lb_b = jnp.broadcast_to(lb, (PRED, D))                              # (PRED, D)

    vmem = pl.BlockSpec(memory_space=pltpu.MemorySpace.VMEM)
    # ONE fused pallas_call, no grid: whole working set (<100 KiB) lives in VMEM on every
    # generation.  (No batch split across v7x cores: the dim=-3 softmax couples batches.)
    return pl.pallas_call(
        fused_kernel,
        out_shape=jax.ShapeDtypeStruct((B, PRED, D), jnp.float32),
        in_specs=[vmem] * 6,
        out_specs=vmem,
    )(xs_all, x1.reshape(N * BS, D), w_all, gcn_pack, lw, lb_b)


# ------------------------------- pure-JAX reference ----------------------------------
def _roll_last(x, shift):
    ll = x.shape[-1]
    s = shift % ll
    if s == 0:
        return x
    return jnp.concatenate([x[..., s:], x[..., :s]], axis=-1)


def _circular_conv1d_ref(x_bcl, w_koc):
    K = w_koc.shape[0]
    pad = K // 2
    out = None
    for k in range(K):
        xs = _roll_last(x_bcl, k - pad)
        y = jnp.einsum("oc,bcl->bol", w_koc[k], xs)
        out = y if out is None else out + y
    return out


def _norm_axis1_ref(x):
    mean = jnp.mean(x, axis=1, keepdims=True)
    var = jnp.mean((x - mean) ** 2, axis=1, keepdims=True)
    return (x - mean) / jnp.sqrt(var + EPS)


def _softmax_axis0_ref(x):
    m = jnp.max(x, axis=0, keepdims=True)
    e = jnp.exp(x - m)
    return e / jnp.sum(e, axis=0, keepdims=True)


def _graph_ref(p1, p2, scale):
    s = jnp.einsum("ble,bse->bls", p1, p2)
    return _softmax_axis0_ref(scale * s)


def _gcn_ref(x, adj, w, b):
    support = jnp.einsum("bsl,le->bse", x, w)
    return jnp.einsum("bsl,ble->bse", adj, support) + b


def _block_compute_ref(x1, x2, wt, wd, wb1, wb2, gbw, gbb, gdw, gdb, gtw, gtb):
    _, bs, d = x1.shape

    pt = _circular_conv1d_ref(jnp.transpose(x1, (0, 2, 1)), wt)
    pt = _norm_axis1_ref(jnp.transpose(pt, (0, 2, 1)))
    time_graph = _graph_ref(pt, pt, 1.0 / math.sqrt(d))

    diff = x1[:, 1:, :] - x1[:, :-1, :]
    pd = _circular_conv1d_ref(diff, wd)
    pd = _norm_axis1_ref(jnp.transpose(pd, (0, 2, 1)))
    dim_graph = _graph_ref(pd, pd, 1.0 / math.sqrt(bs - 1))

    p1 = _norm_axis1_ref(jnp.transpose(
        _circular_conv1d_ref(jnp.transpose(x1, (0, 2, 1)), wb1), (0, 2, 1)))
    p2 = _norm_axis1_ref(jnp.transpose(
        _circular_conv1d_ref(jnp.transpose(x2, (0, 2, 1)), wb2), (0, 2, 1)))
    block_graph = _graph_ref(p1, p2, 1.0 / math.sqrt(d))

    bv = jnp.maximum(_gcn_ref(x1, block_graph, gbw, gbb), 0.0) + x1
    td = _gcn_ref(jnp.transpose(bv, (0, 2, 1)), dim_graph, gdw, gdb)
    td = jnp.transpose(jnp.maximum(td, 0.0), (0, 2, 1)) + bv
    tdb = jnp.maximum(_gcn_ref(td, time_graph, gtw, gtb), 0.0) + td
    return tdb


def reference_forward(x, params):
    (wt, wd, wb1, wb2, gbw, gbb, gdw, gdb, gtw, gtb, lw, lb) = params
    outs = []
    for i in range(BLOCK_NUM):
        ii = i * RES
        x1 = x[:, ii:ii + BS, :]
        x2 = x[:, ii + RES:ii + RES + BS, :]
        outs.append(_block_compute_ref(x1, x2, wt, wd, wb1, wb2,
                                       gbw, gbb, gdw, gdb, gtw, gtb))
    temp = jnp.concatenate(outs, axis=1)                       # (B, OUT_LEN, D)
    return jnp.einsum("pt,btd->bpd", lw, temp) + lb[None, :, :]


# ------------------------------- main -------------------------------------------------
if __name__ == "__main__":
    key = jax.random.PRNGKey(0)
    ks = jax.random.split(key, 16)

    def u(k, shape, scale=0.3):
        return jax.random.uniform(k, shape, jnp.float32, -scale, scale)

    x = jax.random.normal(ks[0], (B, L, D), jnp.float32)

    params = (
        u(ks[1], (KSIZE, D, D)),             # TimeGenerateGraph conv   (K, C_out, C_in)
        u(ks[2], (KSIZE, BS - 1, BS - 1)),   # DimGenerateGraph conv
        u(ks[3], (KSIZE, D, D)),             # BlockGenerateGraph conv1
        u(ks[4], (KSIZE, D, D)),             # BlockGenerateGraph conv2
        u(ks[5], (D, D)),  u(ks[6], (1, 1, D)),     # GCN_Block  W, b
        u(ks[7], (BS, BS)), u(ks[8], (1, 1, BS)),   # GCN_Dim    W, b
        u(ks[9], (D, D)),  u(ks[10], (1, 1, D)),    # GCN_Time   W, b
        u(ks[11], (PRED, OUT_LEN)), u(ks[12], (PRED, 1)),  # simple_linear W, b
    )

    out = jax.block_until_ready(timedim_graph_layer(x, params))
    ref = jax.block_until_ready(reference_forward(x, params))

    assert out.shape == (B, PRED, D), out.shape
    np.testing.assert_allclose(np.asarray(out), np.asarray(ref), rtol=2e-2, atol=2e-2)
    print("KERNEL_OK")
</pallas_src>

<mosaic_0001>
module attributes {stable_mosaic.version = 11 : i64} {
  func.func @fused_kernel(%arg0: memref<4x96x40xf32, #tpu.memory_space<vmem>>, %arg1: memref<96x8xf32, #tpu.memory_space<vmem>>, %arg2: memref<4x40x8xf32, #tpu.memory_space<vmem>>, %arg3: memref<6x8x8xf32, #tpu.memory_space<vmem>>, %arg4: memref<16x48xf32, #tpu.memory_space<vmem>>, %arg5: memref<16x8xf32, #tpu.memory_space<vmem>>, %arg6: memref<2x16x8xf32, #tpu.memory_space<vmem>>) attributes {dimension_semantics = [], scalar_prefetch = 0 : i64, scratch_operands = 0 : i64, tpu.core_type = #tpu.core_type<tc>} {
    %c0 = arith.constant 0 : index
    %c0_0 = arith.constant 0 : index
    %c0_1 = arith.constant 0 : index
    %0 = vector.load %arg0[%c0, %c0_0, %c0_1] : memref<4x96x40xf32, #tpu.memory_space<vmem>>, vector<4x96x40xf32>
    %c0_2 = arith.constant 0 : index
    %c0_3 = arith.constant 0 : index
    %c0_4 = arith.constant 0 : index
    %1 = vector.load %arg2[%c0_2, %c0_3, %c0_4] : memref<4x40x8xf32, #tpu.memory_space<vmem>>, vector<4x40x8xf32>
    "tpu.trace_start"() <{level = 10 : i32, message = "gmc,gco->gmo"}> : () -> ()
    %cst = arith.constant dense<0.000000e+00> : vector<4x96x8xf32>
    %2 = tpu.matmul %0, %1, %cst {dimension_numbers = #tpu.dot_dimension_numbers<[2], [1], [1], [2], [0, 0, 0, 1, 1, 2], [0], [0]>} : vector<4x96x40xf32>, vector<4x40x8xf32>, vector<4x96x8xf32> -> vector<4x96x8xf32>
    "tpu.trace_stop"() : () -> ()
    %3 = vector.shape_cast %2 : vector<4x96x8xf32> to vector<4x12x8x8xf32>
    %cst_5 = arith.constant dense<0.000000e+00> : vector<4x12x8xf32>
    %4 = vector.multi_reduction <add>, %3, %cst_5 [2] : vector<4x12x8x8xf32> to vector<4x12x8xf32>
    %5 = vector.shape_cast %4 : vector<4x12x8xf32> to vector<4x12x1x8xf32>
    %cst_6 = arith.constant 8.000000e+00 : f32
    %6 = vector.broadcast %cst_6 : f32 to vector<4x12x1x8xf32>
    %7 = arith.divf %5, %6 : vector<4x12x1x8xf32>
    %8 = vector.broadcast %7 : vector<4x12x1x8xf32> to vector<4x12x8x8xf32>
    %9 = arith.subf %3, %8 : vector<4x12x8x8xf32>
    %10 = arith.mulf %9, %9 : vector<4x12x8x8xf32>
    %cst_7 = arith.constant dense<0.000000e+00> : vector<4x12x8xf32>
    %11 = vector.multi_reduction <add>, %10, %cst_7 [2] : vector<4x12x8x8xf32> to vector<4x12x8xf32>
    %12 = vector.shape_cast %11 : vector<4x12x8xf32> to vector<4x12x1x8xf32>
    %cst_8 = arith.constant 8.000000e+00 : f32
    %13 = vector.broadcast %cst_8 : f32 to vector<4x12x1x8xf32>
    %14 = arith.divf %12, %13 : vector<4x12x1x8xf32>
    %cst_9 = arith.constant 9.99999974E-6 : f32
    %15 = vector.broadcast %cst_9 : f32 to vector<4x12x1x8xf32>
    %16 = arith.addf %14, %15 : vector<4x12x1x8xf32>
    %17 = math.rsqrt %16 : vector<4x12x1x8xf32>
    %18 = vector.broadcast %17 : vector<4x12x1x8xf32> to vector<4x12x8x8xf32>
    %19 = arith.mulf %9, %18 : vector<4x12x8x8xf32>
    %20 = vector.extract_strided_slice %19 {offsets = [0, 0, 0, 0], sizes = [3, 12, 8, 8], strides = [1, 1, 1, 1]} : vector<4x12x8x8xf32> to vector<3x12x8x8xf32>
    %21 = vector.extract_strided_slice %19 {offsets = [0, 0, 0, 0], sizes = [1, 12, 8, 8], strides = [1, 1, 1, 1]} : vector<4x12x8x8xf32> to vector<1x12x8x8xf32>
    %22 = vector.shape_cast %21 : vector<1x12x8x8xf32> to vector<12x8x8xf32>
    %cst_10 = arith.constant 0.353553385 : f32
    %23 = vector.broadcast %cst_10 : f32 to vector<12x8x8xf32>
    %24 = arith.mulf %22, %23 : vector<12x8x8xf32>
    %25 = vector.extract_strided_slice %19 {offsets = [3, 0, 0, 0], sizes = [1, 12, 8, 8], strides = [1, 1, 1, 1]} : vector<4x12x8x8xf32> to vector<1x12x8x8xf32>
    %26 = vector.shape_cast %25 : vector<1x12x8x8xf32> to vector<12x8x8xf32>
    %cst_11 = arith.constant 0.353553385 : f32
    %27 = vector.broadcast %cst_11 : f32 to vector<12x8x8xf32>
    %28 = arith.mulf %26, %27 : vector<12x8x8xf32>
    %29 = vector.extract_strided_slice %19 {offsets = [2, 0, 0, 0], sizes = [1, 12, 8, 8], strides = [1, 1, 1, 1]} : vector<4x12x8x8xf32> to vector<1x12x8x8xf32>
    %30 = vector.shape_cast %29 : vector<1x12x8x8xf32> to vector<12x8x8xf32>
    %cst_12 = arith.constant 0.377964467 : f32
    %31 = vector.broadcast %cst_12 : f32 to vector<12x8x8xf32>
    %32 = arith.mulf %30, %31 : vector<12x8x8xf32>
    %33 = vector.shape_cast %24 : vector<12x8x8xf32> to vector<1x12x8x8xf32>
    %34 = vector.shape_cast %28 : vector<12x8x8xf32> to vector<1x12x8x8xf32>
    %35 = vector.shape_cast %32 : vector<12x8x8xf32> to vector<1x12x8x8xf32>
    %36 = tpu.concatenate %33, %34, %35 in 0 : vector<1x12x8x8xf32>, vector<1x12x8x8xf32>, vector<1x12x8x8xf32> -> vector<3x12x8x8xf32>
    %37 = vector.shape_cast %20 : vector<3x12x8x8xf32> to vector<36x8x8xf32>
    %38 = vector.shape_cast %36 : vector<3x12x8x8xf32> to vector<36x8x8xf32>
    "tpu.trace_start"() <{level = 10 : i32, message = "ble,bse->bls"}> : () -> ()
    %cst_13 = arith.constant dense<0.000000e+00> : vector<36x8x8xf32>
    %39 = tpu.matmul %37, %38, %cst_13 {dimension_numbers = #tpu.dot_dimension_numbers<[2], [2], [1], [1], [0, 0, 0, 1, 1, 1], [0], [0]>} : vector<36x8x8xf32>, vector<36x8x8xf32>, vector<36x8x8xf32> -> vector<36x8x8xf32>
    "tpu.trace_stop"() : () -> ()
    %40 = vector.shape_cast %39 : vector<36x8x8xf32> to vector<3x12x8x8xf32>
    %41 = vector.extract_strided_slice %40 {offsets = [0, 0, 0, 0], sizes = [3, 6, 8, 8], strides = [1, 1, 1, 1]} : vector<3x12x8x8xf32> to vector<3x6x8x8xf32>
    %42 = vector.extract_strided_slice %40 {offsets = [0, 6, 0, 0], sizes = [3, 6, 8, 8], strides = [1, 1, 1, 1]} : vector<3x12x8x8xf32> to vector<3x6x8x8xf32>
    %43 = arith.maximumf %41, %42 : vector<3x6x8x8xf32>
    %44 = arith.subf %41, %43 : vector<3x6x8x8xf32>
    %45 = math.exp %44 : vector<3x6x8x8xf32>
    %46 = arith.subf %42, %43 : vector<3x6x8x8xf32>
    %47 = math.exp %46 : vector<3x6x8x8xf32>
    %48 = arith.addf %45, %47 : vector<3x6x8x8xf32>
    %49 = tpu.reciprocal %48 : vector<3x6x8x8xf32> -> vector<3x6x8x8xf32>
    %50 = arith.mulf %45, %49 : vector<3x6x8x8xf32>
    %51 = arith.mulf %47, %49 : vector<3x6x8x8xf32>
    %52 = tpu.concatenate %50, %51 in 1 : vector<3x6x8x8xf32>, vector<3x6x8x8xf32> -> vector<3x12x8x8xf32>
    %53 = vector.extract_strided_slice %52 {offsets = [0, 0, 0, 0], sizes = [1, 12, 8, 8], strides = [1, 1, 1, 1]} : vector<3x12x8x8xf32> to vector<1x12x8x8xf32>
    %54 = vector.shape_cast %53 : vector<1x12x8x8xf32> to vector<12x8x8xf32>
    %55 = vector.extract_strided_slice %52 {offsets = [1, 0, 0, 0], sizes = [1, 12, 8, 8], strides = [1, 1, 1, 1]} : vector<3x12x8x8xf32> to vector<1x12x8x8xf32>
    %56 = vector.shape_cast %55 : vector<1x12x8x8xf32> to vector<12x8x8xf32>
    %57 = vector.extract_strided_slice %52 {offsets = [2, 0, 0, 0], sizes = [1, 12, 8, 8], strides = [1, 1, 1, 1]} : vector<3x12x8x8xf32> to vector<1x12x8x8xf32>
    %58 = vector.shape_cast %57 : vector<1x12x8x8xf32> to vector<12x8x8xf32>
    %c0_14 = arith.constant 0 : index
    %c0_15 = arith.constant 0 : index
    %59 = vector.load %arg1[%c0_14, %c0_15] : memref<96x8xf32, #tpu.memory_space<vmem>>, vector<96x8xf32>
    %60 = vector.shape_cast %59 : vector<96x8xf32> to vector<12x8x8xf32>
    %c0_16 = arith.constant 0 : index
    %c0_17 = arith.constant 0 : index
    %c0_18 = arith.constant 0 : index
    %61 = vector.load %arg3[%c0_16, %c0_17, %c0_18] : memref<6x8x8xf32, #tpu.memory_space<vmem>>, vector<6x8x8xf32>
    %62 = vector.extract_strided_slice %61 {offsets = [0, 0, 0], sizes = [1, 8, 8], strides = [1, 1, 1]} : vector<6x8x8xf32> to vector<1x8x8xf32>
    %63 = vector.shape_cast %62 : vector<1x8x8xf32> to vector<8x8xf32>
    %64 = vector.extract_strided_slice %61 {offsets = [1, 0, 0], sizes = [1, 8, 8], strides = [1, 1, 1]} : vector<6x8x8xf32> to vector<1x8x8xf32>
    %65 = vector.shape_cast %64 : vector<1x8x8xf32> to vector<8x8xf32>
    %66 = vector.extract_strided_slice %61 {offsets = [2, 0, 0], sizes = [1, 8, 8], strides = [1, 1, 1]} : vector<6x8x8xf32> to vector<1x8x8xf32>
    %67 = vector.shape_cast %66 : vector<1x8x8xf32> to vector<8x8xf32>
    %68 = vector.extract_strided_slice %61 {offsets = [3, 0, 0], sizes = [1, 8, 8], strides = [1, 1, 1]} : vector<6x8x8xf32> to vector<1x8x8xf32>
    %69 = vector.shape_cast %68 : vector<1x8x8xf32> to vector<8x8xf32>
    %70 = vector.extract_strided_slice %61 {offsets = [4, 0, 0], sizes = [1, 8, 8], strides = [1, 1, 1]} : vector<6x8x8xf32> to vector<1x8x8xf32>
    %71 = vector.shape_cast %70 : vector<1x8x8xf32> to vector<8x8xf32>
    %72 = vector.extract_strided_slice %61 {offsets = [5, 0, 0], sizes = [1, 8, 8], strides = [1, 1, 1]} : vector<6x8x8xf32> to vector<1x8x8xf32>
    %73 = vector.shape_cast %72 : vector<1x8x8xf32> to vector<8x8xf32>
    %cst_19 = arith.constant dense<0.000000e+00> : vector<96x8xf32>
    %74 = tpu.matmul %59, %63, %cst_19 {dimension_numbers = #tpu.dot_dimension_numbers<[1], [0], [0], [1], [0, 0, 1, 1], [], []>} : vector<96x8xf32>, vector<8x8xf32>, vector<96x8xf32> -> vector<96x8xf32>
    %75 = vector.shape_cast %74 : vector<96x8xf32> to vector<12x8x8xf32>
    "tpu.trace_start"() <{level = 10 : i32, message = "nsl,nle->nse"}> : () -> ()
    %cst_20 = arith.constant dense<0.000000e+00> : vector<12x8x8xf32>
    %76 = tpu.matmul %56, %75, %cst_20 {dimension_numbers = #tpu.dot_dimension_numbers<[2], [1], [1], [2], [0, 0, 0, 1, 1, 2], [0], [0]>} : vector<12x8x8xf32>, vector<12x8x8xf32>, vector<12x8x8xf32> -> vector<12x8x8xf32>
    "tpu.trace_stop"() : () -> ()
    %77 = vector.shape_cast %65 : vector<8x8xf32> to vector<1x8x8xf32>
    %78 = vector.broadcast %77 : vector<1x8x8xf32> to vector<12x8x8xf32>
    %79 = arith.addf %76, %78 : vector<12x8x8xf32>
    %cst_21 = arith.constant 0.000000e+00 : f32
    %80 = vector.broadcast %cst_21 : f32 to vector<12x8x8xf32>
    %81 = arith.maximumf %79, %80 : vector<12x8x8xf32>
    %82 = arith.addf %81, %60 : vector<12x8x8xf32>
    %83 = vector.shape_cast %67 : vector<8x8xf32> to vector<1x8x8xf32>
    %84 = vector.shape_cast %83 : vector<1x8x8xf32> to vector<1x8x8xf32>
    %85 = vector.broadcast %84 : vector<1x8x8xf32> to vector<12x8x8xf32>
    "tpu.trace_start"() <{level = 10 : i32, message = "nut,ntd->nud"}> : () -> ()
    %cst_22 = arith.constant dense<0.000000e+00> : vector<12x8x8xf32>
    %86 = tpu.matmul %85, %82, %cst_22 {dimension_numbers = #tpu.dot_dimension_numbers<[2], [1], [1], [2], [0, 0, 0, 1, 1, 2], [0], [0]>} : vector<12x8x8xf32>, vector<12x8x8xf32>, vector<12x8x8xf32> -> vector<12x8x8xf32>
    "tpu.trace_stop"() : () -> ()
    "tpu.trace_start"() <{level = 10 : i32, message = "nue,nde->nud"}> : () -> ()
    %cst_23 = arith.constant dense<0.000000e+00> : vector<12x8x8xf32>
    %87 = tpu.matmul %86, %58, %cst_23 {dimension_numbers = #tpu.dot_dimension_numbers<[2], [2], [1], [1], [0, 0, 0, 1, 1, 1], [0], [0]>} : vector<12x8x8xf32>, vector<12x8x8xf32>, vector<12x8x8xf32> -> vector<12x8x8xf32>
    "tpu.trace_stop"() : () -> ()
    %88 = vector.shape_cast %69 : vector<8x8xf32> to vector<1x8x8xf32>
    %89 = vector.broadcast %88 : vector<1x8x8xf32> to vector<12x8x8xf32>
    %90 = arith.addf %87, %89 : vector<12x8x8xf32>
    %cst_24 = arith.constant 0.000000e+00 : f32
    %91 = vector.broadcast %cst_24 : f32 to vector<12x8x8xf32>
    %92 = arith.maximumf %90, %91 : vector<12x8x8xf32>
    %93 = arith.addf %92, %82 : vector<12x8x8xf32>
    %94 = vector.shape_cast %93 : vector<12x8x8xf32> to vector<96x8xf32>
    %cst_25 = arith.constant dense<0.000000e+00> : vector<96x8xf32>
    %95 = tpu.matmul %94, %71, %cst_25 {dimension_numbers = #tpu.dot_dimension_numbers<[1], [0], [0], [1], [0, 0, 1, 1], [], []>} : vector<96x8xf32>, vector<8x8xf32>, vector<96x8xf32> -> vector<96x8xf32>
    %96 = vector.shape_cast %95 : vector<96x8xf32> to vector<12x8x8xf32>
    "tpu.trace_start"() <{level = 10 : i32, message = "nsl,nle->nse"}> : () -> ()
    %cst_26 = arith.constant dense<0.000000e+00> : vector<12x8x8xf32>
    %97 = tpu.matmul %54, %96, %cst_26 {dimension_numbers = #tpu.dot_dimension_numbers<[2], [1], [1], [2], [0, 0, 0, 1, 1, 2], [0], [0]>} : vector<12x8x8xf32>, vector<12x8x8xf32>, vector<12x8x8xf32> -> vector<12x8x8xf32>
    "tpu.trace_stop"() : () -> ()
    %98 = vector.shape_cast %73 : vector<8x8xf32> to vector<1x8x8xf32>
    %99 = vector.broadcast %98 : vector<1x8x8xf32> to vector<12x8x8xf32>
    %100 = arith.addf %97, %99 : vector<12x8x8xf32>
    %cst_27 = arith.constant 0.000000e+00 : f32
    %101 = vector.broadcast %cst_27 : f32 to vector<12x8x8xf32>
    %102 = arith.maximumf %100, %101 : vector<12x8x8xf32>
    %103 = arith.addf %102, %93 : vector<12x8x8xf32>
    %104 = vector.shape_cast %103 : vector<12x8x8xf32> to vector<2x48x8xf32>
    %c0_28 = arith.constant 0 : index
    %c0_29 = arith.constant 0 : index
    %105 = vector.load %arg4[%c0_28, %c0_29] : memref<16x48xf32, #tpu.memory_space<vmem>>, vector<16x48xf32>
    %106 = vector.shape_cast %105 : vector<16x48xf32> to vector<1x16x48xf32>
    %107 = vector.shape_cast %106 : vector<1x16x48xf32> to vector<1x16x48xf32>
    %108 = vector.broadcast %107 : vector<1x16x48xf32> to vector<2x16x48xf32>
    "tpu.trace_start"() <{level = 10 : i32, message = "bpt,btd->bpd"}> : () -> ()
    %cst_30 = arith.constant dense<0.000000e+00> : vector<2x16x8xf32>
    %109 = tpu.matmul %108, %104, %cst_30 {dimension_numbers = #tpu.dot_dimension_numbers<[2], [1], [1], [2], [0, 0, 0, 1, 1, 2], [0], [0]>} : vector<2x16x48xf32>, vector<2x48x8xf32>, vector<2x16x8xf32> -> vector<2x16x8xf32>
    "tpu.trace_stop"() : () -> ()
    %c0_31 = arith.constant 0 : index
    %c0_32 = arith.constant 0 : index
    %110 = vector.load %arg5[%c0_31, %c0_32] : memref<16x8xf32, #tpu.memory_space<vmem>>, vector<16x8xf32>
    %111 = vector.shape_cast %110 : vector<16x8xf32> to vector<1x16x8xf32>
    %112 = vector.broadcast %111 : vector<1x16x8xf32> to vector<2x16x8xf32>
    %113 = arith.addf %109, %112 : vector<2x16x8xf32>
    %c0_33 = arith.constant 0 : index
    %c0_34 = arith.constant 0 : index
    %c0_35 = arith.constant 0 : index
    %114 = vector.load %arg6[%c0_33, %c0_34, %c0_35] : memref<2x16x8xf32, #tpu.memory_space<vmem>>, vector<2x16x8xf32>
    tpu.vector_store %arg6[%c0_33, %c0_34, %c0_35], %113 {strides = array<i32>} : memref<2x16x8xf32, #tpu.memory_space<vmem>>, vector<2x16x8xf32>,
    return
  }
}

</mosaic_0001>

<bundles_post_ra>
// kernel: timedim_graph_layer.1
= control target key start
LH: loop header
LB: loop body
LE: loop exit
PB: predicated region body
PF: predicated region fallthrough
CT: control target
= control target key end

     0   :  { %vm91_vm0 = vcmask 326656   ;;  %vm736_vm1 = vcmask 64512   ;;  %vm10155_vm2 = vmmov 0   ;;  %vm8639_vm3 = vcmask 392192   ;;  %s12055_s2 = inlined_call_operand.vmem [shape: f32[4,40,8], index: 2, kind: input, shape index: {}]   ;;  %s12056_s0 = inlined_call_operand.vmem [shape: f32[4,96,40], index: 0, kind: input, shape index: {}]   ;;  %s12057_s3 = inlined_call_operand.vmem [shape: f32[6,8,8], index: 3, kind: input, shape index: {}]   ;;  %s12058_s1 = inlined_call_operand.vmem [shape: f32[96,8], index: 1, kind: input, shape index: {}]   ;;  %s12059_s4 = inlined_call_operand.vmem [shape: f32[16,48], index: 4, kind: input, shape index: {}]   ;;  %s12060_s5 = inlined_call_operand.vmem [shape: f32[16,8], index: 5, kind: input, shape index: {}]   ;;  %s12061_s6 = inlined_call_operand.vmem [shape: f32[2,16,8], index: 6, kind: output, shape index: {}]  }
   0x1   :  { %v71_v0 = vld [vmem:[%s12055_s2] sm:$0xff]  ;;  %v72_v1 = vld [vmem:[%s12055_s2 + $0x8] sm:$0xff]  ;;  %v77_v4 = vld [vmem:[%s12055_s2 + $0x30] sm:$0xff] }
   0x2   :  { %v76_v2 = vld [vmem:[%s12055_s2 + $0x28] sm:$0xff]  ;;  %v9892_v3 = vpack.c.bf16 %v72_v1, %v71_v0  ;;  %v73_v5 = vld [vmem:[%s12055_s2 + $0x10] sm:$0xff]  ;;  %v74_v6 = vld [vmem:[%s12055_s2 + $0x18] sm:$0xff] }
   0x3   :  { %v9900_v7 = vpack.c.bf16 %v77_v4, %v76_v2  ;;  %v9896_v8 = vpack.c.bf16 %v74_v6, %v73_v5  ;;  %v78_v9 = vld [vmem:[%s12055_s2 + $0x38] sm:$0xff]  ;;  %v79_v10 = vld [vmem:[%s12055_s2 + $0x40] sm:$0xff]  ;;  %v80_v15 = vld [vmem:[%s12055_s2 + $0x48] sm:$0xff] }
   0x4   :  { %9893 = vmatprep.subr.bf16.mxu0 %v9892_v3  ;;  %v9904_v11 = vpack.c.bf16 %v79_v10, %v78_v9  ;;  %v23_v12 = vld [vmem:[%s12056_s0] sm:$0xff]  ;;  %v81_v16 = vld [vmem:[%s12055_s2 + $0x50] sm:$0xff]  ;;  %v82_v17 = vld [vmem:[%s12055_s2 + $0x58] sm:$0xff] }
   0x5   :  { %9901 = vmatprep.subr.bf16.mxu1 %v9900_v7  ;;  %9895 = vmatpush3.bf16.msra.mxu0 %v9892_v3  ;;  %v35_v13 = vld [vmem:[%s12056_s0 + $0x60] sm:$0xff]  ;;  %v86_v18 = vld [vmem:[%s12055_s2 + $0x78] sm:$0xff]  ;;  %v24_v20 = vld [vmem:[%s12056_s0 + $0x8] sm:$0xff]  ;;  %v9908_v23 = vpack.c.bf16 %v82_v17, %v81_v16 }
   0x6   :  { %9903 = vmatpush3.bf16.msra.mxu1 %v9900_v7  ;;  %9897 = vmatprep.subr.bf16.mxu0 %v9896_v8  ;;  %v75_v14 = vld [vmem:[%s12055_s2 + $0x20] sm:$0xff]  ;;  %v36_v21 = vld [vmem:[%s12056_s0 + $0x68] sm:$0xff]  ;;  %v25_v22 = vld [vmem:[%s12056_s0 + $0x10] sm:$0xff] }
   0x7   :  { %9905 = vmatprep.subr.bf16.mxu1 %v9904_v11  ;;  %9300 = vmatprep.mubr.msk.f32.mxu0 %vm91_vm0, %v23_v12  ;;  %v87_v19 = vld [vmem:[%s12055_s2 + $0x80] sm:$0xff]  ;;  %v37_v24 = vld [vmem:[%s12056_s0 + $0x70] sm:$0xff]  ;;  %v84_v27 = vld [vmem:[%s12055_s2 + $0x68] sm:$0xff] }
   0x8   :  { %9328 = vmatprep.mubr.msk.f32.mxu1 %vm91_vm0, %v35_v13  ;;  %v9916_v25 = vpack.c.bf16 %v87_v19, %v86_v18  ;;  %v83_v26 = vld [vmem:[%s12055_s2 + $0x60] sm:$0xff]  ;;  %v88_v28 = vld [vmem:[%s12055_s2 + $0x88] sm:$0xff]  ;;  %v89_v29 = vld [vmem:[%s12055_s2 + $0x90] sm:$0xff] }
   0x9   :  { %9899 = vmatpush3.bf16.msra.mxu0 %v9896_v8  ;;  %v26_v30 = vld [vmem:[%s12056_s0 + $0x18] sm:$0xff]  ;;  %v27_v32 = vld [vmem:[%s12056_s0 + $0x20] sm:$0xff]  ;;  %v9912_v33 = vpack.c.bf16 %v84_v27, %v83_v26  ;;  %v9920_v35 = vpack.c.bf16 %v89_v29, %v88_v28  ;;  %v28_v36 = vld [vmem:[%s12056_s0 + $0x28] sm:$0xff] }
   0xa   :  { %9907 = vmatpush3.bf16.msra.mxu1 %v9904_v11  ;;  %9298 = vmatprep.subr.mxu0 %v75_v14  ;;  %v38_v31 = vld [vmem:[%s12056_s0 + $0x78] sm:$0xff]  ;;  %v39_v34 = vld [vmem:[%s12056_s0 + $0x80] sm:$0xff]  ;;  %v40_v37 = vld [vmem:[%s12056_s0 + $0x88] sm:$0xff] }
   0xb   :  { %9326 = vmatprep.subr.mxu1 %v80_v15  ;;  %v29_v38 = vld [vmem:[%s12056_s0 + $0x30] sm:$0xff]  ;;  %v90_v41 = vld [vmem:[%s12055_s2 + $0x98] sm:$0xff]  ;;  %v31_v44 = vld [vmem:[%s12056_s0 + $0x40] sm:$0xff] }
   0xc   :  { %v41_v39 = vld [vmem:[%s12056_s0 + $0x90] sm:$0xff]  ;;  %v30_v42 = vld [vmem:[%s12056_s0 + $0x38] sm:$0xff]  ;;  %v43_v45 = vld [vmem:[%s12056_s0 + $0xa0] sm:$0xff] }
   0xd   :  { %9299 = vmatpush3.msra.mxu0 %v75_v14  ;;  %v85_v40 = vld [vmem:[%s12055_s2 + $0x70] sm:$0xff]  ;;  %v42_v43 = vld [vmem:[%s12056_s0 + $0x98] sm:$0xff]  ;;  %v32_v46 = vld [vmem:[%s12056_s0 + $0x48] sm:$0xff] }
   0xe   :  { %9327 = vmatpush3.msra.mxu1 %v80_v15  ;;  %9301 = vmatmul.mubr.msk.f32.vlgmr.msra.gmra.mrb[0].mxu0 %vm91_vm0, %v24_v20  ;;  %v44_v47 = vld [vmem:[%s12056_s0 + $0xa8] sm:$0xff]  ;;  %v33_v48 = vld [vmem:[%s12056_s0 + $0x50] sm:$0xff]  ;;  %v34_v50 = vld [vmem:[%s12056_s0 + $0x58] sm:$0xff] }
   0xf   :  { %9329 = vmatmul.mubr.msk.f32.vlgmr.msra.gmra.mrb[0].mxu1 %vm91_vm0, %v36_v21  ;;  %9303 = vmatprep.mubr.msk.f32.mxu0 %vm91_vm0, %v25_v22  ;;  %v45_v49 = vld [vmem:[%s12056_s0 + $0xb0] sm:$0xff]  ;;  %v46_v51 = vld [vmem:[%s12056_s0 + $0xb8] sm:$0xff]  ;;  %v47_v52 = vld [vmem:[%s12056_s0 + $0xc0] sm:$0xff] }
  0x10   :  { %9331 = vmatprep.mubr.msk.f32.mxu1 %vm91_vm0, %v37_v24  ;;  %9909 = vmatprep.subr.bf16.mxu0 %v9908_v23  ;;  %v59_v53 = vld [vmem:[%s12056_s0 + $0x120] sm:$0xff]  ;;  %v48_v54 = vld [vmem:[%s12056_s0 + $0xc8] sm:$0xff]  ;;  %v49_v56 = vld [vmem:[%s12056_s0 + $0xd0] sm:$0xff] }
  0x11   :  { %9917 = vmatprep.subr.bf16.mxu1 %v9916_v25  ;;  %9911 = vmatpush3.bf16.msra.mxu0 %v9908_v23  ;;  %v60_v55 = vld [vmem:[%s12056_s0 + $0x128] sm:$0xff]  ;;  %v61_v57 = vld [vmem:[%s12056_s0 + $0x130] sm:$0xff]  ;;  %v50_v58 = vld [vmem:[%s12056_s0 + $0xd8] sm:$0xff] }
  0x12   :  { %9304 = vmatmul.mubr.msk.f32.gmra.mrb[2].mxu0 %vm91_vm0, %v26_v30  ;;  %9919 = vmatpush3.bf16.msra.mxu1 %v9916_v25  ;;  %v62_v59 = vld [vmem:[%s12056_s0 + $0x138] sm:$0xff]  ;;  %v51_v60 = vld [vmem:[%s12056_s0 + $0xe0] sm:$0xff]  ;;  %v52_v62 = vld [vmem:[%s12056_s0 + $0xe8] sm:$0xff] }
  0x13   :  { %9332 = vmatmul.mubr.msk.f32.gmra.mrb[2].mxu1 %vm91_vm0, %v38_v31  ;;  %9306 = vmatprep.mubr.msk.f32.mxu0 %vm91_vm0, %v27_v32  ;;  %v63_v61 = vld [vmem:[%s12056_s0 + $0x140] sm:$0xff]  ;;  %v64_v63 = vld [vmem:[%s12056_s0 + $0x148] sm:$0xff]  ;;  %v53_v0 = vld [vmem:[%s12056_s0 + $0xf0] sm:$0xff] }
  0x14   :  { %9334 = vmatprep.mubr.msk.f32.mxu1 %vm91_vm0, %v39_v34  ;;  %9913 = vmatprep.subr.bf16.mxu0 %v9912_v33  ;;  %v65_v1 = vld [vmem:[%s12056_s0 + $0x150] sm:$0xff]  ;;  %v54_v2 = vld [vmem:[%s12056_s0 + $0xf8] sm:$0xff]  ;;  %v55_v4 = vld [vmem:[%s12056_s0 + $0x100] sm:$0xff] }
  0x15   :  { %9921 = vmatprep.subr.bf16.mxu1 %v9920_v35  ;;  %9915 = vmatpush3.bf16.msra.mxu0 %v9912_v33  ;;  %v66_v3 = vld [vmem:[%s12056_s0 + $0x158] sm:$0xff]  ;;  %v67_v5 = vld [vmem:[%s12056_s0 + $0x160] sm:$0xff]  ;;  %v56_v6 = vld [vmem:[%s12056_s0 + $0x108] sm:$0xff] }
  0x16   :  { %9307 = vmatmul.mubr.msk.f32.gmra.mrb[4].mxu0 %vm91_vm0, %v28_v36  ;;  %9923 = vmatpush3.bf16.msra.mxu1 %v9920_v35  ;;  %v68_v7 = vld [vmem:[%s12056_s0 + $0x168] sm:$0xff]  ;;  %v57_v8 = vld [vmem:[%s12056_s0 + $0x110] sm:$0xff]  ;;  %v58_v10 = vld [vmem:[%s12056_s0 + $0x118] sm:$0xff] }
  0x17   :  { %9335 = vmatmul.mubr.msk.f32.gmra.mrb[4].mxu1 %vm91_vm0, %v40_v37  ;;  %9309 = vmatprep.mubr.msk.f32.mxu0 %vm91_vm0, %v29_v38  ;;  %v69_v9 = vld [vmem:[%s12056_s0 + $0x170] sm:$0xff]  ;;  %v70_v11 = vld [vmem:[%s12056_s0 + $0x178] sm:$0xff] }
  0x18   :  { %9337 = vmatprep.mubr.msk.f32.mxu1 %vm91_vm0, %v41_v39  ;;  %9354 = vmatprep.subr.mxu0 %v85_v40 }
  0x19   :  { %9382 = vmatprep.subr.mxu1 %v90_v41  ;;  %9355 = vmatpush3.msra.mxu0 %v85_v40 }
  0x1a   :  { %9310 = vmatmul.mubr.msk.f32.gmra.mrb[6].mxu0 %vm91_vm0, %v30_v42  ;;  %9383 = vmatpush3.msra.mxu1 %v90_v41 }
  0x1b   :  { %9338 = vmatmul.mubr.msk.f32.gmra.mrb[6].mxu1 %vm91_vm0, %v42_v43  ;;  %9312 = vmatprep.mubr.msk.f32.mxu0 %vm91_vm0, %v31_v44 }
  0x1c   :  { %9340 = vmatprep.mubr.msk.f32.mxu1 %vm91_vm0, %v43_v45 }
  0x1e   :  { %9313 = vmatmul.mubr.msk.f32.gmra.mrb[8].mxu0 %vm91_vm0, %v32_v46 }
  0x1f   :  { %9341 = vmatmul.mubr.msk.f32.gmra.mrb[8].mxu1 %vm91_vm0, %v44_v47  ;;  %9315 = vmatprep.mubr.msk.f32.mxu0 %vm91_vm0, %v33_v48 }
  0x20   :  { %9343 = vmatprep.mubr.msk.f32.mxu1 %vm91_vm0, %v45_v49 }
  0x22   :  { %9316 = vmatmul.mubr.msk.f32.gmra.mrb[10].mxu0 %vm91_vm0, %v34_v50 }
  0x23   :  { %9344 = vmatmul.mubr.msk.f32.gmra.mrb[10].mxu1 %vm91_vm0, %v46_v51  ;;  %9356 = vmatprep.mubr.msk.f32.mxu0 %vm91_vm0, %v47_v52 }
  0x24   :  { %9384 = vmatprep.mubr.msk.f32.mxu1 %vm91_vm0, %v59_v53 }
  0x26   :  { %9357 = vmatmul.mubr.msk.f32.vlgmr.msra.gmra.mrb[12].mxu0 %vm91_vm0, %v48_v54 }
  0x27   :  { %9385 = vmatmul.mubr.msk.f32.vlgmr.msra.gmra.mrb[12].mxu1 %vm91_vm0, %v60_v55  ;;  %9359 = vmatprep.mubr.msk.f32.mxu0 %vm91_vm0, %v49_v56 }
  0x28   :  { %9387 = vmatprep.mubr.msk.f32.mxu1 %vm91_vm0, %v61_v57 }
  0x2a   :  { %9360 = vmatmul.mubr.msk.f32.gmra.mrb[14].mxu0 %vm91_vm0, %v50_v58 }
  0x2b   :  { %9388 = vmatmul.mubr.msk.f32.gmra.mrb[14].mxu1 %vm91_vm0, %v62_v59  ;;  %9362 = vmatprep.mubr.msk.f32.mxu0 %vm91_vm0, %v51_v60 }
  0x2c   :  { %9390 = vmatprep.mubr.msk.f32.mxu1 %vm91_vm0, %v63_v61 }
  0x2e   :  { %9363 = vmatmul.mubr.msk.f32.gmra.mrb[16].mxu0 %vm91_vm0, %v52_v62 }
  0x2f   :  { %9391 = vmatmul.mubr.msk.f32.gmra.mrb[16].mxu1 %vm91_vm0, %v64_v63  ;;  %9365 = vmatprep.mubr.msk.f32.mxu0 %vm91_vm0, %v53_v0 }
  0x30   :  { %9393 = vmatprep.mubr.msk.f32.mxu1 %vm91_vm0, %v65_v1 }
  0x32   :  { %9366 = vmatmul.mubr.msk.f32.gmra.mrb[18].mxu0 %vm91_vm0, %v54_v2 }
  0x33   :  { %9394 = vmatmul.mubr.msk.f32.gmra.mrb[18].mxu1 %vm91_vm0, %v66_v3  ;;  %9368 = vmatprep.mubr.msk.f32.mxu0 %vm91_vm0, %v55_v4 }
  0x34   :  { %9396 = vmatprep.mubr.msk.f32.mxu1 %vm91_vm0, %v67_v5 }
  0x36   :  { %9369 = vmatmul.mubr.msk.f32.gmra.mrb[20].mxu0 %vm91_vm0, %v56_v6 }
  0x37   :  { %9397 = vmatmul.mubr.msk.f32.gmra.mrb[20].mxu1 %vm91_vm0, %v68_v7  ;;  %9371 = vmatprep.mubr.msk.f32.mxu0 %vm91_vm0, %v57_v8 }
  0x38   :  { %9399 = vmatprep.mubr.msk.f32.mxu1 %vm91_vm0, %v69_v9 }
  0x3a   :  { %9372 = vmatmul.mubr.msk.f32.gmra.mrb[22].mxu0 %vm91_vm0, %v58_v10 }
  0x3b   :  { %9400 = vmatmul.mubr.msk.f32.gmra.mrb[22].mxu1 %vm91_vm0, %v70_v11 }
  0xe1   :  { %v10443_v12 = vpop.f32.mrb[0].mxu0 }
  0xe2   :  { %v10445_v13 = vpop.f32.mrb[0].mxu1  ;;  %v10447_v14 = vpop.f32.mrb[1].mxu0  ;;  %v744_v17 = vsel %vm736_vm1, %v10443_v12, 0.0 }
  0xe3   :  { %v10449_v15 = vpop.f32.mrb[1].mxu1  ;;  %v828_v20 = vsel %vm736_vm1, %v10445_v13, 0.0  ;;  %v745_v22 = vrot.slane %v744_v17, 4  ;;  %v737_v25 = vsel %vm736_vm1, %v10447_v14, 0.0 }
  0xe4   :  { %v829_v24 = vrot.slane %v828_v20, 4  ;;  %v821_v28 = vsel %vm736_vm1, %v10449_v15, 0.0  ;;  %v738_v31 = vrot.slane %v737_v25, 4 }
  0xe5   :  { %v10451_v16 = vpop.f32.mrb[2].mxu0  ;;  %v746_v30 = vadd.f32 %v745_v22, %v744_v17  ;;  %v822_v34 = vrot.slane %v821_v28, 4 }
  0xe6   :  { %v10455_v18 = vpop.f32.mrb[2].mxu1  ;;  %v10457_v19 = vpop.f32.mrb[3].mxu0  ;;  %v830_v33 = vadd.f32 %v829_v24, %v828_v20  ;;  %v758_v37 = vsel %vm736_vm1, %v10451_v16, 0.0  ;;  %v739_v40 = vadd.f32 %v738_v31, %v737_v25 }
  0xe7   :  { %v10461_v21 = vpop.f32.mrb[3].mxu1  ;;  %v747_v39 = vrot.slane %v746_v30, 2  ;;  %v823_v43 = vadd.f32 %v822_v34, %v821_v28  ;;  %v759_v44 = vrot.slane %v758_v37, 4  ;;  %v842_v45 = vsel %vm736_vm1, %v10455_v18, 0.0 }
  0xe8   :  { %v831_v42 = vrot.slane %v830_v33, 2  ;;  %v740_v50 = vrot.slane %v739_v40, 2  ;;  %v843_v51 = vrot.slane %v842_v45, 4  ;;  %v751_v59 = vsel %vm736_vm1, %v10457_v19, 0.0 }
  0xe9   :  { %v10463_v23 = vpop.f32.mrb[4].mxu0  ;;  %v748_v49 = vadd.f32 %v747_v39, %v746_v30  ;;  %v824_v54 = vrot.slane %v823_v43, 2  ;;  %v760_v55 = vadd.f32 %v759_v44, %v758_v37  ;;  %v752_v5 = vrot.slane %v751_v59, 4 }
  0xea   :  { %v10467_v26 = vpop.f32.mrb[4].mxu1  ;;  %v10469_v27 = vpop.f32.mrb[5].mxu0  ;;  %v832_v53 = vadd.f32 %v831_v42, %v830_v33  ;;  %v741_v61 = vadd.f32 %v740_v50, %v739_v40  ;;  %v844_v62 = vadd.f32 %v843_v51, %v842_v45  ;;  %v835_v28 = vsel %vm736_vm1, %v10461_v21, 0.0 }
  0xeb   :  { %v10473_v29 = vpop.f32.mrb[5].mxu1  ;;  %v749_v60 = vrot.slane %v748_v49, 1  ;;  %v825_v1 = vadd.f32 %v824_v54, %v823_v43  ;;  %v761_v2 = vrot.slane %v760_v55, 2  ;;  %v753_v25 = vadd.f32 %v752_v5, %v751_v59 }
  0xec   :  { %v833_v0 = vrot.slane %v832_v53, 1  ;;  %v742_v8 = vrot.slane %v741_v61, 1  ;;  %v845_v9 = vrot.slane %v844_v62, 2  ;;  %v836_v43 = vrot.slane %v835_v28, 4 }
  0xed   :  { %v10475_v32 = vpop.f32.mrb[6].mxu0  ;;  %v750_v7 = vadd.f32 %v749_v60, %v748_v49  ;;  %v826_v17 = vrot.slane %v825_v1, 1  ;;  %v762_v20 = vadd.f32 %v761_v2, %v760_v55  ;;  %v754_v45 = vrot.slane %v753_v25, 2 }
  0xee   :  { %v10477_v35 = vpop.f32.mrb[6].mxu1  ;;  %v10479_v36 = vpop.f32.mrb[7].mxu0  ;;  %v834_v11 = vadd.f32 %v833_v0, %v832_v53  ;;  %v743_v33 = vadd.f32 %v742_v8, %v741_v61  ;;  %v846_v34 = vadd.f32 %v845_v9, %v844_v62  ;;  %v837_v60 = vadd.f32 %v836_v43, %v835_v28 }
  0xef   :  { %v10483_v38 = vpop.f32.mrb[7].mxu1  ;;  %v1075_v31 = vmul.f32 0.125, %v750_v7  ;;  %v827_v40 = vadd.f32 %v826_v17, %v825_v1  ;;  %v763_v42 = vrot.slane %v762_v20, 1  ;;  %v755_v61 = vadd.f32 %v754_v45, %v753_v25 }
  0xf0   :  { %v1087_v39 = vmul.f32 0.125, %v834_v11  ;;  %v1074_v51 = vmul.f32 0.125, %v743_v33  ;;  %v847_v53 = vrot.slane %v846_v34, 1  ;;  %v772_v62 = vsel %vm736_vm1, %v10463_v23, 0.0 }
  0xf1   :  { %v10485_v41 = vpop.f32.mrb[8].mxu0  ;;  %v10530_v50 = vsub.f32 %v10443_v12, %v1075_v31  ;;  %v1086_v55 = vmul.f32 0.125, %v827_v40  ;;  %v764_v59 = vadd.f32 %v763_v42, %v762_v20  ;;  %v838_v7 = vrot.slane %v837_v60, 2 }
  0xf2   :  { %v10489_v46 = vpop.f32.mrb[8].mxu1  ;;  %v10491_v47 = vpop.f32.mrb[9].mxu0  ;;  %v10533_v54 = vsub.f32 %v10445_v13, %v1087_v39  ;;  %v10540_v1 = vsub.f32 %v10447_v14, %v1074_v51  ;;  %v848_v12 = vadd.f32 %v847_v53, %v846_v34  ;;  %v756_v8 = vrot.slane %v755_v61, 1 }
  0xf3   :  { %v10493_v48 = vpop.f32.mrb[9].mxu1  ;;  %v1171_v0 = vmul.f32 %v10530_v50, %v10530_v50  ;;  %v10545_v13 = vsub.f32 %v10449_v15, %v1086_v55  ;;  %v1077_v5 = vmul.f32 0.125, %v764_v59  ;;  %v773_v9 = vrot.slane %v772_v62, 4 }
  0xf4   :  { %v1183_v2 = vmul.f32 %v10533_v54, %v10533_v54  ;;  %v1170_v20 = vmul.f32 %v10540_v1, %v10540_v1  ;;  %v1089_v14 = vmul.f32 0.125, %v848_v12  ;;  %v839_v31 = vadd.f32 %v838_v7, %v837_v60 }
  0xf5   :  { %v10495_v52 = vpop.f32.mrb[10].mxu0  ;;  %v1225_v17 = vsel %vm736_vm1, %v1171_v0, 0.0  ;;  %v1182_v28 = vmul.f32 %v10545_v13, %v10545_v13  ;;  %v10556_v15 = vsub.f32 %v10451_v16, %v1077_v5  ;;  %v757_v33 = vadd.f32 %v756_v8, %v755_v61 }
  0xf6   :  { %v10497_v56 = vpop.f32.mrb[10].mxu1  ;;  %v10499_v57 = vpop.f32.mrb[11].mxu0  ;;  %v1309_v25 = vsel %vm736_vm1, %v1183_v2, 0.0  ;;  %v774_v34 = vadd.f32 %v773_v9, %v772_v62  ;;  %v1226_v39 = vrot.slane %v1225_v17, 4  ;;  %v765_v40 = vsel %vm736_vm1, %v10469_v27, 0.0 }
  0xf7   :  { %v10501_v58 = vpop.f32.mrb[11].mxu1  ;;  %v1310_v42 = vrot.slane %v1309_v25, 4  ;;  %v1218_v43 = vsel %vm736_vm1, %v1170_v20, 0.0  ;;  %v10562_v45 = vsub.f32 %v10455_v18, %v1089_v14  ;;  %v1302_v53 = vsel %vm736_vm1, %v1182_v28, 0.0 }
  0xf8   :  { %12108 = vst [vmem:[#allocation2_spill] sm:$0xff] %v10501_v58  ;;  %v1173_v16 = vmul.f32 %v10556_v15, %v10556_v15  ;;  %v840_v55 = vrot.slane %v839_v31, 1  ;;  %v1076_v59 = vmul.f32 0.125, %v757_v33  ;;  %v775_v60 = vrot.slane %v774_v34, 2 }
  0xf9   :  { %v10505_v63 = vpop.f32.mrb[12].mxu0  ;;  %v856_v61 = vsel %vm736_vm1, %v10467_v26, 0.0  ;;  %v766_v62 = vrot.slane %v765_v40, 4  ;;  %v1227_v0 = vadd.f32 %v1226_v39, %v1225_v17  ;;  %v1219_v12 = vrot.slane %v1218_v43, 4 }
  0xfa   :  { %12109 = vst [vmem:[#allocation3_spill] sm:$0xff] %v10505_v63  ;;  %v10507_v3 = vpop.f32.mrb[12].mxu1  ;;  %v10509_v4 = vpop.f32.mrb[13].mxu0  ;;  %v1311_v18 = vadd.f32 %v1310_v42, %v1309_v25  ;;  %v1303_v5 = vrot.slane %v1302_v53, 4  ;;  %v1185_v7 = vmul.f32 %v10562_v45, %v10562_v45  ;;  %v1239_v8 = vsel %vm736_vm1, %v1173_v16, 0.0 }
  0xfb   :  { %12110 = vst [vmem:[#allocation4_spill] sm:$0xff] %v10507_v3  ;;  %12111 = vst [vmem:[#allocation5_spill] sm:$0xff] %v10509_v4  ;;  %v10511_v6 = vpop.f32.mrb[13].mxu1  ;;  %v841_v9 = vadd.f32 %v840_v55, %v839_v31  ;;  %v857_v20 = vrot.slane %v856_v61, 4  ;;  %v10577_v14 = vsub.f32 %v10457_v19, %v1076_v59  ;;  %v776_v28 = vadd.f32 %v775_v60, %v774_v34 }
  0xfc   :  { %12112 = vst [vmem:[#allocation6_spill] sm:$0xff] %v10511_v6  ;;  %v767_v33 = vadd.f32 %v766_v62, %v765_v40  ;;  %v786_v17 = vsel %vm736_vm1, %v10475_v32, 0.0  ;;  %v1228_v39 = vrot.slane %v1227_v0, 2  ;;  %v849_v25 = vsel %vm736_vm1, %v10473_v29, 0.0 }
  0xfd   :  { %v10513_v10 = vpop.f32.mrb[14].mxu0  ;;  %v1312_v42 = vrot.slane %v1311_v18, 2  ;;  %v1323_v16 = vsel %vm736_vm1, %v1185_v7, 0.0  ;;  %v1088_v31 = vmul.f32 0.125, %v841_v9  ;;  %v858_v55 = vadd.f32 %v857_v20, %v856_v61 }
  0xfe   :  { %12113 = vst [vmem:[#allocation7_spill] sm:$0xff] %v10513_v10  ;;  %v10515_v22 = vpop.f32.mrb[14].mxu1  ;;  %v10517_v24 = vpop.f32.mrb[15].mxu0  ;;  %v1172_v19 = vmul.f32 %v10577_v14, %v10577_v14  ;;  %v777_v34 = vrot.slane %v776_v28, 1  ;;  %v768_v40 = vrot.slane %v767_v33, 2  ;;  %v850_v59 = vrot.slane %v849_v25, 4 }
  0xff   :  { %12114 = vst [vmem:[#allocation8_spill] sm:$0xff] %v10515_v22  ;;  %12115 = vst [vmem:[#allocation9_spill] sm:$0xff] %v10517_v24  ;;  %v10521_v30 = vpop.f32.mrb[15].mxu1  ;;  %v1229_v60 = vadd.f32 %v1228_v39, %v1227_v0  ;;  %v870_v7 = vsel %vm736_vm1, %v10477_v35, 0.0 }
 0x100   :  { %12116 = vst [vmem:[#allocation10_spill] sm:$0xff] %v10521_v30  ;;  %v1232_v20 = vsel %vm736_vm1, %v1172_v19, 0.0  ;;  %v778_v0 = vadd.f32 %v777_v34, %v776_v28  ;;  %v769_v39 = vadd.f32 %v768_v40, %v767_v33  ;;  %v851_v30 = vadd.f32 %v850_v59, %v849_v25 }
 0x101   :  { %v10523_v37 = vpop.f32.mrb[16].mxu0  ;;  %v871_v22 = vrot.slane %v870_v7, 4 }
 0x102   :  { %12117 = vst [vmem:[#allocation11_spill] sm:$0xff] %v10523_v37  ;;  %v10525_v44 = vpop.f32.mrb[16].mxu1  ;;  %v10527_v49 = vpop.f32.mrb[17].mxu0  ;;  %v1079_v19 = vmul.f32 0.125, %v778_v0  ;;  %v770_v28 = vrot.slane %v769_v39, 1  ;;  %v852_v33 = vrot.slane %v851_v30, 2 }
 0x103   :  { %12118 = vst [vmem:[#allocation12_spill] sm:$0xff] %v10525_v44  ;;  %12119 = vst [vmem:[#allocation13_spill] sm:$0xff] %v10527_v49  ;;  %v10547_v11 = vpop.f32.mrb[17].mxu1  ;;  %v1240_v49 = vrot.slane %v1239_v8, 4  ;;  %v872_v40 = vadd.f32 %v871_v22, %v870_v7 }
 0x104   :  { %12120 = vst [vmem:[#allocation14_spill] sm:$0xff] %v10547_v11  ;;  %v787_v11 = vrot.slane %v786_v17, 4  ;;  %v771_v0 = vadd.f32 %v770_v28, %v769_v39  ;;  %v853_v63 = vadd.f32 %v852_v33, %v851_v30 }
 0x105   :  { %v10564_v51 = vpop.f32.mrb[18].mxu0  ;;  %v1241_v44 = vadd.f32 %v1240_v49, %v1239_v8  ;;  %v873_v22 = vrot.slane %v872_v40, 2 }
 0x106   :  { %12121 = vst [vmem:[#allocation15_spill] sm:$0xff] %v10564_v51  ;;  %v10571_v2 = vpop.f32.mrb[18].mxu1  ;;  %v1220_v51 = vadd.f32 %v1219_v12, %v1218_v43  ;;  %v1324_v43 = vrot.slane %v1323_v16, 4  ;;  %v1313_v12 = vadd.f32 %v1312_v42, %v1311_v18  ;;  %v10586_v24 = vpop.f32.mrb[19].mxu0  ;;  %v788_v61 = vadd.f32 %v787_v11, %v786_v17 }
 0x107   :  { %12122 = vst [vmem:[#allocation16_spill] sm:$0xff] %v10571_v2  ;;  %v1304_v2 = vadd.f32 %v1303_v5, %v1302_v53  ;;  %12123 = vst [vmem:[#allocation17_spill] sm:$0xff] %v10586_v24  ;;  %v10589_v53 = vsub.f32 %v10461_v21, %v1088_v31  ;;  %v859_v5 = vrot.slane %v858_v55, 2  ;;  %v10593_v9 = vpop.f32.mrb[19].mxu1  ;;  %v1230_v18 = vrot.slane %v1229_v60, 1 }
 0x108   :  { %v1221_v62 = vrot.slane %v1220_v51, 2  ;;  %12125 = vst [vmem:[#allocation19_spill] sm:$0xff] %v10593_v9  ;;  %v1325_v49 = vadd.f32 %v1324_v43, %v1323_v16  ;;  %v1242_v24 = vrot.slane %v1241_v44, 2  ;;  %v779_v21 = vsel %vm736_vm1, %v10479_v36, 0.0 }
 0x109   :  { %v1305_v37 = vrot.slane %v1304_v2, 2  ;;  %12124 = vst [vmem:[#allocation18_spill] sm:$0xff] %v10589_v53  ;;  %v1233_v11 = vrot.slane %v1232_v20, 4  ;;  %v1184_v17 = vmul.f32 %v10589_v53, %v10589_v53  ;;  %v860_v31 = vadd.f32 %v859_v5, %v858_v55  ;;  %v10600_v59 = vpop.f32.mrb[20].mxu0 }
 0x10a   :  { %v1222_v42 = vadd.f32 %v1221_v62, %v1220_v51  ;;  %v789_v9 = vrot.slane %v788_v61, 2  ;;  %v1314_v10 = vrot.slane %v1313_v12, 1  ;;  %v1326_v34 = vrot.slane %v1325_v49, 2 }
 0x10b   :  { %v1306_v8 = vadd.f32 %v1305_v37, %v1304_v2  ;;  %v780_v51 = vrot.slane %v779_v21, 4  ;;  %v1231_v16 = vadd.f32 %v1230_v18, %v1229_v60  ;;  %v1243_v2 = vadd.f32 %v1242_v24, %v1241_v44 }
 0x10c   :  { %v1223_v25 = vrot.slane %v1222_v42, 1  ;;  %v1234_v62 = vadd.f32 %v1233_v11, %v1232_v20  ;;  %v1316_v43 = vsel %vm736_vm1, %v1184_v17, 0.0  ;;  %v861_v6 = vrot.slane %v860_v31, 1  ;;  %v10606_v17 = vpop.f32.mrb[20].mxu1 }
 0x10d   :  { %v1307_v37 = vrot.slane %v1306_v8, 1  ;;  %v790_v4 = vadd.f32 %v789_v9, %v788_v61  ;;  %v1315_v55 = vadd.f32 %v1314_v10, %v1313_v12  ;;  %v10604_v5 = vsub.f32 %v10463_v23, %v1079_v19 }
 0x10e   :  { %v1224_v58 = vadd.f32 %v1223_v25, %v1222_v42  ;;  %v1327_v53 = vadd.f32 %v1326_v34, %v1325_v49  ;;  %v781_v3 = vadd.f32 %v780_v51, %v779_v21  ;;  %v1555_v60 = vmul.f32 0.125, %v1231_v16 }
 0x10f   :  { %v1244_v18 = vrot.slane %v1243_v2, 1  ;;  %v1317_v24 = vrot.slane %v1316_v43, 4  ;;  %v1308_v44 = vadd.f32 %v1307_v37, %v1306_v8  ;;  %v1235_v7 = vrot.slane %v1234_v62, 2 }
 0x110   :  { %v862_v20 = vadd.f32 %v861_v6, %v860_v31  ;;  %v791_v11 = vrot.slane %v790_v4, 1  ;;  %v1567_v61 = vmul.f32 0.125, %v1315_v55  ;;  %v1175_v23 = vmul.f32 %v10604_v5, %v10604_v5 }
 0x111   :  { %v1078_v10 = vmul.f32 0.125, %v771_v0  ;;  %v854_v12 = vrot.slane %v853_v63, 1  ;;  %v1554_v30 = vmul.f32 0.125, %v1224_v58  ;;  %v1328_v9 = vrot.slane %v1327_v53, 1 }
 0x112   :  { %v782_v39 = vrot.slane %v781_v3, 2  ;;  %v863_v42 = vsel %vm736_vm1, %v10483_v38, 0.0  ;;  %v1603_v49 = vadd.f32 1e-05, %v1555_v60  ;;  %v1245_v21 = vadd.f32 %v1244_v18, %v1243_v2 }
 0x113   :  { %v1318_v8 = vadd.f32 %v1317_v24, %v1316_v43  ;;  %v874_v19 = vadd.f32 %v873_v22, %v872_v40  ;;  %v1566_v6 = vmul.f32 0.125, %v1308_v44  ;;  %v1236_v31 = vadd.f32 %v1235_v7, %v1234_v62  ;;  %v10621_v44 = vpop.f32.mrb[21].mxu0 }
 0x114   :  { %v1091_v28 = vmul.f32 0.125, %v862_v20  ;;  %v792_v33 = vadd.f32 %v791_v11, %v790_v4  ;;  %v1253_v25 = vsel %vm736_vm1, %v1175_v23, 0.0  ;;  %v10614_v34 = vsub.f32 %v10469_v27, %v1078_v10 }
 0x115   :  { %v855_v51 = vadd.f32 %v854_v12, %v853_v63  ;;  %v864_v58 = vrot.slane %v863_v42, 4  ;;  %v1615_v16 = vadd.f32 1e-05, %v1567_v61  ;;  %v1602_v37 = vadd.f32 1e-05, %v1554_v30  ;;  %v10630_v30 = vpop.f32.mrb[21].mxu1 }
 0x116   :  { %v1329_v55 = vadd.f32 %v1328_v9, %v1327_v53  ;;  %v783_v0 = vadd.f32 %v782_v39, %v781_v3  ;;  %9950 = vrsqrt.f32 %v1603_v49  ;;  %v1557_v60 = vmul.f32 0.125, %v1245_v21 }
 0x117   :  { %v1319_v2 = vrot.slane %v1318_v8, 2  ;;  %v875_v43 = vrot.slane %v874_v19, 1  ;;  %v1237_v40 = vrot.slane %v1236_v31, 1  ;;  %v1254_v18 = vrot.slane %v1253_v25, 4 }
 0x118   :  { %v10617_v62 = vsub.f32 %v10467_v26, %v1091_v28  ;;  %v1081_v4 = vmul.f32 0.125, %v792_v33  ;;  %v1614_v24 = vadd.f32 1e-05, %v1566_v6  ;;  %v1174_v27 = vmul.f32 %v10614_v34, %v10614_v34 }
 0x119   :  { %v1090_v63 = vmul.f32 0.125, %v855_v51  ;;  %v865_v22 = vadd.f32 %v864_v58, %v863_v42  ;;  %9952 = vrsqrt.f32 %v1615_v16  ;;  %v1569_v3 = vmul.f32 0.125, %v1329_v55 }
 0x11a   :  { %12126 = vst [vmem:[#allocation20_spill] sm:$0xff] %v10617_v62  ;;  %v784_v53 = vrot.slane %v783_v0, 1  ;;  %v800_v7 = vsel %vm736_vm1, %v10485_v41, 0.0  ;;  %9954 = vrsqrt.f32 %v1602_v37  ;;  %v1605_v20 = vadd.f32 1e-05, %v1557_v60 }
 0x11b   :  { %v1320_v11 = vadd.f32 %v1319_v2, %v1318_v8  ;;  %v876_v26 = vadd.f32 %v875_v43, %v874_v19  ;;  %v1238_v61 = vadd.f32 %v1237_v40, %v1236_v31  ;;  %v1255_v23 = vadd.f32 %v1254_v18, %v1253_v25  ;;  %v10646_v40 = vpop.f32.mrb[22].mxu0 }
 0x11c   :  { %v1187_v10 = vmul.f32 %v10617_v62, %v10617_v62  ;;  %v10628_v12 = vsub.f32 %v10475_v32, %v1081_v4  ;;  %v1246_v9 = vsel %vm736_vm1, %v1174_v27, 0.0  ;;  %v10634_v39 = vsub.f32 %v10473_v29, %v1090_v63 }
 0x11d   :  { %v866_v42 = vrot.slane %v865_v22, 2  ;;  %v801_v49 = vrot.slane %v800_v7, 4  ;;  %9956 = vrsqrt.f32 %v1614_v24  ;;  %v1617_v21 = vadd.f32 1e-05, %v1569_v3 }
 0x11e   :  { %12127 = vst [vmem:[#allocation21_spill] sm:$0xff] %v10634_v39  ;;  %v785_v8 = vadd.f32 %v784_v53, %v783_v0  ;;  %9958 = vrsqrt.f32 %v1605_v20  ;;  %v1321_v19 = vrot.slane %v1320_v11, 1  ;;  %v1093_v6 = vmul.f32 0.125, %v876_v26 }
 0x11f   :  { %v884_v31 = vsel %vm736_vm1, %v10489_v46, 0.0  ;;  %v1256_v32 = vrot.slane %v1255_v23, 2  ;;  %v1337_v28 = vsel %vm736_vm1, %v1187_v10, 0.0  ;;  %v1247_v33 = vrot.slane %v1246_v9, 4 }
 0x120   :  { %v1177_v25 = vmul.f32 %v10628_v12, %v10628_v12  ;;  %v9951_v29 = vpop.eup %9950  ;;  %v1556_v51 = vmul.f32 0.125, %v1238_v61  ;;  %v1186_v58 = vmul.f32 %v10634_v39, %v10634_v39  ;;  %v867_v16 = vadd.f32 %v866_v42, %v865_v22 }
 0x121   :  { %v802_v37 = vadd.f32 %v801_v49, %v800_v7  ;;  %v1080_v55 = vmul.f32 0.125, %v785_v8  ;;  %v885_v0 = vrot.slane %v884_v31, 4  ;;  %9960 = vrsqrt.f32 %v1617_v21 }
 0x122   :  { %v1322_v60 = vadd.f32 %v1321_v19, %v1320_v11  ;;  %v1338_v2 = vrot.slane %v1337_v28, 4  ;;  %v10644_v43 = vsub.f32 %v10477_v35, %v1093_v6  ;;  %v1257_v4 = vadd.f32 %v1256_v32, %v1255_v23  ;;  %v10660_v6 = vpop.f32.mrb[22].mxu1 }
 0x123   :  { %v9953_v18 = vpop.eup %9952  ;;  %v1248_v24 = vadd.f32 %v1247_v33, %v1246_v9  ;;  %v1267_v27 = vsel %vm736_vm1, %v1177_v25, 0.0  ;;  %v793_v63 = vsel %vm736_vm1, %v10491_v47, 0.0  ;;  %v1604_v3 = vadd.f32 1e-05, %v1556_v51 }
 0x124   :  { %12128 = vst [vmem:[#allocation22_spill] sm:$0xff] %v10644_v43  ;;  %v9955_v22 = vpop.eup %9954  ;;  %v1330_v53 = vsel %vm736_vm1, %v1186_v58, 0.0  ;;  %v868_v7 = vrot.slane %v867_v16, 1  ;;  %v803_v20 = vrot.slane %v802_v37, 2  ;;  %v10653_v11 = vmul.f32 %v9951_v29, %v10530_v50 }
 0x125   :  { %v10656_v35 = vsub.f32 %v10479_v36, %v1080_v55  ;;  %v886_v26 = vadd.f32 %v885_v0, %v884_v31  ;;  %v1339_v61 = vadd.f32 %v1338_v2, %v1337_v28  ;;  %v1268_v23 = vrot.slane %v1267_v27, 4 }
 0x126   :  { %v1189_v10 = vmul.f32 %v10644_v43, %v10644_v43  ;;  %v794_v9 = vrot.slane %v793_v63, 4  ;;  %v1568_v49 = vmul.f32 0.125, %v1322_v60  ;;  %v1258_v21 = vrot.slane %v1257_v4, 1 }
 0x127   :  { %v9957_v42 = vpop.eup %9956  ;;  %v1249_v8 = vrot.slane %v1248_v24, 2  ;;  %v1331_v19 = vrot.slane %v1330_v53, 4  ;;  %v10663_v50 = vmul.f32 %v9953_v18, %v10533_v54  ;;  %9962 = vrsqrt.f32 %v1604_v3  ;;  %v10674_v54 = vpop.f32.mrb[23].mxu0 }
 0x128   :  { %v9959_v32 = vpop.eup %9958  ;;  %v869_v36 = vadd.f32 %v868_v7, %v867_v16  ;;  %v804_v31 = vadd.f32 %v803_v20, %v802_v37  ;;  %v10666_v28 = vmul.f32 0.35355338, %v10653_v11  ;;  %v10669_v33 = vmul.f32 %v9955_v22, %v10540_v1 }
 0x129   :  { %12129 = vst [vmem:[#allocation23_spill] sm:$0xff] %v10663_v50  ;;  %v1176_v25 = vmul.f32 %v10656_v35, %v10656_v35  ;;  %v887_v29 = vrot.slane %v886_v26, 2  ;;  %v1340_v51 = vrot.slane %v1339_v61, 2  ;;  %v1269_v58 = vadd.f32 %v1268_v23, %v1267_v27  ;;  %v12137_v50 = vld [vmem:[#allocation4_spill] sm:$0xff] }
 0x12a   :  { %v1351_v55 = vsel %vm736_vm1, %v1189_v10, 0.0  ;;  %v795_v0 = vadd.f32 %v794_v9, %v793_v63  ;;  %v1616_v60 = vadd.f32 1e-05, %v1568_v49  ;;  %v1259_v16 = vadd.f32 %v1258_v21, %v1257_v4 }
 0x12b   :  { %v1250_v37 = vadd.f32 %v1249_v8, %v1248_v24  ;;  %v1332_v2 = vadd.f32 %v1331_v19, %v1330_v53  ;;  %v9961_v18 = vpop.eup %9960  ;;  %v10677_v3 = vmul.f32 %v9957_v42, %v10545_v13  ;;  %v10680_v1 = vmul.f32 %v9959_v32, %v10556_v15  ;;  %v10688_v42 = vpop.f32.mrb[23].mxu1 }
 0x12c   :  { %v1092_v22 = vmul.f32 0.125, %v869_v36  ;;  %v805_v7 = vrot.slane %v804_v31, 1  ;;  %v1352_v20 = vrot.slane %v1351_v55, 4  ;;  %v1260_v27 = vsel %vm736_vm1, %v1176_v25, 0.0 }
 0x12d   :  { %12130 = vst [vmem:[#allocation24_spill] sm:$0xff] %v10677_v3  ;;  %12131 = vst [vmem:[#allocation25_spill] sm:$0xff] %v10680_v1  ;;  %v888_v23 = vadd.f32 %v887_v29, %v886_v26  ;;  %v877_v63 = vsel %vm736_vm1, %v10493_v48, 0.0  ;;  %v10686_v4 = vmul.f32 0.35355338, %v10669_v33  ;;  %v1341_v24 = vadd.f32 %v1340_v51, %v1339_v61 }
 0x12e   :  { %v1270_v53 = vrot.slane %v1269_v58, 2  ;;  %v796_v10 = vrot.slane %v795_v0, 2  ;;  %9964 = vrsqrt.f32 %v1616_v60  ;;  %v1559_v13 = vmul.f32 0.125, %v1259_v16 }
 0x12f   :  { %v1251_v9 = vrot.slane %v1250_v37, 1  ;;  %v1333_v15 = vrot.slane %v1332_v2, 2  ;;  %v1261_v49 = vrot.slane %v1260_v27, 4  ;;  %v10691_v21 = vsub.f32 %v10483_v38, %v1092_v22 }
 0x130   :  { %v806_v26 = vadd.f32 %v805_v7, %v804_v31  ;;  %v878_v8 = vrot.slane %v877_v63, 4  ;;  %v10694_v19 = vmul.f32 0.35355338, %v10680_v1  ;;  %v10697_v32 = vmul.f32 %v9961_v18, %v10562_v45 }
 0x131   :  { %12132 = vst [vmem:[#allocation26_spill] sm:$0xff] %v10691_v21  ;;  %v1353_v61 = vadd.f32 %v1352_v20, %v1351_v55  ;;  %v889_v36 = vrot.slane %v888_v23, 1  ;;  %v9963_v25 = vpop.eup %9962  ;;  %v1342_v29 = vrot.slane %v1341_v24, 1  ;;  %v1271_v51 = vadd.f32 %v1270_v53, %v1269_v58 }
 0x132   :  { %12133 = vst [vmem:[#allocation27_spill] sm:$0xff] %v10694_v19  ;;  %12134 = vst [vmem:[#allocation28_spill] sm:$0xff] %v10697_v32  ;;  %v797_v60 = vadd.f32 %v796_v10, %v795_v0  ;;  %v814_v16 = vsel %vm736_vm1, %v10495_v52, 0.0  ;;  %v1607_v43 = vadd.f32 1e-05, %v1559_v13  ;;  %v1252_v38 = vadd.f32 %v1251_v9, %v1250_v37 }
 0x133   :  { %v1334_v22 = vadd.f32 %v1333_v15, %v1332_v2  ;;  %v807_v31 = vsel %vm736_vm1, %v10499_v57, 0.0  ;;  %v1262_v7 = vadd.f32 %v1261_v49, %v1260_v27  ;;  %v1188_v45 = vmul.f32 %v10691_v21, %v10691_v21 }
 0x134   :  { %v1083_v18 = vmul.f32 0.125, %v806_v26  ;;  %v879_v55 = vadd.f32 %v878_v8, %v877_v63  ;;  %v10706_v20 = vmul.f32 %v9963_v25, %v10577_v14  ;;  %v1354_v58 = vrot.slane %v1353_v61, 2 }
 0x135   :  { %v890_v0 = vadd.f32 %v889_v36, %v888_v23  ;;  %v815_v53 = vrot.slane %v814_v16, 4  ;;  %v1272_v10 = vrot.slane %v1271_v51, 1  ;;  %v798_v32 = vrot.slane %v797_v60, 1 }
 0x136   :  { %12135 = vst [vmem:[#allocation29_spill] sm:$0xff] %v10706_v20  ;;  %v898_v37 = vsel %vm736_vm1, %v10497_v56, 0.0  ;;  %v808_v2 = vrot.slane %v807_v31, 4  ;;  %9966 = vrsqrt.f32 %v1607_v43  ;;  %v1343_v13 = vadd.f32 %v1342_v29, %v1341_v24 }
 0x137   :  { %v1558_v27 = vmul.f32 0.125, %v1252_v38  ;;  %v1335_v9 = vrot.slane %v1334_v22, 1  ;;  %v1263_v15 = vrot.slane %v1262_v7, 2  ;;  %v1344_v49 = vsel %vm736_vm1, %v1188_v45, 0.0 }
 0x138   :  { %v10712_v63 = vsub.f32 %v10485_v41, %v1083_v18  ;;  %v880_v14 = vrot.slane %v879_v55, 2  ;;  %v9965_v26 = vpop.eup %9964  ;;  %v1355_v23 = vadd.f32 %v1354_v58, %v1353_v61  ;;  %v1095_v8 = vmul.f32 0.125, %v890_v0 }
 0x139   :  { %v816_v36 = vadd.f32 %v815_v53, %v814_v16  ;;  %v899_v25 = vrot.slane %v898_v37, 4  ;;  %v10715_v21 = vmul.f32 0.35355338, %v10706_v20  ;;  %v1273_v39 = vadd.f32 %v1272_v10, %v1271_v51  ;;  %v12158_v20 = vld [vmem:[#allocation10_spill] sm:$0xff] }
 0x13a   :  { %v799_v43 = vadd.f32 %v798_v32, %v797_v60  ;;  %v809_v24 = vadd.f32 %v808_v2, %v807_v31  ;;  %v1571_v29 = vmul.f32 0.125, %v1343_v13  ;;  %v1606_v38 = vadd.f32 1e-05, %v1558_v27  ;;  %v12139_v32 = vld [vmem:[#allocation18_spill] sm:$0xff] }
 0x13b   :  { %12136 = vst [vmem:[#allocation30_spill] sm:$0xff] %v10715_v21  ;;  %v1336_v62 = vadd.f32 %v1335_v9, %v1334_v22  ;;  %v1345_v3 = vrot.slane %v1344_v49, 4  ;;  %v1264_v45 = vadd.f32 %v1263_v15, %v1262_v7  ;;  %v1179_v41 = vmul.f32 %v10712_v63, %v10712_v63 }
 0x13c   :  { %v881_v18 = vadd.f32 %v880_v14, %v879_v55  ;;  %v996_v61 = vsel %vm736_vm1, %v12137_v50, 0.0  ;;  %v1356_v16 = vrot.slane %v1355_v23, 1  ;;  %v10722_v58 = vsub.f32 %v10489_v46, %v1095_v8 }
 0x13d   :  { %v817_v0 = vrot.slane %v816_v36, 2  ;;  %v900_v51 = vadd.f32 %v899_v25, %v898_v37  ;;  %v10725_v60 = vmul.f32 %v9965_v26, %v12139_v32  ;;  %v1561_v31 = vmul.f32 0.125, %v1273_v39 }
 0x13e   :  { %12138 = vst [vmem:[#allocation4_spill] sm:$0xff] %v10722_v58  ;;  %v1082_v22 = vmul.f32 0.125, %v799_v43  ;;  %v810_v53 = vrot.slane %v809_v24, 2  ;;  %v1619_v7 = vadd.f32 1e-05, %v1571_v29  ;;  %9968 = vrsqrt.f32 %v1606_v38  ;;  %v12141_v43 = vld [vmem:[#allocation2_spill] sm:$0xff] }
 0x13f   :  { %12140 = vst [vmem:[#allocation18_spill] sm:$0xff] %v10725_v60  ;;  %v1346_v10 = vadd.f32 %v1345_v3, %v1344_v49  ;;  %v997_v2 = vrot.slane %v996_v61, 4  ;;  %v1570_v55 = vmul.f32 0.125, %v1336_v62  ;;  %v1265_v13 = vrot.slane %v1264_v45, 1 }
 0x140   :  { %v1281_v27 = vsel %vm736_vm1, %v1179_v41, 0.0  ;;  %v882_v9 = vrot.slane %v881_v18, 1  ;;  %v9967_v15 = vpop.eup %9966  ;;  %v1357_v46 = vadd.f32 %v1356_v16, %v1355_v23  ;;  %v1191_v37 = vmul.f32 %v10722_v58, %v10722_v58  ;;  %v12145_v58 = vld [vmem:[#allocation5_spill] sm:$0xff] }
 0x141   :  { %v818_v14 = vadd.f32 %v817_v0, %v816_v36  ;;  %v901_v26 = vrot.slane %v900_v51, 2  ;;  %v1609_v8 = vadd.f32 1e-05, %v1561_v31  ;;  %v10731_v39 = vsub.f32 %v10491_v47, %v1082_v22 }
 0x142   :  { %v811_v25 = vadd.f32 %v810_v53, %v809_v24  ;;  %v891_v3 = vsel %vm736_vm1, %v12141_v43, 0.0  ;;  %9970 = vrsqrt.f32 %v1619_v7  ;;  %v1347_v62 = vrot.slane %v1346_v10, 2 }
 0x143   :  { %v1282_v49 = vrot.slane %v1281_v27, 4  ;;  %v998_v29 = vadd.f32 %v997_v2, %v996_v61  ;;  %v10736_v38 = vmul.f32 %v9967_v15, %v10604_v5  ;;  %v1618_v23 = vadd.f32 1e-05, %v1570_v55  ;;  %v12143_v61 = vld [vmem:[#allocation3_spill] sm:$0xff] }
 0x144   :  { %v1266_v41 = vadd.f32 %v1265_v13, %v1264_v45  ;;  %v883_v16 = vadd.f32 %v882_v9, %v881_v18  ;;  %v1365_v36 = vsel %vm736_vm1, %v1191_v37, 0.0  ;;  %v819_v0 = vrot.slane %v818_v14, 1 }
 0x145   :  { %12142 = vst [vmem:[#allocation2_spill] sm:$0xff] %v10736_v38  ;;  %v902_v32 = vadd.f32 %v901_v26, %v900_v51  ;;  %v892_v47 = vrot.slane %v891_v3, 4  ;;  %9972 = vrsqrt.f32 %v1609_v8  ;;  %v1573_v24 = vmul.f32 0.125, %v1357_v46 }
 0x146   :  { %v1178_v31 = vmul.f32 %v10731_v39, %v10731_v39  ;;  %v812_v22 = vrot.slane %v811_v25, 1  ;;  %v1348_v53 = vadd.f32 %v1347_v62, %v1346_v10  ;;  %v1283_v7 = vadd.f32 %v1282_v49, %v1281_v27 }
 0x147   :  { %v912_v5 = vsel %vm736_vm1, %v12143_v61, 0.0  ;;  %v999_v2 = vrot.slane %v998_v29, 2  ;;  %9974 = vrsqrt.f32 %v1618_v23  ;;  %v1560_v45 = vmul.f32 0.125, %v1266_v41 }
 0x148   :  { %v1366_v18 = vrot.slane %v1365_v36, 4  ;;  %v1094_v55 = vmul.f32 0.125, %v883_v16  ;;  %v9969_v13 = vpop.eup %9968  ;;  %v10744_v51 = vmul.f32 0.35355338, %v10736_v38  ;;  %v820_v9 = vadd.f32 %v819_v0, %v818_v14 }
 0x149   :  { %v903_v15 = vrot.slane %v902_v32, 1  ;;  %v893_v46 = vadd.f32 %v892_v47, %v891_v3  ;;  %v1621_v37 = vadd.f32 1e-05, %v1573_v24  ;;  %v1274_v26 = vsel %vm736_vm1, %v1178_v31, 0.0 }
 0x14a   :  { %12144 = vst [vmem:[#allocation3_spill] sm:$0xff] %v10744_v51  ;;  %v813_v10 = vadd.f32 %v812_v22, %v811_v25  ;;  %v913_v27 = vrot.slane %v912_v5, 4  ;;  %v1349_v8 = vrot.slane %v1348_v53, 1  ;;  %v1284_v62 = vrot.slane %v1283_v7, 2 }
 0x14b   :  { %v1000_v49 = vadd.f32 %v999_v2, %v998_v29  ;;  %v905_v23 = vsel %vm736_vm1, %v12145_v58, 0.0  ;;  %v10750_v41 = vmul.f32 %v9969_v13, %v10614_v34  ;;  %v1608_v16 = vadd.f32 1e-05, %v1560_v45  ;;  %v12149_v2 = vld [vmem:[#allocation6_spill] sm:$0xff] }
 0x14c   :  { %v1367_v60 = vadd.f32 %v1366_v18, %v1365_v36  ;;  %v10753_v14 = vsub.f32 %v10493_v48, %v1094_v55  ;;  %v10755_v3 = vpop.eup %9970  ;;  %v1275_v0 = vrot.slane %v1274_v26, 4  ;;  %v1085_v47 = vmul.f32 0.125, %v820_v9 }
 0x14d   :  { %12146 = vst [vmem:[#allocation5_spill] sm:$0xff] %v10750_v41  ;;  %12148 = vst [vmem:[#allocation32_spill] sm:$0xff] %v10755_v3  ;;  %v904_v25 = vadd.f32 %v903_v15, %v902_v32  ;;  %v894_v24 = vrot.slane %v893_v46, 2  ;;  %v1084_v31 = vmul.f32 0.125, %v813_v10  ;;  %v914_v22 = vadd.f32 %v913_v27, %v912_v5 }
 0x14e   :  { %12147 = vst [vmem:[#allocation31_spill] sm:$0xff] %v10753_v14  ;;  %v906_v29 = vrot.slane %v905_v23, 4  ;;  %v989_v38 = vsel %vm736_vm1, %v12149_v2, 0.0  ;;  %9976 = vrsqrt.f32 %v1621_v37  ;;  %v1350_v34 = vadd.f32 %v1349_v8, %v1348_v53 }
 0x14f   :  { %v1285_v13 = vadd.f32 %v1284_v62, %v1283_v7  ;;  %v1001_v45 = vrot.slane %v1000_v49, 1  ;;  %v9973_v36 = vpop.eup %9972  ;;  %v10760_v48 = vmul.f32 0.35355338, %v10750_v41  ;;  %9978 = vrsqrt.f32 %v1608_v16 }
 0x150   :  { %v1368_v18 = vrot.slane %v1367_v60, 2  ;;  %v1190_v32 = vmul.f32 %v10753_v14, %v10753_v14  ;;  %v10765_v55 = vsub.f32 %v10495_v52, %v1085_v47  ;;  %v1097_v5 = vmul.f32 0.125, %v904_v25  ;;  %v12153_v47 = vld [vmem:[#allocation7_spill] sm:$0xff]  ;;  %v12154_v25 = vld [vmem:[#allocation8_spill] sm:$0xff] }
 0x151   :  { %12150 = vst [vmem:[#allocation6_spill] sm:$0xff] %v10760_v48  ;;  %v895_v9 = vadd.f32 %v894_v24, %v893_v46  ;;  %v990_v15 = vrot.slane %v989_v38, 4  ;;  %v10767_v10 = vpop.eup %9974  ;;  %v1276_v53 = vadd.f32 %v1275_v0, %v1274_v26  ;;  %v10770_v7 = vsub.f32 %v10499_v57, %v1084_v31 }
 0x152   :  { %12151 = vst [vmem:[#allocation33_spill] sm:$0xff] %v10767_v10  ;;  %v915_v37 = vrot.slane %v914_v22, 2  ;;  %v907_v27 = vadd.f32 %v906_v29, %v905_v23  ;;  %v10773_v8 = vmul.f32 %v9973_v36, %v10628_v12  ;;  %v1572_v62 = vmul.f32 0.125, %v1350_v34 }
 0x153   :  { %v1286_v16 = vrot.slane %v1285_v13, 1  ;;  %v1002_v14 = vadd.f32 %v1001_v45, %v1000_v49  ;;  %v1369_v3 = vadd.f32 %v1368_v18, %v1367_v60  ;;  %v1358_v52 = vsel %vm736_vm1, %v1190_v32, 0.0 }
 0x154   :  { %12152 = vst [vmem:[#allocation34_spill] sm:$0xff] %v10773_v8  ;;  %v926_v46 = vsel %vm736_vm1, %v12153_v47, 0.0  ;;  %v1010_v26 = vsel %vm736_vm1, %v12154_v25, 0.0  ;;  %v1181_v57 = vmul.f32 %v10765_v55, %v10765_v55  ;;  %v10783_v23 = vsub.f32 %v10497_v56, %v1097_v5 }
 0x155   :  { %v896_v12 = vrot.slane %v895_v9, 1  ;;  %v991_v0 = vadd.f32 %v990_v15, %v989_v38  ;;  %v1277_v24 = vrot.slane %v1276_v53, 2  ;;  %v1180_v60 = vmul.f32 %v10770_v7, %v10770_v7 }
 0x156   :  { %12155 = vst [vmem:[#allocation7_spill] sm:$0xff] %v10783_v23  ;;  %v916_v49 = vadd.f32 %v915_v37, %v914_v22  ;;  %v908_v31 = vrot.slane %v907_v27, 2  ;;  %v1620_v29 = vadd.f32 1e-05, %v1572_v62  ;;  %v1111_v34 = vmul.f32 0.125, %v1002_v14 }
 0x157   :  { %v927_v45 = vrot.slane %v926_v46, 4  ;;  %v1011_v36 = vrot.slane %v1010_v26, 4  ;;  %v10788_v18 = vmul.f32 0.35355338, %v10773_v8  ;;  %v1287_v32 = vadd.f32 %v1286_v16, %v1285_v13 }
 0x158   :  { %v1370_v10 = vrot.slane %v1369_v3, 1  ;;  %v1359_v41 = vrot.slane %v1358_v52, 4  ;;  %v10790_v56 = vpop.eup %9976  ;;  %v1295_v38 = vsel %vm736_vm1, %v1181_v57, 0.0  ;;  %v1193_v5 = vmul.f32 %v10783_v23, %v10783_v23 }
 0x159   :  { %12156 = vst [vmem:[#allocation8_spill] sm:$0xff] %v10788_v18  ;;  %12157 = vst [vmem:[#allocation35_spill] sm:$0xff] %v10790_v56  ;;  %v897_v15 = vadd.f32 %v896_v12, %v895_v9  ;;  %v992_v22 = vrot.slane %v991_v0, 2  ;;  %v9979_v37 = vpop.eup %9978  ;;  %v1278_v62 = vadd.f32 %v1277_v24, %v1276_v53  ;;  %v1288_v14 = vsel %vm736_vm1, %v1180_v60, 0.0 }
 0x15a   :  { %v917_v48 = vrot.slane %v916_v49, 1  ;;  %v909_v51 = vadd.f32 %v908_v31, %v907_v27  ;;  %9980 = vrsqrt.f32 %v1620_v29  ;;  %v10797_v13 = vsub.f32 %v12137_v50, %v1111_v34 }
 0x15b   :  { %v928_v16 = vadd.f32 %v927_v45, %v926_v46  ;;  %v1012_v8 = vadd.f32 %v1011_v36, %v1010_v26  ;;  %v1563_v56 = vmul.f32 0.125, %v1287_v32  ;;  %v1360_v18 = vadd.f32 %v1359_v41, %v1358_v52 }
 0x15c   :  { %v1296_v57 = vrot.slane %v1295_v38, 4  ;;  %v1003_v23 = vsel %vm736_vm1, %v12158_v20, 0.0  ;;  %v1379_v9 = vsel %vm736_vm1, %v1193_v5, 0.0  ;;  %v1289_v12 = vrot.slane %v1288_v14, 4 }
 0x15d   :  { %v1096_v53 = vmul.f32 0.125, %v897_v15  ;;  %v993_v24 = vadd.f32 %v992_v22, %v991_v0  ;;  %v1371_v60 = vadd.f32 %v1370_v10, %v1369_v3  ;;  %v1279_v1 = vrot.slane %v1278_v62, 1 }
 0x15e   :  { %v918_v27 = vadd.f32 %v917_v48, %v916_v49  ;;  %v910_v31 = vrot.slane %v909_v51, 1  ;;  %v1207_v50 = vmul.f32 %v10797_v13, %v10797_v13  ;;  %v929_v46 = vrot.slane %v928_v16, 2 }
 0x15f   :  { %v1013_v26 = vrot.slane %v1012_v8, 2  ;;  %v1004_v29 = vrot.slane %v1003_v23, 4  ;;  %v1611_v41 = vadd.f32 1e-05, %v1563_v56  ;;  %v1361_v52 = vrot.slane %v1360_v18, 2 }
 0x160   :  { %v1297_v34 = vadd.f32 %v1296_v57, %v1295_v38  ;;  %v1380_v45 = vrot.slane %v1379_v9, 4  ;;  %v10805_v36 = vmul.f32 %v9979_v37, %v10656_v35  ;;  %v1290_v32 = vadd.f32 %v1289_v12, %v1288_v14 }
 0x161   :  { %v10808_v0 = vsub.f32 %v12141_v43, %v1096_v53  ;;  %v994_v3 = vrot.slane %v993_v24, 1  ;;  %v1575_v48 = vmul.f32 0.125, %v1371_v60  ;;  %v1099_v10 = vmul.f32 0.125, %v918_v27 }
 0x162   :  { %v911_v49 = vadd.f32 %v910_v31, %v909_v51  ;;  %v1005_v5 = vadd.f32 %v1004_v29, %v1003_v23  ;;  %v1280_v15 = vadd.f32 %v1279_v1, %v1278_v62  ;;  %v1477_v22 = vsel %vm736_vm1, %v1207_v50, 0.0 }
 0x163   :  { %12159 = vst [vmem:[#allocation10_spill] sm:$0xff] %v10808_v0  ;;  %v930_v21 = vadd.f32 %v929_v46, %v928_v16  ;;  %v1014_v56 = vadd.f32 %v1013_v26, %v1012_v8  ;;  %9982 = vrsqrt.f32 %v1611_v41  ;;  %v1362_v38 = vadd.f32 %v1361_v52, %v1360_v18  ;;  %v12162_v18 = vld [vmem:[#allocation9_spill] sm:$0xff] }
 0x164   :  { %v1298_v57 = vrot.slane %v1297_v34, 2  ;;  %v1381_v19 = vadd.f32 %v1380_v45, %v1379_v9  ;;  %v10811_v35 = vpop.eup %9980  ;;  %v1291_v37 = vrot.slane %v1290_v32, 2  ;;  %v1192_v43 = vmul.f32 %v10808_v0, %v10808_v0 }
 0x165   :  { %12160 = vst [vmem:[#allocation36_spill] sm:$0xff] %v10811_v35  ;;  %v995_v14 = vadd.f32 %v994_v3, %v993_v24  ;;  %v1006_v12 = vrot.slane %v1005_v5, 2  ;;  %v1623_v53 = vadd.f32 1e-05, %v1575_v48  ;;  %v10816_v51 = vsub.f32 %v12143_v61, %v1099_v10 }
 0x166   :  { %v1478_v1 = vrot.slane %v1477_v22, 4  ;;  %v1098_v23 = vmul.f32 0.125, %v911_v49  ;;  %v1562_v62 = vmul.f32 0.125, %v1280_v15  ;;  %v931_v8 = vrot.slane %v930_v21, 1 }
 0x167   :  { %12161 = vst [vmem:[#allocation37_spill] sm:$0xff] %v10816_v51  ;;  %v1015_v16 = vrot.slane %v1014_v56, 1  ;;  %v919_v9 = vsel %vm736_vm1, %v12162_v18, 0.0  ;;  %v10821_v60 = vmul.f32 0.35355338, %v10805_v36  ;;  %v1363_v27 = vrot.slane %v1362_v38, 1 }
 0x168   :  { %v1299_v31 = vadd.f32 %v1298_v57, %v1297_v34  ;;  %v1382_v50 = vrot.slane %v1381_v19, 2  ;;  %v1292_v24 = vadd.f32 %v1291_v37, %v1290_v32  ;;  %v1372_v46 = vsel %vm736_vm1, %v1192_v43, 0.0  ;;  %v12164_v32 = vld [vmem:[#allocation12_spill] sm:$0xff] }
 0x169   :  { %v1110_v26 = vmul.f32 0.125, %v995_v14  ;;  %v1007_v61 = vadd.f32 %v1006_v12, %v1005_v5  ;;  %v1195_v29 = vmul.f32 %v10816_v51, %v10816_v51  ;;  %v1479_v41 = vadd.f32 %v1478_v1, %v1477_v22 }
 0x16a   :  { %v10827_v52 = vsub.f32 %v12145_v58, %v1098_v23  ;;  %v920_v45 = vrot.slane %v919_v9, 4  ;;  %9984 = vrsqrt.f32 %v1623_v53  ;;  %v1610_v3 = vadd.f32 1e-05, %v1562_v62 }
 0x16b   :  { %v932_v48 = vadd.f32 %v931_v8, %v930_v21  ;;  %v1016_v10 = vadd.f32 %v1015_v16, %v1014_v56  ;;  %v1364_v49 = vadd.f32 %v1363_v27, %v1362_v38  ;;  %v1300_v34 = vrot.slane %v1299_v31, 1  ;;  %v12165_v8 = vld [vmem:[#allocation11_spill] sm:$0xff] }
 0x16c   :  { %12163 = vst [vmem:[#allocation9_spill] sm:$0xff] %v10827_v52  ;;  %v1373_v15 = vrot.slane %v1372_v46, 4  ;;  %v1024_v57 = vsel %vm736_vm1, %v12164_v32, 0.0  ;;  %v1383_v37 = vadd.f32 %v1382_v50, %v1381_v19  ;;  %v1293_v5 = vrot.slane %v1292_v24, 1 }
 0x16d   :  { %v10832_v43 = vsub.f32 %v12149_v2, %v1110_v26  ;;  %v1008_v22 = vrot.slane %v1007_v61, 1  ;;  %v9983_v14 = vpop.eup %9982  ;;  %v1393_v58 = vsel %vm736_vm1, %v1195_v29, 0.0  ;;  %v1480_v12 = vrot.slane %v1479_v41, 2 }
 0x16e   :  { %v1194_v21 = vmul.f32 %v10827_v52, %v10827_v52  ;;  %v921_v56 = vadd.f32 %v920_v45, %v919_v9  ;;  %9986 = vrsqrt.f32 %v1610_v3  ;;  %v1101_v38 = vmul.f32 0.125, %v932_v48 }
 0x16f   :  { %v1113_v53 = vmul.f32 0.125, %v1016_v10  ;;  %v1025_v1 = vrot.slane %v1024_v57, 4  ;;  %v1574_v23 = vmul.f32 0.125, %v1364_v49  ;;  %v1301_v62 = vadd.f32 %v1300_v34, %v1299_v31 }
 0x170   :  { %v1374_v19 = vadd.f32 %v1373_v15, %v1372_v46  ;;  %v940_v2 = vsel %vm736_vm1, %v12165_v8, 0.0  ;;  %v1384_v16 = vrot.slane %v1383_v37, 1  ;;  %v1394_v27 = vrot.slane %v1393_v58, 4 }
 0x171   :  { %v1206_v50 = vmul.f32 %v10832_v43, %v10832_v43  ;;  %v1009_v26 = vadd.f32 %v1008_v22, %v1007_v61  ;;  %v1294_v29 = vadd.f32 %v1293_v5, %v1292_v24  ;;  %v1481_v0 = vadd.f32 %v1480_v12, %v1479_v41 }
 0x172   :  { %v1386_v9 = vsel %vm736_vm1, %v1194_v21, 0.0  ;;  %v922_v45 = vrot.slane %v921_v56, 2  ;;  %v10843_v3 = vsub.f32 %v12153_v47, %v1101_v38  ;;  %v10846_v31 = vsub.f32 %v12154_v25, %v1113_v53 }
 0x173   :  { %v941_v46 = vrot.slane %v940_v2, 4  ;;  %v1026_v48 = vadd.f32 %v1025_v1, %v1024_v57  ;;  %v10849_v10 = vmul.f32 %v9983_v14, %v10712_v63  ;;  %v1622_v49 = vadd.f32 1e-05, %v1574_v23 }
 0x174   :  { %12166 = vst [vmem:[#allocation12_spill] sm:$0xff] %v10843_v3  ;;  %12167 = vst [vmem:[#allocation11_spill] sm:$0xff] %v10846_v31  ;;  %v1565_v34 = vmul.f32 0.125, %v1301_v62  ;;  %v1375_v15 = vrot.slane %v1374_v19, 2  ;;  %v10851_v61 = vpop.eup %9984  ;;  %v1395_v24 = vadd.f32 %v1394_v27, %v1393_v58  ;;  %v1387_v41 = vrot.slane %v1386_v9, 4 }
 0x175   :  { %12168 = vst [vmem:[#allocation38_spill] sm:$0xff] %v10849_v10  ;;  %12169 = vst [vmem:[#allocation39_spill] sm:$0xff] %v10851_v61  ;;  %v1470_v5 = vsel %vm736_vm1, %v1206_v50, 0.0  ;;  %v1112_v22 = vmul.f32 0.125, %v1009_v26  ;;  %v1385_v47 = vadd.f32 %v1384_v16, %v1383_v37  ;;  %v1564_v12 = vmul.f32 0.125, %v1294_v29 }
 0x176   :  { %v1482_v21 = vrot.slane %v1481_v0, 1  ;;  %v923_v25 = vadd.f32 %v922_v45, %v921_v56  ;;  %v1197_v57 = vmul.f32 %v10843_v3, %v10843_v3  ;;  %v1209_v63 = vmul.f32 %v10846_v31, %v10846_v31 }
 0x177   :  { %v942_v14 = vadd.f32 %v941_v46, %v940_v2  ;;  %v1027_v38 = vrot.slane %v1026_v48, 2  ;;  %9988 = vrsqrt.f32 %v1622_v49  ;;  %v1613_v53 = vadd.f32 1e-05, %v1565_v34 }
 0x178   :  { %v1376_v1 = vadd.f32 %v1375_v15, %v1374_v19  ;;  %v1471_v58 = vrot.slane %v1470_v5, 4  ;;  %v9987_v23 = vpop.eup %9986  ;;  %v10859_v62 = vmul.f32 0.35355338, %v10849_v10  ;;  %v1396_v37 = vrot.slane %v1395_v24, 2 }
 0x179   :  { %v1388_v16 = vadd.f32 %v1387_v41, %v1386_v9  ;;  %v10862_v56 = vsub.f32 %v12158_v20, %v1112_v22  ;;  %v1577_v27 = vmul.f32 0.125, %v1385_v47  ;;  %v1612_v50 = vadd.f32 1e-05, %v1564_v12  ;;  %v12172_v22 = vld [vmem:[#allocation14_spill] sm:$0xff] }
 0x17a   :  { %v1483_v26 = vadd.f32 %v1482_v21, %v1481_v0  ;;  %v924_v29 = vrot.slane %v923_v25, 1  ;;  %v1407_v2 = vsel %vm736_vm1, %v1197_v57, 0.0  ;;  %v1491_v45 = vsel %vm736_vm1, %v1209_v63, 0.0 }
 0x17b   :  { %12170 = vst [vmem:[#allocation40_spill] sm:$0xff] %v10862_v56  ;;  %v943_v46 = vrot.slane %v942_v14, 2  ;;  %v1028_v19 = vadd.f32 %v1027_v38, %v1026_v48  ;;  %v10867_v49 = vmul.f32 %v9987_v23, %v10731_v39  ;;  %9990 = vrsqrt.f32 %v1613_v53  ;;  %v12173_v53 = vld [vmem:[#allocation13_spill] sm:$0xff] }
 0x17c   :  { %v1377_v34 = vrot.slane %v1376_v1, 1  ;;  %v1472_v15 = vadd.f32 %v1471_v58, %v1470_v5  ;;  %v1397_v9 = vadd.f32 %v1396_v37, %v1395_v24  ;;  %v1389_v41 = vrot.slane %v1388_v16, 2  ;;  %v12174_v58 = vld [vmem:[#allocation16_spill] sm:$0xff] }
 0x17d   :  { %12171 = vst [vmem:[#allocation41_spill] sm:$0xff] %v10867_v49  ;;  %v1208_v20 = vmul.f32 %v10862_v56, %v10862_v56  ;;  %v1017_v0 = vsel %vm736_vm1, %v12172_v22, 0.0  ;;  %v1625_v47 = vadd.f32 1e-05, %v1577_v27  ;;  %v1408_v12 = vrot.slane %v1407_v2, 4 }
 0x17e   :  { %v1492_v21 = vrot.slane %v1491_v45, 4  ;;  %v925_v57 = vadd.f32 %v924_v29, %v923_v25  ;;  %9992 = vrsqrt.f32 %v1612_v50  ;;  %v1591_v48 = vmul.f32 0.125, %v1483_v26 }
 0x17f   :  { %v944_v63 = vadd.f32 %v943_v46, %v942_v14  ;;  %v1029_v39 = vrot.slane %v1028_v19, 1  ;;  %v1473_v38 = vrot.slane %v1472_v15, 2  ;;  %v933_v5 = vsel %vm736_vm1, %v12173_v53, 0.0 }
 0x180   :  { %v1018_v24 = vrot.slane %v1017_v0, 4  ;;  %v1038_v23 = vsel %vm736_vm1, %v12174_v58, 0.0  ;;  %v1378_v37 = vadd.f32 %v1377_v34, %v1376_v1  ;;  %v1398_v3 = vrot.slane %v1397_v9, 1 }
 0x181   :  { %v1390_v52 = vadd.f32 %v1389_v41, %v1388_v16  ;;  %v1484_v27 = vsel %vm736_vm1, %v1208_v20, 0.0  ;;  %v10878_v51 = vpop.eup %9988  ;;  %v1409_v25 = vadd.f32 %v1408_v12, %v1407_v2  ;;  %v1493_v50 = vadd.f32 %v1492_v21, %v1491_v45  ;;  %v12176_v20 = vld [vmem:[#allocation19_spill] sm:$0xff] }
 0x182   :  { %12175 = vst [vmem:[#allocation14_spill] sm:$0xff] %v10878_v51  ;;  %v1100_v26 = vmul.f32 0.125, %v925_v57  ;;  %v1039_v14 = vrot.slane %v1038_v23, 4  ;;  %v10881_v29 = vmul.f32 0.35355338, %v10867_v49  ;;  %v945_v46 = vrot.slane %v944_v63, 1 }
 0x183   :  { %v1030_v61 = vadd.f32 %v1029_v39, %v1028_v19  ;;  %v934_v35 = vrot.slane %v933_v5, 4  ;;  %v1639_v56 = vadd.f32 1e-05, %v1591_v48  ;;  %v1474_v10 = vadd.f32 %v1473_v38, %v1472_v15 }
 0x184   :  { %v1485_v31 = vrot.slane %v1484_v27, 4  ;;  %v1019_v1 = vadd.f32 %v1018_v24, %v1017_v0  ;;  %v1576_v34 = vmul.f32 0.125, %v1378_v37  ;;  %v1391_v16 = vrot.slane %v1390_v52, 1 }
 0x185   :  { %v1040_v41 = vadd.f32 %v1039_v14, %v1038_v23  ;;  %v1031_v51 = vsel %vm736_vm1, %v12176_v20, 0.0  ;;  %v9991_v2 = vpop.eup %9990  ;;  %v1399_v45 = vadd.f32 %v1398_v3, %v1397_v9  ;;  %v1410_v12 = vrot.slane %v1409_v25, 2 }
 0x186   :  { %v1494_v21 = vrot.slane %v1493_v50, 2  ;;  %v10886_v57 = vsub.f32 %v12162_v18, %v1100_v26  ;;  %v946_v49 = vadd.f32 %v945_v46, %v944_v63  ;;  %v1115_v19 = vmul.f32 0.125, %v1030_v61 }
 0x187   :  { %v935_v39 = vadd.f32 %v934_v35, %v933_v5  ;;  %v1032_v48 = vrot.slane %v1031_v51, 4  ;;  %9994 = vrsqrt.f32 %v1639_v56  ;;  %v1475_v15 = vrot.slane %v1474_v10, 1 }
 0x188   :  { %12177 = vst [vmem:[#allocation13_spill] sm:$0xff] %v10886_v57  ;;  %v1486_v0 = vadd.f32 %v1485_v31, %v1484_v27  ;;  %v1020_v38 = vrot.slane %v1019_v1, 2  ;;  %v9993_v24 = vpop.eup %9992  ;;  %v10889_v23 = vmul.f32 %v9991_v2, %v10765_v55  ;;  %9996 = vrsqrt.f32 %v1625_v47 }
 0x189   :  { %v1392_v37 = vadd.f32 %v1391_v16, %v1390_v52  ;;  %v1041_v3 = vrot.slane %v1040_v41, 2  ;;  %v1411_v9 = vadd.f32 %v1410_v12, %v1409_v25  ;;  %v1495_v14 = vadd.f32 %v1494_v21, %v1493_v50  ;;  %v12179_v16 = vld [vmem:[#allocation15_spill] sm:$0xff] }
 0x18a   :  { %v1196_v18 = vmul.f32 %v10886_v57, %v10886_v57  ;;  %v1033_v63 = vadd.f32 %v1032_v48, %v1031_v51  ;;  %v1624_v61 = vadd.f32 1e-05, %v1576_v34  ;;  %v1103_v35 = vmul.f32 0.125, %v946_v49 }
 0x18b   :  { %v10894_v56 = vsub.f32 %v12164_v32, %v1115_v19  ;;  %v936_v31 = vrot.slane %v935_v39, 2  ;;  %v1579_v5 = vmul.f32 0.125, %v1399_v45  ;;  %v1476_v27 = vadd.f32 %v1475_v15, %v1474_v10 }
 0x18c   :  { %v1487_v26 = vrot.slane %v1486_v0, 2  ;;  %v1021_v55 = vadd.f32 %v1020_v38, %v1019_v1  ;;  %v10897_v47 = vmul.f32 0.35355338, %v10889_v23  ;;  %v1578_v52 = vmul.f32 0.125, %v1392_v37 }
 0x18d   :  { %v1042_v25 = vadd.f32 %v1041_v3, %v1040_v41  ;;  %v1034_v50 = vrot.slane %v1033_v63, 2  ;;  %v10900_v46 = vmul.f32 %v9993_v24, %v10770_v7  ;;  %v1412_v51 = vrot.slane %v1411_v9, 1 }
 0x18e   :  { %v1496_v34 = vrot.slane %v1495_v14, 1  ;;  %v1400_v49 = vsel %vm736_vm1, %v1196_v18, 0.0  ;;  %v10904_v32 = vsub.f32 %v12165_v8, %v1103_v35  ;;  %v1211_v10 = vmul.f32 %v10894_v56, %v10894_v56 }
 0x18f   :  { %v937_v1 = vadd.f32 %v936_v31, %v935_v39  ;;  %v954_v2 = vsel %vm736_vm1, %v12179_v16, 0.0  ;;  %v1627_v45 = vadd.f32 1e-05, %v1579_v5  ;;  %v1590_v41 = vmul.f32 0.125, %v1476_v27 }
 0x190   :  { %12178 = vst [vmem:[#allocation16_spill] sm:$0xff] %v10904_v32  ;;  %v1488_v12 = vadd.f32 %v1487_v26, %v1486_v0  ;;  %v1022_v21 = vrot.slane %v1021_v55, 1  ;;  %9998 = vrsqrt.f32 %v1624_v61  ;;  %v1626_v7 = vadd.f32 1e-05, %v1578_v52 }
 0x191   :  { %v1043_v19 = vrot.slane %v1042_v25, 1  ;;  %v1035_v48 = vadd.f32 %v1034_v50, %v1033_v63  ;;  %v9995_v15 = vpop.eup %9994  ;;  %v10911_v38 = vmul.f32 0.35355338, %v10900_v46  ;;  %v1413_v8 = vadd.f32 %v1412_v51, %v1411_v9 }
 0x192   :  { %v1401_v24 = vrot.slane %v1400_v49, 4  ;;  %v955_v37 = vrot.slane %v954_v2, 4  ;;  %v10913_v3 = vpop.eup %9996  ;;  %v1497_v39 = vadd.f32 %v1496_v34, %v1495_v14  ;;  %v1199_v18 = vmul.f32 %v10904_v32, %v10904_v32 }
 0x193   :  { %12180 = vst [vmem:[#allocation19_spill] sm:$0xff] %v10913_v3  ;;  %v1505_v0 = vsel %vm736_vm1, %v1211_v10, 0.0  ;;  %v938_v35 = vrot.slane %v937_v1, 1  ;;  %10000 = vrsqrt.f32 %v1627_v45  ;;  %v1638_v61 = vadd.f32 1e-05, %v1590_v41 }
 0x194   :  { %v1489_v31 = vrot.slane %v1488_v12, 1  ;;  %v1023_v63 = vadd.f32 %v1022_v21, %v1021_v55  ;;  %v1735_v5 = vmul.f32 %v9995_v15, %v10797_v13  ;;  %10002 = vrsqrt.f32 %v1626_v7  ;;  %v12181_v21 = vld [vmem:[#allocation17_spill] sm:$0xff] }
 0x195   :  { %v1044_v27 = vadd.f32 %v1043_v19, %v1042_v25  ;;  %v1036_v9 = vrot.slane %v1035_v48, 1  ;;  %v1402_v26 = vadd.f32 %v1401_v24, %v1400_v49  ;;  %v1506_v52 = vrot.slane %v1505_v0, 4 }
 0x196   :  { %v956_v50 = vadd.f32 %v955_v37, %v954_v2  ;;  %v1052_v14 = vsel %vm736_vm1, %v10606_v17, 0.0  ;;  %v10921_v51 = vmul.f32 0.125, %v1413_v8  ;;  %v1593_v34 = vmul.f32 0.125, %v1497_v39 }
 0x197   :  { %v1421_v10 = vsel %vm736_vm1, %v1199_v18, 0.0  ;;  %v939_v45 = vadd.f32 %v938_v35, %v937_v1  ;;  %10004 = vrsqrt.f32 %v1638_v61  ;;  %v1490_v41 = vadd.f32 %v1489_v31, %v1488_v12 }
 0x198   :  { %v1114_v55 = vmul.f32 0.125, %v1023_v63  ;;  %v947_v13 = vsel %vm736_vm1, %v12181_v21, 0.0  ;;  %v1117_v25 = vmul.f32 0.125, %v1044_v27  ;;  %v1037_v7 = vadd.f32 %v1036_v9, %v1035_v48 }
 0x199   :  { %v968_v49 = vsel %vm736_vm1, %v10600_v59, 0.0  ;;  %v1053_v2 = vrot.slane %v1052_v14, 4  ;;  %v1403_v19 = vrot.slane %v1402_v26, 2  ;;  %v1422_v15 = vrot.slane %v1421_v10, 4 }
 0x19a   :  { %v1507_v8 = vadd.f32 %v1506_v52, %v1505_v0  ;;  %v957_v24 = vrot.slane %v956_v50, 2  ;;  %v10928_v37 = vpop.eup %9998  ;;  %v10930_v39 = vmul.f32 0.35355338, %v1735_v5  ;;  %v1641_v1 = vadd.f32 1e-05, %v1593_v34 }
 0x19b   :  { %12182 = vst [vmem:[#allocation15_spill] sm:$0xff] %v10928_v37  ;;  %v1102_v12 = vmul.f32 0.125, %v939_v45  ;;  %v1054_v18 = vadd.f32 %v1053_v2, %v1052_v14  ;;  %v1592_v35 = vmul.f32 0.125, %v1490_v41  ;;  %v10933_v61 = vsub.f32 %v12172_v22, %v1114_v55 }
 0x19c   :  { %12183 = vst [vmem:[#allocation17_spill] sm:$0xff] %v10930_v39  ;;  %v948_v48 = vrot.slane %v947_v13, 4  ;;  %v969_v31 = vrot.slane %v968_v49, 4  ;;  %v10936_v63 = vsub.f32 %v12174_v58, %v1117_v25  ;;  %v1116_v27 = vmul.f32 0.125, %v1037_v7 }
 0x19d   :  { %12184 = vst [vmem:[#allocation42_spill] sm:$0xff] %v10933_v61  ;;  %v1055_v9 = vrot.slane %v1054_v18, 2  ;;  %v1045_v0 = vsel %vm736_vm1, %v10630_v30, 0.0  ;;  %v10940_v52 = vpop.eup %10000  ;;  %v10942_v5 = vadd.f32 %v1403_v19, %v1402_v26  ;;  %v10944_v34 = vadd.f32 %v1422_v15, %v1421_v10 }
 0x19e   :  { %12185 = vst [vmem:[#allocation43_spill] sm:$0xff] %v10936_v63  ;;  %12186 = vst [vmem:[#allocation44_spill] sm:$0xff] %v10940_v52  ;;  %v1508_v14 = vrot.slane %v1507_v8, 2  ;;  %v958_v45 = vadd.f32 %v957_v24, %v956_v50  ;;  %v10946_v22 = vpop.eup %10002  ;;  %v10949_v41 = vsub.f32 %v12173_v53, %v1102_v12  ;;  %v961_v55 = vsel %vm736_vm1, %v10621_v44, 0.0 }
 0x19f   :  { %12187 = vst [vmem:[#allocation45_spill] sm:$0xff] %v10946_v22  ;;  %v1056_v58 = vadd.f32 %v1055_v9, %v1054_v18  ;;  %v1046_v25 = vrot.slane %v1045_v0, 4  ;;  %10006 = vrsqrt.f32 %v1641_v1  ;;  %v1210_v7 = vmul.f32 %v10933_v61, %v10933_v61 }
 0x1a0   :  { %12188 = vst [vmem:[#allocation46_spill] sm:$0xff] %v10949_v41  ;;  %v949_v26 = vadd.f32 %v948_v48, %v947_v13  ;;  %v970_v2 = vadd.f32 %v969_v31, %v968_v49  ;;  %v1640_v10 = vadd.f32 1e-05, %v1592_v35  ;;  %v1213_v50 = vmul.f32 %v10936_v63, %v10936_v63 }
 0x1a1   :  { %v10958_v19 = vsub.f32 %v12176_v20, %v1116_v27  ;;  %v1057_v53 = vrot.slane %v1056_v58, 1  ;;  %v10960_v15 = vpop.eup %10004  ;;  %v1509_v24 = vadd.f32 %v1508_v14, %v1507_v8  ;;  %v959_v12 = vrot.slane %v958_v45, 1 }
 0x1a2   :  { %v962_v18 = vrot.slane %v961_v55, 4  ;;  %v1047_v9 = vadd.f32 %v1046_v25, %v1045_v0  ;;  %v1198_v13 = vmul.f32 %v10949_v41, %v10949_v41  ;;  %v1498_v35 = vsel %vm736_vm1, %v1210_v7, 0.0 }
 0x1a3   :  { %12189 = vst [vmem:[#allocation47_spill] sm:$0xff] %v10958_v19  ;;  %v1058_v49 = vadd.f32 %v1057_v53, %v1056_v58  ;;  %v950_v48 = vrot.slane %v949_v26, 2  ;;  %v971_v20 = vrot.slane %v970_v2, 2  ;;  %v982_v31 = vsel %vm736_vm1, %v10646_v40, 0.0 }
 0x1a4   :  { %v1519_v8 = vsel %vm736_vm1, %v1213_v50, 0.0  ;;  %v1212_v27 = vmul.f32 %v10958_v19, %v10958_v19  ;;  %v1048_v14 = vrot.slane %v1047_v9, 2  ;;  %10008 = vrsqrt.f32 %v1640_v10 }
 0x1a5   :  { %v1119_v0 = vmul.f32 0.125, %v1058_v49  ;;  %v1510_v25 = vrot.slane %v1509_v24, 1  ;;  %v960_v1 = vadd.f32 %v959_v12, %v958_v45  ;;  %v963_v32 = vadd.f32 %v962_v18, %v961_v55 }
 0x1a6   :  { %v1499_v41 = vrot.slane %v1498_v35, 4  ;;  %v1049_v7 = vadd.f32 %v1048_v14, %v1047_v9  ;;  %v983_v53 = vrot.slane %v982_v31, 4  ;;  %v1414_v57 = vsel %vm736_vm1, %v1198_v13, 0.0 }
 0x1a7   :  { %v10973_v58 = vsub.f32 %v10606_v17, %v1119_v0  ;;  %v1520_v37 = vrot.slane %v1519_v8, 4  ;;  %v951_v3 = vadd.f32 %v950_v48, %v949_v26  ;;  %v1066_v50 = vsel %vm736_vm1, %v10660_v6, 0.0 }
 0x1a8   :  { %v1512_v49 = vsel %vm736_vm1, %v1212_v27, 0.0  ;;  %v972_v22 = vadd.f32 %v971_v20, %v970_v2  ;;  %v1050_v55 = vrot.slane %v1049_v7, 1  ;;  %v1511_v17 = vadd.f32 %v1510_v25, %v1509_v24 }
 0x1a9   :  { %12190 = vst [vmem:[#allocation48_spill] sm:$0xff] %v10973_v58  ;;  %v1215_v45 = vmul.f32 %v10973_v58, %v10973_v58  ;;  %v10981_v10 = vpop.eup %10006  ;;  %v964_v12 = vrot.slane %v963_v32, 2  ;;  %v984_v18 = vadd.f32 %v983_v53, %v982_v31  ;;  %v1067_v9 = vrot.slane %v1066_v50, 4 }
 0x1aa   :  { %v1415_v0 = vrot.slane %v1414_v57, 4  ;;  %v1500_v13 = vadd.f32 %v1499_v41, %v1498_v35  ;;  %v1105_v14 = vmul.f32 0.125, %v960_v1  ;;  %v1051_v26 = vadd.f32 %v1050_v55, %v1049_v7 }
 0x1ab   :  { %v1521_v48 = vadd.f32 %v1520_v37, %v1519_v8  ;;  %v952_v52 = vrot.slane %v951_v3, 1  ;;  %v1513_v19 = vrot.slane %v1512_v49, 4  ;;  %v1533_v27 = vsel %vm736_vm1, %v1215_v45, 0.0 }
 0x1ac   :  { %v973_v2 = vrot.slane %v972_v22, 1  ;;  %v1118_v20 = vmul.f32 0.125, %v1051_v26  ;;  %v1068_v63 = vadd.f32 %v1067_v9, %v1066_v50  ;;  %v975_v58 = vsel %vm736_vm1, %v10674_v54, 0.0 }
 0x1ad   :  { %v1595_v39 = vmul.f32 0.125, %v1511_v17  ;;  %v965_v24 = vadd.f32 %v964_v12, %v963_v32  ;;  %v985_v25 = vrot.slane %v984_v18, 2  ;;  %v976_v31 = vrot.slane %v975_v58, 4 }
 0x1ae   :  { %v10986_v53 = vadd.f32 %v1415_v0, %v1414_v57  ;;  %v1534_v41 = vrot.slane %v1533_v27, 4  ;;  %v10989_v1 = vsub.f32 %v10630_v30, %v1118_v20  ;;  %v1069_v37 = vrot.slane %v1068_v63, 2  ;;  %v10991_v35 = vpop.eup %10008 }
 0x1af   :  { %v1501_v8 = vrot.slane %v1500_v13, 2  ;;  %v1522_v7 = vrot.slane %v1521_v48, 2  ;;  %v953_v45 = vadd.f32 %v952_v52, %v951_v3  ;;  %v1514_v50 = vadd.f32 %v1513_v19, %v1512_v49 }
 0x1b0   :  { %12191 = vst [vmem:[#allocation49_spill] sm:$0xff] %v10989_v1  ;;  %v974_v55 = vadd.f32 %v973_v2, %v972_v22  ;;  %v1214_v17 = vmul.f32 %v10989_v1, %v10989_v1  ;;  %v1070_v32 = vadd.f32 %v1069_v37, %v1068_v63  ;;  %v977_v12 = vadd.f32 %v976_v31, %v975_v58 }
 0x1b1   :  { %v10995_v9 = vadd.f32 1e-05, %v1595_v39  ;;  %v10998_v57 = vsub.f32 %v12179_v16, %v1105_v14  ;;  %v966_v30 = vrot.slane %v965_v24, 1  ;;  %v986_v0 = vadd.f32 %v985_v25, %v984_v18 }
 0x1b2   :  { %v1535_v26 = vadd.f32 %v1534_v41, %v1533_v27  ;;  %v1526_v20 = vsel %vm736_vm1, %v1214_v17, 0.0  ;;  %v1071_v61 = vrot.slane %v1070_v32, 1  ;;  %v1059_v3 = vsel %vm736_vm1, %v10688_v42, 0.0 }
 0x1b3   :  { %v1502_v52 = vadd.f32 %v1501_v8, %v1500_v13  ;;  %v1104_v22 = vmul.f32 0.125, %v953_v45  ;;  %v1515_v19 = vrot.slane %v1514_v50, 2  ;;  %v1527_v49 = vrot.slane %v1526_v20, 4 }
 0x1b4   :  { %v1523_v63 = vadd.f32 %v1522_v7, %v1521_v48  ;;  %v1107_v58 = vmul.f32 0.125, %v974_v55  ;;  %v1072_v39 = vadd.f32 %v1071_v61, %v1070_v32  ;;  %v978_v2 = vrot.slane %v977_v12, 2 }
 0x1b5   :  { %v967_v31 = vadd.f32 %v966_v30, %v965_v24  ;;  %v1528_v16 = vadd.f32 %v1527_v49, %v1526_v20  ;;  %v987_v14 = vrot.slane %v986_v0, 1  ;;  %v1060_v37 = vrot.slane %v1059_v3, 4 }
 0x1b6   :  { %v1201_v18 = vmul.f32 %v10998_v57, %v10998_v57  ;;  %v1536_v27 = vrot.slane %v1535_v26, 2  ;;  %v1121_v25 = vmul.f32 0.125, %v1072_v39  ;;  %v979_v41 = vadd.f32 %v978_v2, %v977_v12 }
 0x1b7   :  { %v1503_v17 = vrot.slane %v1502_v52, 1  ;;  %v1516_v1 = vadd.f32 %v1515_v19, %v1514_v50  ;;  %v1529_v13 = vrot.slane %v1528_v16, 2  ;;  %v1061_v8 = vadd.f32 %v1060_v37, %v1059_v3 }
 0x1b8   :  { %v1524_v45 = vrot.slane %v1523_v63, 1  ;;  %v11006_v48 = vsub.f32 %v12181_v21, %v1104_v22  ;;  %v11009_v61 = vsub.f32 %v10660_v6, %v1121_v25  ;;  %v980_v24 = vrot.slane %v979_v41, 1 }
 0x1b9   :  { %v11012_v7 = vsub.f32 %v10600_v59, %v1107_v58  ;;  %v1106_v55 = vmul.f32 0.125, %v967_v31  ;;  %v988_v32 = vadd.f32 %v987_v14, %v986_v0  ;;  %v1062_v30 = vrot.slane %v1061_v8, 2 }
 0x1ba   :  { %v1537_v20 = vadd.f32 %v1536_v27, %v1535_v26  ;;  %v1217_v50 = vmul.f32 %v11009_v61, %v11009_v61  ;;  %v981_v12 = vadd.f32 %v980_v24, %v979_v41  ;;  %v1504_v3 = vadd.f32 %v1503_v17, %v1502_v52  ;;  %v12192_v41 = vld [vmem:[#allocation27_spill] sm:$0xff]  ;;  %v12193_v17 = vld [vmem:[#allocation30_spill] sm:$0xff] }
 0x1bb   :  { %v1435_v19 = vsel %vm736_vm1, %v1201_v18, 0.0  ;;  %v1517_v21 = vrot.slane %v1516_v1, 1  ;;  %v1530_v22 = vadd.f32 %v1529_v13, %v1528_v16  ;;  %v10154_v49 = vmov 0.0  }
 0x1bc   :  { %9407 = vmatprep.subr.mxu1 %v10154_v49  ;;  %9402 = vmatprep.subr.mxu0 %v10154_v49  ;;  %v1200_v59 = vmul.f32 %v11006_v48, %v11006_v48  ;;  %v1547_v6 = vsel %vm736_vm1, %v1217_v50, 0.0  ;;  %v1063_v0 = vadd.f32 %v1062_v30, %v1061_v8  ;;  %v1525_v26 = vadd.f32 %v1524_v45, %v1523_v63 }
 0x1bd   :  { %9408 = vmatpush3.xpose.msk.msra.mxu1 %vm736_vm1, %v10666_v28  ;;  %9403 = vmatpush3.xpose.msk.msra.mxu0 %vm736_vm1, %v10686_v4  ;;  %v1203_v52 = vmul.f32 %v11012_v7, %v11012_v7  ;;  %v1109_v58 = vmul.f32 0.125, %v988_v32  ;;  %v1548_v39 = vrot.slane %v1547_v6, 4  ;;  %v1538_v2 = vrot.slane %v1537_v20, 1 }
 0x1be   :  { %9409 = vmatprep.mubr.msk.f32.mxu1 %vm10155_vm2, %v10154_v49  ;;  %9404 = vmatprep.mubr.msk.f32.mxu0 %vm10155_vm2, %v10154_v49  ;;  %v11033_v31 = vsub.f32 %v10621_v44, %v1106_v55  ;;  %v1108_v28 = vmul.f32 0.125, %v981_v12  ;;  %v1064_v16 = vrot.slane %v1063_v0, 1  ;;  %v1594_v4 = vmul.f32 0.125, %v1504_v3  ;;  %v12194_v12 = vld [vmem:[#allocation25_spill] sm:$0xff] }
 0x1bf   :  { %9417 = vmatprep.subr.mxu1 %v10154_v49  ;;  %9412 = vmatprep.subr.mxu0 %v10154_v49  ;;  %v1518_v63 = vadd.f32 %v1517_v21, %v1516_v1  ;;  %v1531_v14 = vrot.slane %v1530_v22, 1  ;;  %v1549_v37 = vadd.f32 %v1548_v39, %v1547_v6  ;;  %v1417_v18 = vrot.slane %v10986_v53, 2  ;;  %v12195_v3 = vld [vmem:[#allocation29_spill] sm:$0xff]  ;;  %v12197_v6 = vld [vmem:[#allocation6_spill] sm:$0xff] }
 0x1c0   :  { %9410 = vmatmul.mubr.msk.f32.vlgmr.msra.gmra.mrb[24].mxu1 %vm736_vm1, %v10653_v11  ;;  %9405 = vmatmul.mubr.msk.f32.vlgmr.msra.gmra.mrb[24].mxu0 %vm736_vm1, %v10669_v33  ;;  %v1436_v44 = vrot.slane %v1435_v19, 4  ;;  %v1428_v27 = vsel %vm736_vm1, %v1200_v59, 0.0  ;;  %v1065_v25 = vadd.f32 %v1064_v16, %v1063_v0  ;;  %v1597_v1 = vmul.f32 0.125, %v1525_v26  ;;  %v12196_v59 = vld [vmem:[#allocation3_spill] sm:$0xff]  ;;  %v12198_v16 = vld [vmem:[#allocation2_spill] sm:$0xff] }
 0x1c1   :  { %9418 = vmatpush3.xpose.msk.msra.mxu1 %vm736_vm1, %v12192_v41  ;;  %9413 = vmatpush3.xpose.msk.msra.mxu0 %vm736_vm1, %v12193_v17  ;;  %v1449_v13 = vsel %vm736_vm1, %v1203_v52, 0.0  ;;  %v11049_v11 = vsub.f32 %v10646_v40, %v1109_v58  ;;  %v1550_v8 = vrot.slane %v1549_v37, 2  ;;  %v1539_v33 = vadd.f32 %v1538_v2, %v1537_v20  ;;  %v12201_v41 = vld [vmem:[#allocation8_spill] sm:$0xff] }
 0x1c2   :  { %9419 = vmatprep.mubr.msk.f32.mxu1 %vm10155_vm2, %v10154_v49  ;;  %9414 = vmatprep.mubr.msk.f32.mxu0 %vm10155_vm2, %v10154_v49  ;;  %v1202_v45 = vmul.f32 %v11033_v31, %v11033_v31  ;;  %v11058_v24 = vsub.f32 %v10674_v54, %v1108_v28  ;;  %v1120_v55 = vmul.f32 0.125, %v1065_v25  ;;  %v1642_v40 = vadd.f32 1e-05, %v1594_v4  ;;  %v12199_v4 = vld [vmem:[#allocation5_spill] sm:$0xff] }
 0x1c3   :  { %9427 = vmatprep.subr.mxu1 %v10154_v49  ;;  %9422 = vmatprep.subr.mxu0 %v10154_v49  ;;  %v1596_v32 = vmul.f32 0.125, %v1518_v63  ;;  %v1532_v30 = vadd.f32 %v1531_v14, %v1530_v22  ;;  %v1551_v50 = vadd.f32 %v1550_v8, %v1549_v37  ;;  %10010 = vrsqrt.f32 %v10995_v9 }
 0x1c4   :  { %9420 = vmatmul.mubr.msk.f32.vlgmr.msra.gmra.mrb[26].mxu1 %vm736_vm1, %v12194_v12  ;;  %9415 = vmatmul.mubr.msk.f32.vlgmr.msra.gmra.mrb[26].mxu0 %vm736_vm1, %v12195_v3  ;;  %v1437_v20 = vadd.f32 %v1436_v44, %v1435_v19  ;;  %v1429_v54 = vrot.slane %v1428_v27, 4  ;;  %v11068_v21 = vsub.f32 %v10688_v42, %v1120_v55  ;;  %v1645_v22 = vadd.f32 1e-05, %v1597_v1  ;;  %v12202_v55 = vld [vmem:[#allocation34_spill] sm:$0xff] }
 0x1c5   :  { %9428 = vmatpush3.xpose.msk.msra.mxu1 %vm736_vm1, %v12196_v59  ;;  %9423 = vmatpush3.xpose.msk.msra.mxu0 %vm736_vm1, %v12197_v6  ;;  %v1450_v0 = vrot.slane %v1449_v13, 4  ;;  %v1205_v26 = vmul.f32 %v11049_v11, %v11049_v11  ;;  %v1552_v52 = vrot.slane %v1551_v50, 1  ;;  %v1599_v42 = vmul.f32 0.125, %v1539_v33 }
 0x1c6   :  { %9429 = vmatprep.mubr.msk.f32.mxu1 %vm10155_vm2, %v10154_v49  ;;  %9424 = vmatprep.mubr.msk.f32.mxu0 %vm10155_vm2, %v10154_v49  ;;  %v1442_v9 = vsel %vm736_vm1, %v1202_v45, 0.0  ;;  %v1204_v19 = vmul.f32 %v11058_v24, %v11058_v24  ;;  %v1216_v58 = vmul.f32 %v11068_v21, %v11068_v21  ;;  %10012 = vrsqrt.f32 %v1642_v40 }
 0x1c7   :  { %9437 = vmatprep.subr.mxu1 %v10154_v49  ;;  %9432 = vmatprep.subr.mxu0 %v10154_v49  ;;  %v1644_v39 = vadd.f32 1e-05, %v1596_v32  ;;  %v1598_v2 = vmul.f32 0.125, %v1532_v30  ;;  %v1553_v28 = vadd.f32 %v1552_v52, %v1551_v50  ;;  %v12200_v63 = vrot.slane %v10944_v34, 2 }
 0x1c8   :  { %9430 = vmatmul.mubr.msk.f32.vlgmr.msra.gmra.mrb[28].mxu1 %vm736_vm1, %v12198_v16  ;;  %9425 = vmatmul.mubr.msk.f32.vlgmr.msra.gmra.mrb[28].mxu0 %vm736_vm1, %v12199_v4  ;;  %v11097_v37 = vadd.f32 %v1417_v18, %v10986_v53  ;;  %v1438_v44 = vrot.slane %v1437_v20, 2  ;;  %v1540_v25 = vsel %vm736_vm1, %v1216_v58, 0.0  ;;  %v1430_v17 = vadd.f32 %v1429_v54, %v1428_v27 }
 0x1c9   :  { %v11094_v14 = vadd.f32 %v12200_v63, %v10944_v34  ;;  %9438 = vmatpush3.xpose.msk.msra.mxu1 %vm736_vm1, %v12201_v41  ;;  %9433 = vmatpush3.xpose.msk.msra.mxu0 %vm736_vm1, %v10821_v60  ;;  %v1443_v1 = vrot.slane %v1442_v9, 4  ;;  %v1463_v8 = vsel %vm736_vm1, %v1205_v26, 0.0  ;;  %v1541_v33 = vrot.slane %v1540_v25, 4  ;;  %v12206_v26 = vld [vmem:[#allocation41_spill] sm:$0xff]  ;;  %v12208_v41 = vld [vmem:[#allocation42_spill] sm:$0xff] }
 0x1ca   :  { %9439 = vmatprep.mubr.msk.f32.mxu1 %vm10155_vm2, %v10154_v49  ;;  %9434 = vmatprep.mubr.msk.f32.mxu0 %vm10155_vm2, %v10154_v49  ;;  %10014 = vrsqrt.f32 %v1645_v22  ;;  %v1451_v34 = vadd.f32 %v1450_v0, %v1449_v13  ;;  %v1647_v53 = vadd.f32 1e-05, %v1599_v42  ;;  %v1456_v18 = vsel %vm736_vm1, %v1204_v19, 0.0  ;;  %v12205_v0 = vld [vmem:[#allocation38_spill] sm:$0xff]  ;;  %v12207_v42 = vld [vmem:[#allocation40_spill] sm:$0xff] }
 0x1cb   :  { %9447 = vmatprep.subr.mxu1 %v10154_v49  ;;  %9442 = vmatprep.subr.mxu0 %v10154_v49  ;;  %10016 = vrsqrt.f32 %v1644_v39  ;;  %v1646_v60 = vadd.f32 1e-05, %v1598_v2  ;;  %v1601_v27 = vmul.f32 0.125, %v1553_v28  ;;  %v1542_v45 = vadd.f32 %v1541_v33, %v1540_v25 }
 0x1cc   :  { %9440 = vmatmul.mubr.msk.f32.vlgmr.msra.gmra.mrb[30].mxu1 %vm736_vm1, %v12202_v55  ;;  %9435 = vmatmul.mubr.msk.f32.vlgmr.msra.gmra.mrb[30].mxu0 %vm736_vm1, %v10805_v36  ;;  %v1734_v13 = vmul.f32 %v10960_v15, %v10832_v43  ;;  %v12203_v40 = vrot.slane %v10942_v5, 1  ;;  %v1426_v30 = vrot.slane %v11094_v14, 1  ;;  %v1464_v50 = vrot.slane %v1463_v8, 4 }
 0x1cd   :  { %9448 = vmatpush3.xpose.msk.msra.mxu1 %vm736_vm1, %v10859_v62  ;;  %9443 = vmatpush3.xpose.msk.msra.mxu0 %vm736_vm1, %v10881_v29  ;;  %v1431_v12 = vrot.slane %v1430_v17, 2  ;;  %v1444_v3 = vadd.f32 %v1443_v1, %v1442_v9  ;;  %v1457_v54 = vrot.slane %v1456_v18, 4  ;;  %v1543_v36 = vrot.slane %v1542_v45, 2  ;;  %v10011_v43 = vpop.eup %10010  ;;  %v12209_v1 = vld [vmem:[#allocation17_spill] sm:$0xff] }
 0x1ce   :  { %v1406_v32 = vadd.f32 %v12203_v40, %v10942_v5  ;;  %9449 = vmatprep.mubr.msk.f32.mxu1 %vm10155_vm2, %v10154_v49  ;;  %9444 = vmatprep.mubr.msk.f32.mxu0 %vm10155_vm2, %v10154_v49  ;;  %v12204_v5 = vld [vmem:[#allocation11_spill] sm:$0xff]  ;;  %v1419_v59 = vrot.slane %v11097_v37, 1  ;;  %v1439_v62 = vadd.f32 %v1438_v44, %v1437_v20  ;;  %10018 = vrsqrt.f32 %v1647_v53 }
 0x1cf   :  { %v1737_v15 = vmul.f32 %v10981_v10, %v12204_v5  ;;  %9457 = vmatprep.subr.mxu1 %v10154_v49  ;;  %9452 = vmatprep.subr.mxu0 %v10154_v49  ;;  %v1452_v29 = vrot.slane %v1451_v34, 2  ;;  %10020 = vrsqrt.f32 %v1646_v60  ;;  %v1649_v6 = vadd.f32 1e-05, %v1601_v27  ;;  %v12210_v27 = vld [vmem:[#allocation43_spill] sm:$0xff] }
 0x1d0   :  { %v1544_v22 = vadd.f32 %v1543_v36, %v1542_v45  ;;  %9450 = vmatmul.mubr.msk.f32.vlgmr.msra.gmra.mrb[32].mxu1 %vm736_vm1, %v12205_v0  ;;  %9445 = vmatmul.mubr.msk.f32.vlgmr.msra.gmra.mrb[32].mxu0 %vm736_vm1, %v12206_v26  ;;  %v1758_v52 = vmul.f32 0.35355338, %v1734_v13  ;;  %v1629_v10 = vadd.f32 1e-05, %v10921_v51  ;;  %v1736_v20 = vmul.f32 %v10991_v35, %v12207_v42  ;;  %v10013_v19 = vpop.eup %10012  ;;  %v12211_v40 = vld [vmem:[#allocation23_spill] sm:$0xff]  ;;  %v12217_v0 = vld [vmem:[#allocation33_spill] sm:$0xff] }
 0x1d1   :  { %v1465_v9 = vadd.f32 %v1464_v50, %v1463_v8  ;;  %9458 = vmatpush3.xpose.msk.msra.mxu1 %vm736_vm1, %v10897_v47  ;;  %9453 = vmatpush3.xpose.msk.msra.mxu0 %vm736_vm1, %v10911_v38  ;;  %v1432_v58 = vadd.f32 %v1431_v12, %v1430_v17  ;;  %v1445_v39 = vrot.slane %v1444_v3, 2  ;;  %v1458_v2 = vadd.f32 %v1457_v54, %v1456_v18 }
 0x1d2   :  { %v1545_v28 = vrot.slane %v1544_v22, 1  ;;  %9459 = vmatprep.mubr.msk.f32.mxu1 %vm10155_vm2, %v10154_v49  ;;  %9454 = vmatprep.mubr.msk.f32.mxu0 %vm10155_vm2, %v10154_v49  ;;  %v1761_v51 = vmul.f32 0.35355338, %v1737_v15  ;;  %v1580_v35 = vmul.f32 0.125, %v1406_v32  ;;  %v1427_v16 = vadd.f32 %v1426_v30, %v11094_v14  ;;  %v12212_v32 = vld [vmem:[#allocation24_spill] sm:$0xff] }
 0x1d3   :  { %v1420_v47 = vadd.f32 %v1419_v59, %v11097_v37  ;;  %9467 = vmatprep.subr.mxu1 %v10154_v49  ;;  %9462 = vmatprep.subr.mxu0 %v10154_v49  ;;  %v1440_v38 = vrot.slane %v1439_v62, 1  ;;  %v1453_v4 = vadd.f32 %v1452_v29, %v1451_v34  ;;  %10022 = vrsqrt.f32 %v1649_v6  ;;  %v12215_v29 = vld [vmem:[#allocation32_spill] sm:$0xff] }
 0x1d4   :  { %v1546_v63 = vadd.f32 %v1545_v28, %v1544_v22  ;;  %9460 = vmatmul.mubr.msk.f32.vlgmr.msra.gmra.mrb[34].mxu1 %vm736_vm1, %v10889_v23  ;;  %9455 = vmatmul.mubr.msk.f32.vlgmr.msra.gmra.mrb[34].mxu0 %vm736_vm1, %v10900_v46  ;;  %v10015_v44 = vpop.eup %10014  ;;  %v1760_v25 = vmul.f32 0.35355338, %v1736_v20  ;;  %v1739_v14 = vmul.f32 %v10011_v43, %v10894_v56  ;;  %v1738_v37 = vmul.f32 %v10013_v19, %v12208_v41  ;;  %v12216_v22 = vld [vmem:[#allocation21_spill] sm:$0xff]  ;;  %v12219_v19 = vld [vmem:[#allocation18_spill] sm:$0xff] }
 0x1d5   :  { %v1466_v17 = vrot.slane %v1465_v9, 2  ;;  %9468 = vmatpush3.xpose.msk.msra.mxu1 %vm736_vm1, %v12209_v1  ;;  %9463 = vmatpush3.xpose.msk.msra.mxu0 %vm736_vm1, %v1758_v52  ;;  %v10017_v8 = vpop.eup %10016  ;;  %v1433_v33 = vrot.slane %v1432_v58, 1  ;;  %v1446_v34 = vadd.f32 %v1445_v39, %v1444_v3  ;;  %v1459_v53 = vrot.slane %v1458_v2, 2  ;;  %v12213_v3 = vld [vmem:[#allocation47_spill] sm:$0xff]  ;;  %v12220_v39 = vld [vmem:[#allocation48_spill] sm:$0xff]  ;;  %v12221_v28 = vld [vmem:[#allocation49_spill] sm:$0xff] }
 0x1d6   :  { %v1600_v23 = vmul.f32 0.125, %v1546_v63  ;;  %9469 = vmatprep.mubr.msk.f32.mxu1 %vm10155_vm2, %v10154_v49  ;;  %9464 = vmatprep.mubr.msk.f32.mxu0 %vm10155_vm2, %v10154_v49  ;;  %10024 = vrsqrt.f32 %v1629_v10  ;;  %v1628_v56 = vadd.f32 1e-05, %v1580_v35  ;;  %v1583_v46 = vmul.f32 0.125, %v1427_v16  ;;  %v12224_v41 = vld [vmem:[#allocation26_spill] sm:$0xff] }
 0x1d7   :  { %v1582_v18 = vmul.f32 0.125, %v1420_v47  ;;  %9477 = vmatprep.subr.mxu1 %v10154_v49  ;;  %9472 = vmatprep.subr.mxu0 %v10154_v49  ;;  %v1441_v60 = vadd.f32 %v1440_v38, %v1439_v62  ;;  %v1741_v45 = vmul.f32 %v10015_v44, %v12210_v27  ;;  %v1454_v55 = vrot.slane %v1453_v4, 1  ;;  %v12214_v62 = vld [vmem:[#allocation20_spill] sm:$0xff]  ;;  %v12222_v44 = vld [vmem:[#allocation22_spill] sm:$0xff] }
 0x1d8   :  { %v1648_v13 = vadd.f32 1e-05, %v1600_v23  ;;  %9470 = vmatmul.mubr.msk.f32.vlgmr.msra.gmra.mrb[36].mxu1 %vm736_vm1, %v12211_v40  ;;  %9465 = vmatmul.mubr.msk.f32.vlgmr.msra.gmra.mrb[36].mxu0 %vm736_vm1, %v12212_v32  ;;  %v10019_v30 = vpop.eup %10018  ;;  %v1763_v50 = vmul.f32 0.35355338, %v1739_v14  ;;  %v1762_v12 = vmul.f32 0.35355338, %v1738_v37  ;;  %v1740_v54 = vmul.f32 %v10017_v8, %v12213_v3 }
 0x1d9   :  { %v1467_v36 = vadd.f32 %v1466_v17, %v1465_v9  ;;  %9478 = vmatpush3.xpose.msk.msra.mxu1 %vm736_vm1, %v1761_v51  ;;  %9473 = vmatpush3.xpose.msk.msra.mxu0 %vm736_vm1, %v1760_v25  ;;  %v10021_v43 = vpop.eup %10020  ;;  %v1434_v5 = vadd.f32 %v1433_v33, %v1432_v58  ;;  %v1447_v15 = vrot.slane %v1446_v34, 1  ;;  %v1460_v59 = vadd.f32 %v1459_v53, %v1458_v2  ;;  %v12218_v9 = vld [vmem:[#allocation28_spill] sm:$0xff]  ;;  %v12223_v25 = vld [vmem:[#allocation35_spill] sm:$0xff]  ;;  %v12229_v3 = vld [vmem:[#allocation14_spill] sm:$0xff] }
 0x1da   :  { %10026 = vrsqrt.f32 %v1648_v13  ;;  %9479 = vmatprep.mubr.msk.f32.mxu1 %vm10155_vm2, %v10154_v49  ;;  %9474 = vmatprep.mubr.msk.f32.mxu0 %vm10155_vm2, %v10154_v49  ;;  %v1715_v6 = vmul.f32 %v12215_v29, %v12214_v62  ;;  %v1714_v26 = vmul.f32 %v12217_v0, %v12216_v22  ;;  %v1631_v52 = vadd.f32 1e-05, %v1583_v46  ;;  %v12225_v37 = vld [vmem:[#allocation36_spill] sm:$0xff]  ;;  %v12233_v62 = vld [vmem:[#allocation45_spill] sm:$0xff] }
 0x1db   :  { %10028 = vrsqrt.f32 %v1628_v56  ;;  %9487 = vmatprep.subr.mxu1 %v10154_v49  ;;  %9482 = vmatprep.subr.mxu0 %v10154_v49  ;;  %v1585_v10 = vmul.f32 0.125, %v1441_v60  ;;  %v1765_v42 = vmul.f32 0.35355338, %v1741_v45  ;;  %v1455_v20 = vadd.f32 %v1454_v55, %v1453_v4  ;;  %v12227_v45 = vld [vmem:[#allocation39_spill] sm:$0xff] }
 0x1dc   :  { %9480 = vmatmul.mubr.msk.f32.vlgmr.msra.gmra.mrb[38].mxu1 %vm736_vm1, %v12218_v9  ;;  %9475 = vmatmul.mubr.msk.f32.vlgmr.msra.gmra.mrb[38].mxu0 %vm736_vm1, %v12219_v19  ;;  %v1764_v58 = vmul.f32 0.35355338, %v1740_v54  ;;  %v1743_v2 = vmul.f32 %v10019_v30, %v12220_v39  ;;  %v1742_v51 = vmul.f32 %v10021_v43, %v12221_v28  ;;  %v1468_v35 = vrot.slane %v1467_v36, 1 }
 0x1dd   :  { %9488 = vmatpush3.xpose.msk.msra.mxu1 %vm736_vm1, %v1763_v50  ;;  %9483 = vmatpush3.xpose.msk.msra.mxu0 %vm736_vm1, %v1762_v12  ;;  %v10023_v16 = vpop.eup %10022  ;;  %v1630_v47 = vadd.f32 1e-05, %v1582_v18  ;;  %v1584_v38 = vmul.f32 0.125, %v1434_v5  ;;  %v1448_v4 = vadd.f32 %v1447_v15, %v1446_v34  ;;  %v1461_v63 = vrot.slane %v1460_v59, 1  ;;  %v12228_v12 = vld [vmem:[#allocation31_spill] sm:$0xff]  ;;  %v12230_v5 = vld [vmem:[#allocation37_spill] sm:$0xff] }
 0x1de   :  { %9489 = vmatprep.mubr.msk.f32.mxu1 %vm10155_vm2, %v10154_v49  ;;  %9484 = vmatprep.mubr.msk.f32.mxu0 %vm10155_vm2, %v10154_v49  ;;  %v1717_v14 = vmul.f32 %v12223_v25, %v12222_v44  ;;  %v1716_v17 = vmul.f32 %v12225_v37, %v12224_v41  ;;  %10030 = vrsqrt.f32 %v1631_v52  ;;  %v1633_v1 = vadd.f32 1e-05, %v1585_v10  ;;  %v12231_v15 = vld [vmem:[#allocation44_spill] sm:$0xff]  ;;  %v12235_v52 = vld [vmem:[#allocation19_spill] sm:$0xff]  ;;  %v12241_v25 = vld [vmem:[#allocation46_spill] sm:$0xff] }
 0x1df   :  { %9497 = vmatprep.subr.mxu1 %v10154_v49  ;;  %9492 = vmatprep.subr.mxu0 %v10154_v49  ;;  %v1587_v8 = vmul.f32 0.125, %v1455_v20  ;;  %v1767_v34 = vmul.f32 0.35355338, %v1743_v2  ;;  %v1766_v53 = vmul.f32 0.35355338, %v1742_v51  ;;  %v1469_v23 = vadd.f32 %v1468_v35, %v1467_v36  ;;  %v12237_v20 = vld [vmem:[#allocation15_spill] sm:$0xff] }
 0x1e0   :  { %9490 = vmatmul.mubr.msk.f32.vlgmr.msra.gmra.mrb[40].mxu1 %vm736_vm1, %v1715_v6  ;;  %9485 = vmatmul.mubr.msk.f32.vlgmr.msra.gmra.mrb[40].mxu0 %vm736_vm1, %v1714_v26  ;;  %v10025_v33 = vpop.eup %10024  ;;  %v1745_v56 = vmul.f32 %v10023_v16, %v11009_v61  ;;  %10032 = vrsqrt.f32 %v1630_v47  ;;  %v1632_v46 = vadd.f32 1e-05, %v1584_v38  ;;  %v1586_v18 = vmul.f32 0.125, %v1448_v4  ;;  %v12226_v61 = vld [vmem:[#allocation4_spill] sm:$0xff]  ;;  %v12234_v26 = vld [vmem:[#allocation7_spill] sm:$0xff]  ;;  %v12239_v51 = vld [vmem:[#allocation13_spill] sm:$0xff] }
 0x1e1   :  { %9498 = vmatpush3.xpose.msk.msra.mxu1 %vm736_vm1, %v1765_v42  ;;  %9493 = vmatpush3.xpose.msk.msra.mxu0 %vm736_vm1, %v1764_v58  ;;  %v1462_v60 = vadd.f32 %v1461_v63, %v1460_v59  ;;  %v1719_v55 = vmul.f32 %v12227_v45, %v12226_v61  ;;  %10034 = vrsqrt.f32 %v1633_v1  ;;  %v1635_v40 = vadd.f32 1e-05, %v1587_v8  ;;  %v12236_v42 = vld [vmem:[#allocation10_spill] sm:$0xff]  ;;  %v12238_v2 = vld [vmem:[#allocation12_spill] sm:$0xff]  ;;  %v11333_v45 = vld [vmem:[%s12058_s1 + $0x8] sm:$0xff] }
 0x1e2   :  { %9499 = vmatprep.mubr.msk.f32.mxu1 %vm10155_vm2, %v10154_v49  ;;  %9494 = vmatprep.mubr.msk.f32.mxu0 %vm10155_vm2, %v10154_v49  ;;  %v1589_v32 = vmul.f32 0.125, %v1469_v23  ;;  %v1769_v30 = vmul.f32 0.35355338, %v1745_v56  ;;  %v1718_v54 = vmul.f32 %v12229_v3, %v12228_v12  ;;  %10036 = vrsqrt.f32 %v1632_v46  ;;  %v12240_v63 = vld [vmem:[#allocation16_spill] sm:$0xff]  ;;  %v11323_v61 = vld [vmem:[%s12058_s1] sm:$0xff]  ;;  %v11392_v3 = vld [vmem:[%s12058_s1 + $0x48] sm:$0xff] }
 0x1e3   :  { %9507 = vmatprep.subr.mxu1 %v10154_v49  ;;  %9502 = vmatprep.subr.mxu0 %v10154_v49  ;;  %v1634_v36 = vadd.f32 1e-05, %v1586_v18  ;;  %v1588_v43 = vmul.f32 0.125, %v1462_v60  ;;  %v1723_v59 = vmul.f32 %v12231_v15, %v12230_v5  ;;  %10038 = vrsqrt.f32 %v1635_v40  ;;  %v11355_v40 = vld [vmem:[%s12058_s1 + $0x20] sm:$0xff] }
 0x1e4   :  { %v10027_v27 = vpop.eup %10026  ;;  %9500 = vmatmul.mubr.msk.f32.vlgmr.msra.gmra.mrb[42].mxu1 %vm736_vm1, %v1717_v14  ;;  %9495 = vmatmul.mubr.msk.f32.vlgmr.msra.gmra.mrb[42].mxu0 %vm736_vm1, %v1716_v17  ;;  %v1637_v22 = vadd.f32 1e-05, %v1589_v32  ;;  %v1721_v10 = vmul.f32 %v12235_v52, %v12234_v26  ;;  %v1720_v9 = vmul.f32 %v12237_v20, %v12236_v42  ;;  %v1725_v28 = vmul.f32 %v10025_v33, %v12238_v2  ;;  %v11364_v32 = vld [vmem:[%s12058_s1 + $0x28] sm:$0xff]  ;;  %v11383_v12 = vld [vmem:[%s12058_s1 + $0x40] sm:$0xff] }
 0x1e5   :  { %v10029_v13 = vpop.eup %10028  ;;  %v1744_v50 = vmul.f32 %v10027_v27, %v11068_v21  ;;  %9508 = vmatpush3.xpose.msk.msra.mxu1 %vm736_vm1, %v1767_v34  ;;  %9503 = vmatpush3.xpose.msk.msra.mxu0 %vm736_vm1, %v1766_v53  ;;  %v12232_v21 = vld [vmem:[#allocation9_spill] sm:$0xff]  ;;  %10040 = vrsqrt.f32 %v1634_v36  ;;  %v1636_v19 = vadd.f32 1e-05, %v1588_v43  ;;  %v1771_v58 = vmul.f32 0.37796447, %v1723_v59  ;;  %v4728_v27 = vld [vmem:[%s12057_s3] sm:$0xff] }
 0x1e6   :  { %9509 = vmatprep.mubr.msk.f32.mxu1 %vm10155_vm2, %v10154_v49  ;;  %9504 = vmatprep.mubr.msk.f32.mxu0 %vm10155_vm2, %v10154_v49  ;;  %v1722_v29 = vmul.f32 %v12233_v62, %v12232_v21  ;;  %v1724_v35 = vmul.f32 %v10029_v13, %v12239_v51  ;;  %10042 = vrsqrt.f32 %v1637_v22  ;;  %v1773_v38 = vmul.f32 0.37796447, %v1725_v28  ;;  %v11350_v13 = vld [vmem:[%s12058_s1 + $0x18] sm:$0xff] }
 0x1e7   :  { %v1768_v6 = vmul.f32 0.35355338, %v1744_v50  ;;  %9517 = vmatprep.subr.mxu1 %v10154_v49  ;;  %9512 = vmatprep.subr.mxu0 %v10154_v49  ;;  %10044 = vrsqrt.f32 %v1636_v19  ;;  %v11378_v50 = vld [vmem:[%s12058_s1 + $0x38] sm:$0xff] }
 0x1e8   :  { %9510 = vmatmul.mubr.msk.f32.vlgmr.msra.gmra.mrb[44].mxu1 %vm736_vm1, %v1719_v55  ;;  %9505 = vmatmul.mubr.msk.f32.vlgmr.msra.gmra.mrb[44].mxu0 %vm736_vm1, %v1718_v54  ;;  %v10031_v0 = vpop.eup %10030  ;;  %v1770_v39 = vmul.f32 0.37796447, %v1722_v29  ;;  %v1772_v4 = vmul.f32 0.37796447, %v1724_v35  ;;  %v11338_v55 = vld [vmem:[%s12058_s1 + $0x10] sm:$0xff]  ;;  %v11406_v36 = vld [vmem:[%s12058_s1 + $0x58] sm:$0xff] }
 0x1e9   :  { %9518 = vmatpush3.xpose.msk.msra.mxu1 %vm736_vm1, %v1769_v30  ;;  %9513 = vmatpush3.xpose.msk.msra.mxu0 %vm736_vm1, %v1768_v6  ;;  %v1727_v44 = vmul.f32 %v10031_v0, %v12240_v63  ;;  %v11369_v30 = vld [vmem:[%s12058_s1 + $0x30] sm:$0xff] }
 0x1ea   :  { %9519 = vmatprep.mubr.msk.f32.mxu1 %vm10155_vm2, %v10154_v49  ;;  %9514 = vmatprep.mubr.msk.f32.mxu0 %vm10155_vm2, %v10154_v49  ;;  %v10033_v16 = vpop.eup %10032  ;;  %v11397_v54 = vld [vmem:[%s12058_s1 + $0x50] sm:$0xff] }
 0x1eb   :  { %9527 = vmatprep.subr.mxu1 %v10154_v49  ;;  %9522 = vmatprep.subr.mxu0 %v10154_v49  ;;  %v10035_v47 = vpop.eup %10034  ;;  %v1726_v14 = vmul.f32 %v10033_v16, %v12241_v25  ;;  %v1775_v17 = vmul.f32 0.37796447, %v1727_v44 }
 0x1ec   :  { %9520 = vmatmul.mubr.msk.f32.vlgmr.msra.gmra.mrb[46].mxu1 %vm736_vm1, %v1721_v10  ;;  %9515 = vmatmul.mubr.msk.f32.vlgmr.msra.gmra.mrb[46].mxu0 %vm736_vm1, %v1720_v9  ;;  %v10037_v41 = vpop.eup %10036  ;;  %v1729_v8 = vmul.f32 %v10035_v47, %v10998_v57 }
 0x1ed   :  { %9528 = vmatpush3.xpose.msk.msra.mxu1 %vm736_vm1, %v1771_v58  ;;  %9523 = vmatpush3.xpose.msk.msra.mxu0 %vm736_vm1, %v1770_v39  ;;  %v10039_v37 = vpop.eup %10038  ;;  %v1774_v1 = vmul.f32 0.37796447, %v1726_v14  ;;  %v1728_v33 = vmul.f32 %v10037_v41, %v11006_v48 }
 0x1ee   :  { %9529 = vmatprep.mubr.msk.f32.mxu1 %vm10155_vm2, %v10154_v49  ;;  %9524 = vmatprep.mubr.msk.f32.mxu0 %vm10155_vm2, %v10154_v49  ;;  %v1777_v48 = vmul.f32 0.37796447, %v1729_v8  ;;  %v1731_v23 = vmul.f32 %v10039_v37, %v11012_v7 }
 0x1ef   :  { %9537 = vmatprep.subr.mxu1 %v10154_v49  ;;  %9532 = vmatprep.subr.mxu0 %v10154_v49  ;;  %v10041_v34 = vpop.eup %10040  ;;  %v1776_v53 = vmul.f32 0.37796447, %v1728_v33 }
 0x1f0   :  { %9530 = vmatmul.mubr.msk.f32.vlgmr.msra.gmra.mrb[48].mxu1 %vm736_vm1, %v1723_v59  ;;  %9525 = vmatmul.mubr.msk.f32.vlgmr.msra.gmra.mrb[48].mxu0 %vm736_vm1, %v1722_v29  ;;  %v10043_v57 = vpop.eup %10042  ;;  %v1730_v56 = vmul.f32 %v10041_v34, %v11033_v31  ;;  %v1779_v7 = vmul.f32 0.37796447, %v1731_v23 }
 0x1f1   :  { %9538 = vmatpush3.xpose.msk.msra.mxu1 %vm736_vm1, %v1773_v38  ;;  %9533 = vmatpush3.xpose.msk.msra.mxu0 %vm736_vm1, %v1772_v4  ;;  %v10045_v46 = vpop.eup %10044  ;;  %v1733_v18 = vmul.f32 %v10043_v57, %v11049_v11 }
 0x1f2   :  { %9539 = vmatprep.mubr.msk.f32.mxu1 %vm10155_vm2, %v10154_v49  ;;  %9534 = vmatprep.mubr.msk.f32.mxu0 %vm10155_vm2, %v10154_v49  ;;  %v1778_v31 = vmul.f32 0.37796447, %v1730_v56  ;;  %v1732_v60 = vmul.f32 %v10045_v46, %v11058_v24 }
 0x1f3   :  { %9547 = vmatprep.subr.mxu1 %v10154_v49  ;;  %9542 = vmatprep.subr.mxu0 %v10154_v49  ;;  %v1781_v11 = vmul.f32 0.37796447, %v1733_v18 }
 0x1f4   :  { %9540 = vmatmul.mubr.msk.f32.vlgmr.msra.gmra.mrb[50].mxu1 %vm736_vm1, %v1725_v28  ;;  %9535 = vmatmul.mubr.msk.f32.vlgmr.msra.gmra.mrb[50].mxu0 %vm736_vm1, %v1724_v35  ;;  %v1780_v24 = vmul.f32 0.37796447, %v1732_v60 }
 0x1f5   :  { %9548 = vmatpush3.xpose.msk.msra.mxu1 %vm736_vm1, %v1775_v17  ;;  %9543 = vmatpush3.xpose.msk.msra.mxu0 %vm736_vm1, %v1774_v1 }
 0x1f6   :  { %9549 = vmatprep.mubr.msk.f32.mxu1 %vm10155_vm2, %v10154_v49  ;;  %9544 = vmatprep.mubr.msk.f32.mxu0 %vm10155_vm2, %v10154_v49 }
 0x1f7   :  { %9557 = vmatprep.subr.mxu1 %v10154_v49  ;;  %9552 = vmatprep.subr.mxu0 %v10154_v49 }
 0x1f8   :  { %9550 = vmatmul.mubr.msk.f32.vlgmr.msra.gmra.mrb[52].mxu1 %vm736_vm1, %v1727_v44  ;;  %9545 = vmatmul.mubr.msk.f32.vlgmr.msra.gmra.mrb[52].mxu0 %vm736_vm1, %v1726_v14 }
 0x1f9   :  { %9558 = vmatpush3.xpose.msk.msra.mxu1 %vm736_vm1, %v1777_v48  ;;  %9553 = vmatpush3.xpose.msk.msra.mxu0 %vm736_vm1, %v1776_v53 }
 0x1fa   :  { %9559 = vmatprep.mubr.msk.f32.mxu1 %vm10155_vm2, %v10154_v49  ;;  %9554 = vmatprep.mubr.msk.f32.mxu0 %vm10155_vm2, %v10154_v49 }
 0x1fb   :  { %9567 = vmatprep.subr.mxu1 %v10154_v49  ;;  %9562 = vmatprep.subr.mxu0 %v10154_v49 }
 0x1fc   :  { %9560 = vmatmul.mubr.msk.f32.vlgmr.msra.gmra.mrb[54].mxu1 %vm736_vm1, %v1729_v8  ;;  %9555 = vmatmul.mubr.msk.f32.vlgmr.msra.gmra.mrb[54].mxu0 %vm736_vm1, %v1728_v33 }
 0x1fd   :  { %9568 = vmatpush3.xpose.msk.msra.mxu1 %vm736_vm1, %v1779_v7  ;;  %9563 = vmatpush3.xpose.msk.msra.mxu0 %vm736_vm1, %v1778_v31 }
 0x1fe   :  { %9569 = vmatprep.mubr.msk.f32.mxu1 %vm10155_vm2, %v10154_v49  ;;  %9564 = vmatprep.mubr.msk.f32.mxu0 %vm10155_vm2, %v10154_v49 }
 0x1ff   :  { %9577 = vmatprep.subr.mxu1 %v10154_v49  ;;  %9572 = vmatprep.subr.mxu0 %v10154_v49 }
 0x200   :  { %9570 = vmatmul.mubr.msk.f32.vlgmr.msra.gmra.mrb[56].mxu1 %vm736_vm1, %v1731_v23  ;;  %9565 = vmatmul.mubr.msk.f32.vlgmr.msra.gmra.mrb[56].mxu0 %vm736_vm1, %v1730_v56 }
 0x201   :  { %9578 = vmatpush3.xpose.msk.msra.mxu1 %vm736_vm1, %v1781_v11  ;;  %9573 = vmatpush3.xpose.msk.msra.mxu0 %vm736_vm1, %v1780_v24 }
 0x202   :  { %9579 = vmatprep.mubr.msk.f32.mxu1 %vm10155_vm2, %v10154_v49  ;;  %9574 = vmatprep.mubr.msk.f32.mxu0 %vm10155_vm2, %v10154_v49 }
 0x203   :  { %9582 = vmatprep.subr.mxu0 %v4728_v27  ;;  %9602 = vmatprep.subr.mxu1 %v10154_v49 }
 0x204   :  { %9580 = vmatmul.mubr.msk.f32.vlgmr.msra.gmra.mrb[58].mxu1 %vm736_vm1, %v1733_v18  ;;  %9575 = vmatmul.mubr.msk.f32.vlgmr.msra.gmra.mrb[58].mxu0 %vm736_vm1, %v1732_v60 }
 0x205   :  { %9583 = vmatpush3.msra.mxu0 %v4728_v27  ;;  %9584 = vmatprep.mubr.msk.f32.mxu0 %vm736_vm1, %v11323_v61 }
 0x206   :  { %9604 = vmatprep.mubr.msk.f32.mxu1 %vm10155_vm2, %v10154_v49  ;;  %9632 = vmatprep.subr.mxu0 %v10154_v49 }
 0x208   :  { %9585 = vmatmul.mubr.msk.f32.vlgmr.msra.gmra.mrb[60].mxu0 %vm736_vm1, %v11333_v45 }
 0x209   :  { %9587 = vmatprep.mubr.msk.f32.mxu0 %vm736_vm1, %v11338_v55 }
 0x20c   :  { %9588 = vmatmul.mubr.msk.f32.gmra.mrb[62].mxu0 %vm736_vm1, %v11350_v13 }
 0x20d   :  { %9590 = vmatprep.mubr.msk.f32.mxu0 %vm736_vm1, %v11355_v40 }
 0x210   :  { %9591 = vmatmul.mubr.msk.f32.gmra.mrb[64].mxu0 %vm736_vm1, %v11364_v32 }
 0x211   :  { %9593 = vmatprep.mubr.msk.f32.mxu0 %vm736_vm1, %v11369_v30 }
 0x214   :  { %9594 = vmatmul.mubr.msk.f32.gmra.mrb[66].mxu0 %vm736_vm1, %v11378_v50 }
 0x215   :  { %9596 = vmatprep.mubr.msk.f32.mxu0 %vm736_vm1, %v11383_v12 }
 0x218   :  { %9597 = vmatmul.mubr.msk.f32.gmra.mrb[68].mxu0 %vm736_vm1, %v11392_v3 }
 0x219   :  { %9599 = vmatprep.mubr.msk.f32.mxu0 %vm736_vm1, %v11397_v54 }
 0x21c   :  { %9600 = vmatmul.mubr.msk.f32.gmra.mrb[70].mxu0 %vm736_vm1, %v11406_v36 }
 0x21d   :  { %9634 = vmatprep.mubr.msk.f32.mxu0 %vm10155_vm2, %v10154_v49 }
 0x293   :  { %v1930_v43 = vpop.f32.mrb[24].mxu1  ;;  %v1854_v5 = vpop.f32.mrb[24].mxu0 }
 0x294   :  { %v9411_v15 = vpop.f32.mrb[25].mxu1  ;;  %v9406_v59 = vpop.f32.mrb[25].mxu0 }
 0x297   :  { %v2082_v21 = vpop.f32.mrb[26].mxu1  ;;  %v2006_v62 = vpop.f32.mrb[26].mxu0 }
 0x298   :  { %v9421_v29 = vpop.f32.mrb[27].mxu1  ;;  %v9416_v6 = vpop.f32.mrb[27].mxu0 }
 0x29b   :  { %v2234_v22 = vpop.f32.mrb[28].mxu1  ;;  %v2158_v0 = vpop.f32.mrb[28].mxu0 }
 0x29c   :  { %v9431_v26 = vpop.f32.mrb[29].mxu1  ;;  %v9426_v52 = vpop.f32.mrb[29].mxu0 }
 0x29f   :  { %v2386_v10 = vpop.f32.mrb[30].mxu1  ;;  %v2310_v42 = vpop.f32.mrb[30].mxu0 }
 0x2a0   :  { %v4519_v20 = vmax.f32 %v1930_v43, %v2386_v10  ;;  %v4518_v9 = vmax.f32 %v1854_v5, %v2310_v42  ;;  %v9441_v19 = vpop.f32.mrb[31].mxu1  ;;  %v9436_v58 = vpop.f32.mrb[31].mxu0 }
 0x2a2   :  { %v4537_v39 = vsub.f32 %v1930_v43, %v4519_v20  ;;  %v4591_v2 = vsub.f32 %v2386_v10, %v4519_v20  ;;  %v4536_v28 = vsub.f32 %v1854_v5, %v4518_v9  ;;  %v4590_v51 = vsub.f32 %v2310_v42, %v4518_v9 }
 0x2a3   :  { %v2538_v35 = vpop.f32.mrb[32].mxu1  ;;  %v2462_v16 = vpop.f32.mrb[32].mxu0 }
 0x2a4   :  { %v4556_v47 = vmul.f32 1.442695, %v4537_v39  ;;  %v4610_v38 = vmul.f32 1.442695, %v4591_v2  ;;  %v4554_v4 = vmul.f32 1.442695, %v4536_v28  ;;  %v4521_v63 = vmax.f32 %v2082_v21, %v2538_v35 }
 0x2a5   :  { %v4608_v44 = vmul.f32 1.442695, %v4590_v51  ;;  %v4520_v25 = vmax.f32 %v2006_v62, %v2462_v16  ;;  %v9451_v14 = vpop.f32.mrb[33].mxu1  ;;  %v9446_v41 = vpop.f32.mrb[33].mxu0 }
 0x2a6   :  { %10046 = vpow2.f32 %v4556_v47  ;;  %v4539_v37 = vsub.f32 %v2082_v21, %v4521_v63  ;;  %v4593_v17 = vsub.f32 %v2538_v35, %v4521_v63 }
 0x2a7   :  { %10048 = vpow2.f32 %v4610_v38  ;;  %v4538_v1 = vsub.f32 %v2006_v62, %v4520_v25  ;;  %v4592_v8 = vsub.f32 %v2462_v16, %v4520_v25  ;;  %v2690_v33 = vpop.f32.mrb[34].mxu1  ;;  %v2614_v34 = vpop.f32.mrb[34].mxu0 }
 0x2a8   :  { %10050 = vpow2.f32 %v4554_v4  ;;  %v4560_v57 = vmul.f32 1.442695, %v4539_v37  ;;  %v4614_v48 = vmul.f32 1.442695, %v4593_v17  ;;  %v4523_v53 = vmax.f32 %v2234_v22, %v2690_v33  ;;  %v9461_v23 = vpop.f32.mrb[35].mxu1  ;;  %v9456_v56 = vpop.f32.mrb[35].mxu0 }
 0x2a9   :  { %10052 = vpow2.f32 %v4608_v44  ;;  %v4558_v46 = vmul.f32 1.442695, %v4538_v1  ;;  %v4612_v7 = vmul.f32 1.442695, %v4592_v8  ;;  %v4522_v31 = vmax.f32 %v2158_v0, %v2614_v34 }
 0x2aa   :  { %10054 = vpow2.f32 %v4560_v57  ;;  %v4541_v18 = vsub.f32 %v2234_v22, %v4523_v53  ;;  %v4595_v60 = vsub.f32 %v2690_v33, %v4523_v53 }
 0x2ab   :  { %10056 = vpow2.f32 %v4614_v48  ;;  %v4540_v11 = vsub.f32 %v2158_v0, %v4522_v31  ;;  %v4594_v24 = vsub.f32 %v2614_v34, %v4522_v31  ;;  %v2842_v27 = vpop.f32.mrb[36].mxu1  ;;  %v2766_v43 = vpop.f32.mrb[36].mxu0 }
 0x2ac   :  { %10058 = vpow2.f32 %v4558_v46  ;;  %v4564_v5 = vmul.f32 1.442695, %v4541_v18  ;;  %v4618_v15 = vmul.f32 1.442695, %v4595_v60  ;;  %v9471_v59 = vpop.f32.mrb[37].mxu1  ;;  %v9466_v21 = vpop.f32.mrb[37].mxu0 }
 0x2ad   :  { %10060 = vpow2.f32 %v4612_v7  ;;  %v4562_v62 = vmul.f32 1.442695, %v4540_v11  ;;  %v4616_v29 = vmul.f32 1.442695, %v4594_v24 }
 0x2ae   :  { %10062 = vpow2.f32 %v4564_v5 }
 0x2af   :  { %10064 = vpow2.f32 %v4618_v15  ;;  %v11412_v6 = vpop.f32.mrb[38].mxu1  ;;  %v11414_v26 = vpop.f32.mrb[38].mxu0 }
 0x2b0   :  { %v11416_v22 = vpop.eup %10046  ;;  %10066 = vpow2.f32 %v4562_v62  ;;  %v9481_v0 = vpop.f32.mrb[39].mxu1 }
 0x2b1   :  { %v9476_v52 = vpop.f32.mrb[39].mxu0  ;;  %v11418_v10 = vpop.eup %10048  ;;  %10068 = vpow2.f32 %v4616_v29 }
 0x2b2   :  { %v11420_v42 = vpop.eup %10050  ;;  %v4645_v20 = vadd.f32 %v11418_v10, %v11416_v22 }
 0x2b3   :  { %v10053_v9 = vpop.eup %10052  ;;  %v11424_v19 = vpop.f32.mrb[40].mxu1 }
 0x2b4   :  { %v11426_v58 = vpop.f32.mrb[40].mxu0  ;;  %v11428_v39 = vpop.eup %10054  ;;  %v4644_v2 = vadd.f32 %v10053_v9, %v11420_v42 }
 0x2b5   :  { %v9491_v28 = vpop.f32.mrb[41].mxu1  ;;  %v9486_v51 = vpop.f32.mrb[41].mxu0 }
 0x2b6   :  { %v11431_v35 = vpop.eup %10056  ;;  %10070 = vrcp.f32 %v4644_v2 }
 0x2b7   :  { %v11433_v16 = vpop.eup %10058  ;;  %v4647_v47 = vadd.f32 %v11431_v35, %v11428_v39  ;;  %10072 = vrcp.f32 %v4645_v20  ;;  %v3298_v4 = vpop.f32.mrb[42].mxu1 }
 0x2b8   :  { %v11437_v38 = vpop.eup %10060  ;;  %v3222_v63 = vpop.f32.mrb[42].mxu0  ;;  %v4525_v14 = vmax.f32 %v2842_v27, %v3298_v4 }
 0x2b9   :  { %v11439_v44 = vpop.eup %10062  ;;  %v4646_v25 = vadd.f32 %v11437_v38, %v11433_v16  ;;  %v4524_v41 = vmax.f32 %v2766_v43, %v3222_v63  ;;  %v9501_v37 = vpop.f32.mrb[43].mxu1  ;;  %10074 = vrcp.f32 %v4647_v47 }
 0x2ba   :  { %v9496_v17 = vpop.f32.mrb[43].mxu0  ;;  %v11443_v1 = vpop.eup %10064  ;;  %v4543_v34 = vsub.f32 %v2842_v27, %v4525_v14  ;;  %v4597_v57 = vsub.f32 %v3298_v4, %v4525_v14 }
 0x2bb   :  { %v11445_v8 = vpop.eup %10066  ;;  %10076 = vrcp.f32 %v4646_v25  ;;  %v4649_v33 = vadd.f32 %v11443_v1, %v11439_v44  ;;  %v4542_v53 = vsub.f32 %v2766_v43, %v4524_v41  ;;  %v4596_v23 = vsub.f32 %v3222_v63, %v4524_v41  ;;  %v3450_v56 = vpop.f32.mrb[44].mxu1 }
 0x2bc   :  { %v11449_v48 = vpop.eup %10068  ;;  %v3374_v46 = vpop.f32.mrb[44].mxu0  ;;  %v4568_v31 = vmul.f32 1.442695, %v4543_v34  ;;  %v4622_v18 = vmul.f32 1.442695, %v4597_v57  ;;  %v4527_v5 = vmax.f32 %v11412_v6, %v3450_v56 }
 0x2bd   :  { %10078 = vrcp.f32 %v4649_v33  ;;  %v4648_v7 = vadd.f32 %v11449_v48, %v11445_v8  ;;  %v9511_v60 = vpop.f32.mrb[45].mxu1  ;;  %v9506_v11 = vpop.f32.mrb[45].mxu0  ;;  %v4566_v24 = vmul.f32 1.442695, %v4542_v53  ;;  %v4526_v27 = vmax.f32 %v11414_v26, %v3374_v46 }
 0x2be   :  { %v4620_v15 = vmul.f32 1.442695, %v4596_v23  ;;  %v4545_v43 = vsub.f32 %v11412_v6, %v4527_v5  ;;  %v4599_v59 = vsub.f32 %v3450_v56, %v4527_v5 }
 0x2bf   :  { %10080 = vrcp.f32 %v4648_v7  ;;  %v4544_v21 = vsub.f32 %v11414_v26, %v4526_v27  ;;  %v3602_v62 = vpop.f32.mrb[46].mxu1  ;;  %v3526_v29 = vpop.f32.mrb[46].mxu0  ;;  %v4598_v52 = vsub.f32 %v3374_v46, %v4526_v27 }
 0x2c0   :  { %10082 = vpow2.f32 %v4568_v31  ;;  %v10071_v0 = vpop.eup %10070  ;;  %v4529_v20 = vmax.f32 %v11424_v19, %v3602_v62  ;;  %v4528_v2 = vmax.f32 %v11426_v58, %v3526_v29  ;;  %v9521_v28 = vpop.f32.mrb[47].mxu1  ;;  %v4572_v63 = vmul.f32 1.442695, %v4545_v43 }
 0x2c1   :  { %10084 = vpow2.f32 %v4622_v18  ;;  %v9516_v51 = vpop.f32.mrb[47].mxu0  ;;  %v10073_v47 = vpop.eup %10072  ;;  %v11459_v4 = vmul.f32 %v10071_v0, %v10053_v9  ;;  %v4626_v6 = vmul.f32 1.442695, %v4599_v59  ;;  %v4570_v25 = vmul.f32 1.442695, %v4544_v21 }
 0x2c2   :  { %10086 = vpow2.f32 %v4566_v24  ;;  %v4624_v26 = vmul.f32 1.442695, %v4598_v52  ;;  %v4547_v14 = vsub.f32 %v11424_v19, %v4529_v20  ;;  %v4601_v37 = vsub.f32 %v3602_v62, %v4529_v20 }
 0x2c3   :  { %10088 = vpow2.f32 %v4620_v15  ;;  %v10075_v41 = vpop.eup %10074  ;;  %v4546_v17 = vsub.f32 %v11426_v58, %v4528_v2  ;;  %v4600_v33 = vsub.f32 %v3526_v29, %v4528_v2  ;;  %v11463_v34 = vpop.f32.mrb[48].mxu1  ;;  %v11468_v46 = vmul.f32 %v10071_v0, %v11420_v42 }
 0x2c4   :  { %10090 = vpow2.f32 %v4572_v63  ;;  %v11465_v57 = vpop.f32.mrb[48].mxu0  ;;  %v4576_v53 = vmul.f32 1.442695, %v4547_v14  ;;  %v9531_v23 = vpop.f32.mrb[49].mxu1  ;;  %v11471_v19 = vmul.f32 %v10073_v47, %v11416_v22  ;;  %v4630_v7 = vmul.f32 1.442695, %v4601_v37 }
 0x2c5   :  { %v10077_v9 = vpop.eup %10076  ;;  %10092 = vpow2.f32 %v4626_v6  ;;  %v9526_v56 = vpop.f32.mrb[49].mxu0  ;;  %v4574_v31 = vmul.f32 1.442695, %v4546_v17  ;;  %v4628_v58 = vmul.f32 1.442695, %v4600_v33  ;;  %v11477_v11 = vmul.f32 %v10075_v41, %v11428_v39 }
 0x2c6   :  { %10094 = vpow2.f32 %v4570_v25  ;;  %v11474_v60 = vmul.f32 %v10077_v9, %v11433_v16  ;;  %v11480_v24 = vmul.f32 %v10073_v47, %v11418_v10  ;;  %v11490_v27 = vmul.f32 %v10077_v9, %v11437_v38 }
 0x2c7   :  { %v10079_v18 = vpop.eup %10078  ;;  %10096 = vpow2.f32 %v4624_v26  ;;  %v11482_v42 = vpop.f32.mrb[50].mxu1  ;;  %v11493_v16 = vmul.f32 %v10075_v41, %v11431_v35 }
 0x2c8   :  { %10098 = vpow2.f32 %v4576_v53  ;;  %v11484_v22 = vpop.f32.mrb[50].mxu0  ;;  %v11487_v5 = vmul.f32 %v10079_v18, %v11439_v44  ;;  %v9541_v39 = vpop.f32.mrb[51].mxu1  ;;  %v11496_v10 = vmul.f32 %v10079_v18, %v11443_v1 }
 0x2c9   :  { %v10081_v15 = vpop.eup %10080  ;;  %10100 = vpow2.f32 %v4630_v7  ;;  %v9536_v43 = vpop.f32.mrb[51].mxu0 }
 0x2ca   :  { %v11498_v59 = vpop.eup %10082  ;;  %10102 = vpow2.f32 %v4574_v31  ;;  %v11501_v21 = vmul.f32 %v10081_v15, %v11445_v8  ;;  %v11504_v44 = vmul.f32 %v10081_v15, %v11449_v48 }
 0x2cb   :  { %v11506_v38 = vpop.eup %10084  ;;  %10104 = vpow2.f32 %v4628_v58  ;;  %v11512_v29 = vpop.f32.mrb[52].mxu1 }
 0x2cc   :  { %v11508_v35 = vpop.eup %10086  ;;  %v4651_v62 = vadd.f32 %v11506_v38, %v11498_v59  ;;  %v11514_v1 = vpop.f32.mrb[52].mxu0 }
 0x2cd   :  { %v10089_v0 = vpop.eup %10088  ;;  %v9551_v52 = vpop.f32.mrb[53].mxu1 }
 0x2ce   :  { %v9546_v20 = vpop.f32.mrb[53].mxu0  ;;  %v11516_v8 = vpop.eup %10090  ;;  %v4650_v48 = vadd.f32 %v10089_v0, %v11508_v35  ;;  %10106 = vrcp.f32 %v4651_v62 }
 0x2cf   :  { %v11519_v2 = vpop.eup %10092  ;;  %v4210_v47 = vpop.f32.mrb[54].mxu1 }
 0x2d0   :  { %v11521_v28 = vpop.eup %10094  ;;  %10108 = vrcp.f32 %v4650_v48  ;;  %v4653_v51 = vadd.f32 %v11519_v2, %v11516_v8  ;;  %v4134_v63 = vpop.f32.mrb[54].mxu0  ;;  %v4531_v25 = vmax.f32 %v11463_v34, %v4210_v47 }
 0x2d1   :  { %v11525_v6 = vpop.eup %10096  ;;  %v4530_v26 = vmax.f32 %v11465_v57, %v4134_v63  ;;  %v9561_v14 = vpop.f32.mrb[55].mxu1 }
 0x2d2   :  { %v9556_v41 = vpop.f32.mrb[55].mxu0  ;;  %v11529_v37 = vpop.eup %10098  ;;  %10110 = vrcp.f32 %v4653_v51  ;;  %v4652_v17 = vadd.f32 %v11525_v6, %v11521_v28  ;;  %v4549_v9 = vsub.f32 %v11463_v34, %v4531_v25  ;;  %v4603_v53 = vsub.f32 %v4210_v47, %v4531_v25 }
 0x2d3   :  { %v11533_v33 = vpop.eup %10100  ;;  %v4548_v23 = vsub.f32 %v11465_v57, %v4530_v26  ;;  %v4602_v56 = vsub.f32 %v4134_v63, %v4530_v26  ;;  %v4362_v58 = vpop.f32.mrb[56].mxu1 }
 0x2d4   :  { %v11537_v7 = vpop.eup %10102  ;;  %10112 = vrcp.f32 %v4652_v17  ;;  %v4655_v31 = vadd.f32 %v11533_v33, %v11529_v37  ;;  %v4286_v18 = vpop.f32.mrb[56].mxu0  ;;  %v4580_v39 = vmul.f32 1.442695, %v4549_v9  ;;  %v4634_v43 = vmul.f32 1.442695, %v4603_v53 }
 0x2d5   :  { %v11541_v15 = vpop.eup %10104  ;;  %v4533_v62 = vmax.f32 %v11482_v42, %v4362_v58  ;;  %v4578_v57 = vmul.f32 1.442695, %v4548_v23  ;;  %v4532_v52 = vmax.f32 %v11484_v22, %v4286_v18  ;;  %v9571_v20 = vpop.f32.mrb[57].mxu1  ;;  %v4632_v51 = vmul.f32 1.442695, %v4602_v56 }
 0x2d6   :  { %10114 = vrcp.f32 %v4655_v31  ;;  %v4654_v34 = vadd.f32 %v11541_v15, %v11537_v7  ;;  %v9566_v48 = vpop.f32.mrb[57].mxu0 }
 0x2d7   :  { %10116 = vpow2.f32 %v4580_v39  ;;  %v4551_v47 = vsub.f32 %v11482_v42, %v4533_v62  ;;  %v4605_v63 = vsub.f32 %v4362_v58, %v4533_v62  ;;  %v4550_v25 = vsub.f32 %v11484_v22, %v4532_v52  ;;  %v4514_v14 = vpop.f32.mrb[58].mxu1  ;;  %v4438_v41 = vpop.f32.mrb[58].mxu0 }
 0x2d8   :  { %10118 = vrcp.f32 %v4654_v34  ;;  %v4604_v26 = vsub.f32 %v4286_v18, %v4532_v52  ;;  %v10107_v17 = vpop.eup %10106  ;;  %v4535_v23 = vmax.f32 %v11512_v29, %v4514_v14  ;;  %v9581_v31 = vpop.f32.mrb[59].mxu1  ;;  %v4534_v42 = vmax.f32 %v11514_v1, %v4438_v41 }
 0x2d9   :  { %10120 = vpow2.f32 %v4634_v43  ;;  %v4584_v9 = vmul.f32 1.442695, %v4551_v47  ;;  %v4638_v53 = vmul.f32 1.442695, %v4605_v63  ;;  %v9576_v20 = vpop.f32.mrb[59].mxu0 }
 0x2da   :  { %v10109_v48 = vpop.eup %10108  ;;  %10122 = vpow2.f32 %v4578_v57  ;;  %v4582_v56 = vmul.f32 1.442695, %v4550_v25  ;;  %v4636_v39 = vmul.f32 1.442695, %v4604_v26  ;;  %v4553_v22 = vsub.f32 %v11512_v29, %v4535_v23 }
 0x2db   :  { %v11551_v58 = vmul.f32 %v10109_v48, %v10089_v0  ;;  %10124 = vpow2.f32 %v4632_v51  ;;  %v4607_v18 = vsub.f32 %v4514_v14, %v4535_v23  ;;  %v4552_v43 = vsub.f32 %v11514_v1, %v4534_v42  ;;  %v9586_v52 = vpop.f32.mrb[60].mxu0 }
 0x2dc   :  { %v10111_v62 = vpop.eup %10110  ;;  %10126 = vpow2.f32 %v4584_v9  ;;  %v4606_v34 = vsub.f32 %v4438_v41, %v4534_v42  ;;  %v4686_v47 = vmul.f32 %v10109_v48, %v11508_v35  ;;  %v4588_v57 = vmul.f32 1.442695, %v4553_v22  ;;  %v4836_v25 = vpop.f32.mrb[61].mxu0 }
 0x2dd   :  { %10128 = vpow2.f32 %v4638_v53  ;;  %v4642_v63 = vmul.f32 1.442695, %v4607_v18  ;;  %v4687_v26 = vmul.f32 %v10107_v17, %v11498_v59  ;;  %v4586_v51 = vmul.f32 1.442695, %v4552_v43  ;;  %9603 = vmatpush3.msra.mxu1 %v4836_v25 }
 0x2de   :  { %v10113_v0 = vpop.eup %10112  ;;  %10130 = vpow2.f32 %v4582_v56  ;;  %v4640_v31 = vmul.f32 1.442695, %v4606_v34  ;;  %v4689_v29 = vmul.f32 %v10111_v62, %v11516_v8  ;;  %9605 = vmatmul.mubr.msk.f32.vlgmr.msra.gmra.mrb[60].mxu1 %vm736_vm1, %v4686_v47  ;;  %9607 = vmatprep.subr.mxu1 %v10154_v49  ;;  %v11565_v14 = vmul.f32 %v10107_v17, %v11506_v38 }
 0x2df   :  { %10132 = vpow2.f32 %v4636_v39  ;;  %v4688_v35 = vmul.f32 %v10113_v0, %v11521_v28  ;;  %v11562_v1 = vmul.f32 %v10113_v0, %v11525_v6  ;;  %9608 = vmatpush3.msra.mxu1 %v9586_v52  ;;  %9609 = vmatprep.mubr.msk.f32.mxu1 %vm10155_vm2, %v10154_v49  ;;  %v9589_v8 = vpop.f32.mrb[62].mxu0  ;;  %v11570_v41 = vmul.f32 %v10111_v62, %v11519_v2 }
 0x2e0   :  { %v10115_v59 = vpop.eup %10114  ;;  %10134 = vpow2.f32 %v4588_v57  ;;  %v4846_v28 = vpop.f32.mrb[63].mxu0  ;;  %9612 = vmatprep.subr.mxu1 %v10154_v49 }
 0x2e1   :  { %v11572_v9 = vpop.eup %10116  ;;  %10136 = vpow2.f32 %v4642_v63  ;;  %v11576_v6 = vmul.f32 %v10115_v59, %v11529_v37  ;;  %v11579_v38 = vmul.f32 %v10115_v59, %v11533_v33 }
 0x2e2   :  { %v10119_v17 = vpop.eup %10118  ;;  %10138 = vpow2.f32 %v4586_v51  ;;  %9610 = vmatmul.mubr.msk.f32.vlgmr.msra.gmra.mrb[62].mxu1 %vm736_vm1, %v4687_v26 }
 0x2e3   :  { %v10121_v53 = vpop.eup %10120  ;;  %10140 = vpow2.f32 %v4640_v31  ;;  %v4690_v2 = vmul.f32 %v10119_v17, %v11537_v7  ;;  %v4708_v23 = vmul.f32 %v10119_v17, %v11541_v15  ;;  %9613 = vmatpush3.msra.mxu1 %v4846_v28  ;;  %v9592_v56 = vpop.f32.mrb[64].mxu0  ;;  %9614 = vmatprep.mubr.msk.f32.mxu1 %vm10155_vm2, %v10154_v49 }
 0x2e4   :  { %v10123_v20 = vpop.eup %10122  ;;  %v4657_v48 = vadd.f32 %v10121_v53, %v11572_v9  ;;  %9617 = vmatprep.subr.mxu1 %v10154_v49  ;;  %v4856_v33 = vpop.f32.mrb[65].mxu0 }
 0x2e5   :  { %v10125_v37 = vpop.eup %10124 }
 0x2e6   :  { %v10127_v39 = vpop.eup %10126  ;;  %10142 = vrcp.f32 %v4657_v48  ;;  %v4656_v42 = vadd.f32 %v10125_v37, %v10123_v20  ;;  %9615 = vmatmul.mubr.msk.f32.vlgmr.msra.gmra.mrb[64].mxu1 %vm736_vm1, %v4688_v35 }
 0x2e7   :  { %v10129_v22 = vpop.eup %10128  ;;  %9618 = vmatpush3.msra.mxu1 %v9589_v8  ;;  %v9595_v18 = vpop.f32.mrb[66].mxu0  ;;  %9619 = vmatprep.mubr.msk.f32.mxu1 %vm10155_vm2, %v10154_v49 }
 0x2e8   :  { %v10131_v7 = vpop.eup %10130  ;;  %10144 = vrcp.f32 %v4656_v42  ;;  %v4659_v15 = vadd.f32 %v10129_v22, %v10127_v39  ;;  %v4866_v43 = vpop.f32.mrb[67].mxu0  ;;  %9622 = vmatprep.subr.mxu1 %v10154_v49 }
 0x2e9   :  { %v10133_v62 = vpop.eup %10132  ;;  %9633 = vmatpush3.msra.mxu0 %v4866_v43 }
 0x2ea   :  { %v10135_v34 = vpop.eup %10134  ;;  %10146 = vrcp.f32 %v4659_v15  ;;  %v4658_v52 = vadd.f32 %v10133_v62, %v10131_v7  ;;  %9620 = vmatmul.mubr.msk.f32.vlgmr.msra.gmra.mrb[66].mxu1 %vm736_vm1, %v4689_v29  ;;  %9635 = vmatmul.mubr.msk.f32.vlgmr.msra.gmra.mrb[72].mxu0 %vm736_vm1, %v11551_v58 }
 0x2eb   :  { %v10137_v47 = vpop.eup %10136  ;;  %v9598_v25 = vpop.f32.mrb[68].mxu0  ;;  %9623 = vmatpush3.msra.mxu1 %v4856_v33  ;;  %9642 = vmatprep.subr.mxu0 %v10154_v49 }
 0x2ec   :  { %v10139_v57 = vpop.eup %10138  ;;  %10148 = vrcp.f32 %v4658_v52  ;;  %v4661_v63 = vadd.f32 %v10137_v47, %v10135_v34  ;;  %v4876_v0 = vpop.f32.mrb[69].mxu0  ;;  %9624 = vmatprep.mubr.msk.f32.mxu1 %vm10155_vm2, %v10154_v49  ;;  %9627 = vmatprep.subr.mxu1 %v10154_v49 }
 0x2ed   :  { %v10141_v26 = vpop.eup %10140  ;;  %9643 = vmatpush3.msra.mxu0 %v4876_v0  ;;  %9644 = vmatprep.mubr.msk.f32.mxu0 %vm10155_vm2, %v10154_v49 }
 0x2ee   :  { %10150 = vrcp.f32 %v4661_v63  ;;  %v4660_v51 = vadd.f32 %v10141_v26, %v10139_v57  ;;  %9625 = vmatmul.mubr.msk.f32.vlgmr.msra.gmra.mrb[68].mxu1 %vm736_vm1, %v4690_v2  ;;  %9645 = vmatmul.mubr.msk.f32.vlgmr.msra.gmra.mrb[74].mxu0 %vm736_vm1, %v11562_v1 }
 0x2ef   :  { %9628 = vmatpush3.msra.mxu1 %v9592_v56  ;;  %v9601_v31 = vpop.f32.mrb[70].mxu0  ;;  %9652 = vmatprep.subr.mxu0 %v10154_v49 }
 0x2f0   :  { %v10143_v58 = vpop.eup %10142  ;;  %10152 = vrcp.f32 %v4660_v51  ;;  %v4886_v29 = vpop.f32.mrb[71].mxu0  ;;  %9629 = vmatprep.mubr.msk.f32.mxu1 %vm10155_vm2, %v10154_v49  ;;  %9654 = vmatprep.mubr.msk.f32.mxu0 %vm10155_vm2, %v10154_v49 }
 0x2f1   :  { %v11610_v35 = vmul.f32 %v10143_v58, %v11572_v9  ;;  %v11612_v59 = vmul.f32 %v10143_v58, %v10121_v53  ;;  %9653 = vmatpush3.msra.mxu0 %v4886_v29  ;;  %9637 = vmatprep.subr.mxu1 %v10154_v49 }
 0x2f2   :  { %v10145_v8 = vpop.eup %10144  ;;  %9630 = vmatmul.mubr.msk.f32.vlgmr.msra.gmra.mrb[70].mxu1 %vm736_vm1, %v11576_v6  ;;  %9655 = vmatmul.mubr.msk.f32.vlgmr.msra.gmra.mrb[76].mxu0 %vm736_vm1, %v4708_v23 }
 0x2f3   :  { %v11618_v1 = vmul.f32 %v10145_v8, %v10123_v20  ;;  %v11620_v28 = vmul.f32 %v10145_v8, %v10125_v37  ;;  %9638 = vmatpush3.msra.mxu1 %v9595_v18  ;;  %9639 = vmatprep.mubr.msk.f32.mxu1 %vm10155_vm2, %v10154_v49  ;;  %v11667_v18 = vld [vmem:[%s12057_s3 + $0x10] sm:$0xff] }
 0x2f4   :  { %v10147_v17 = vpop.eup %10146  ;;  %9647 = vmatprep.subr.mxu1 %v10154_v49  ;;  %9662 = vmatprep.subr.mxu0 %v10154_v49 }
 0x2f5   :  { %v11626_v9 = vmul.f32 %v10147_v17, %v10127_v39  ;;  %v11628_v53 = vmul.f32 %v10147_v17, %v10129_v22  ;;  %9664 = vmatprep.mubr.msk.f32.mxu0 %vm10155_vm2, %v10154_v49 }
 0x2f6   :  { %v10149_v6 = vpop.eup %10148  ;;  %9640 = vmatmul.mubr.msk.f32.vlgmr.msra.gmra.mrb[72].mxu1 %vm736_vm1, %v11565_v14 }
 0x2f7   :  { %v11634_v2 = vmul.f32 %v10149_v6, %v10131_v7  ;;  %v11636_v23 = vmul.f32 %v10149_v6, %v10133_v62  ;;  %9648 = vmatpush3.msra.mxu1 %v9598_v25  ;;  %9649 = vmatprep.mubr.msk.f32.mxu1 %vm10155_vm2, %v10154_v49 }
 0x2f8   :  { %v10151_v20 = vpop.eup %10150  ;;  %9657 = vmatprep.subr.mxu1 %v10154_v49 }
 0x2f9   :  { %v11641_v48 = vmul.f32 %v10151_v20, %v10135_v34  ;;  %v11643_v56 = vmul.f32 %v10151_v20, %v10137_v47 }
 0x2fa   :  { %v10153_v37 = vpop.eup %10152  ;;  %9650 = vmatmul.mubr.msk.f32.vlgmr.msra.gmra.mrb[74].mxu1 %vm736_vm1, %v11570_v41  ;;  %v11661_v41 = vld [vmem:[%s12057_s3 + $0x8] sm:$0xff] }
 0x2fb   :  { %v11647_v14 = vmul.f32 %v10153_v37, %v10139_v57  ;;  %v11649_v33 = vmul.f32 %v10153_v37, %v10141_v26  ;;  %9658 = vmatpush3.msra.mxu1 %v9601_v31  ;;  %9659 = vmatprep.mubr.msk.f32.mxu1 %vm10155_vm2, %v10154_v49 }
 0x2fc   :  { %9667 = vmatprep.subr.mxu1 %v10154_v49 }
 0x2fe   :  { %9660 = vmatmul.mubr.msk.f32.vlgmr.msra.gmra.mrb[76].mxu1 %vm736_vm1, %v11579_v38 }
 0x2ff   :  { %9669 = vmatprep.mubr.msk.f32.mxu1 %vm10155_vm2, %v10154_v49 }
 0x3b1   :  { %v4964_v39 = vpop.f32.mrb[60].mxu1 }
 0x3b2   :  { %v4965_v42 = vadd.f32 %v4964_v39, %v11661_v41  ;;  %v9606_v22 = vpop.f32.mrb[61].mxu1 }
 0x3b4   :  { %v5771_v7 = vmax.f32 %v4965_v42, 0.0 }
 0x3b5   :  { %v5037_v15 = vpop.f32.mrb[62].mxu1 }
 0x3b6   :  { %v11670_v38 = vadd.f32 %v5771_v7, %v11323_v61  ;;  %v5038_v62 = vadd.f32 %v5037_v15, %v11661_v41  ;;  %v9611_v43 = vpop.f32.mrb[63].mxu1 }
 0x3b8   :  { %v5772_v34 = vmax.f32 %v5038_v62, 0.0  ;;  %9663 = vmatpush3.msra.mxu0 %v11670_v38 }
 0x3b9   :  { %v5110_v52 = vpop.f32.mrb[64].mxu1  ;;  %9665 = vmatmul.mubr.msk.f32.vlgmr.msra.gmra.mrb[78].mxu0 %vm736_vm1, %v11667_v18  ;;  %9672 = vmatprep.subr.mxu0 %v10154_v49 }
 0x3ba   :  { %v11678_v47 = vadd.f32 %v5772_v34, %v11333_v45  ;;  %v5111_v57 = vadd.f32 %v5110_v52, %v11661_v41  ;;  %v9616_v63 = vpop.f32.mrb[65].mxu1  ;;  %9674 = vmatprep.mubr.msk.f32.mxu0 %vm10155_vm2, %v10154_v49 }
 0x3bc   :  { %v5773_v61 = vmax.f32 %v5111_v57, 0.0  ;;  %9668 = vmatpush3.msra.mxu1 %v11678_v47 }
 0x3bd   :  { %v5183_v25 = vpop.f32.mrb[66].mxu1  ;;  %v5402_v26 = vpop.f32.mrb[72].mxu0  ;;  %9670 = vmatmul.mubr.msk.f32.vlgmr.msra.gmra.mrb[78].mxu1 %vm736_vm1, %v11667_v18  ;;  %9677 = vmatprep.subr.mxu1 %v10154_v49 }
 0x3be   :  { %v11688_v0 = vadd.f32 %v5773_v61, %v11338_v55  ;;  %v5184_v45 = vadd.f32 %v5183_v25, %v11661_v41  ;;  %v9621_v51 = vpop.f32.mrb[67].mxu1  ;;  %v9636_v58 = vpop.f32.mrb[73].mxu0  ;;  %9679 = vmatprep.mubr.msk.f32.mxu1 %vm10155_vm2, %v10154_v49  ;;  %v5403_v29 = vadd.f32 %v5402_v26, %v11661_v41 }
 0x3c0   :  { %v5774_v31 = vmax.f32 %v5184_v45, 0.0  ;;  %9673 = vmatpush3.msra.mxu0 %v11688_v0  ;;  %v5777_v39 = vmax.f32 %v5403_v29, 0.0 }
 0x3c1   :  { %v5256_v8 = vpop.f32.mrb[68].mxu1  ;;  %v5548_v17 = vpop.f32.mrb[74].mxu0  ;;  %9675 = vmatmul.mubr.msk.f32.vlgmr.msra.gmra.mrb[80].mxu0 %vm736_vm1, %v11667_v18  ;;  %9682 = vmatprep.subr.mxu0 %v10154_v49 }
 0x3c2   :  { %v11699_v55 = vadd.f32 %v5774_v31, %v11350_v13  ;;  %v5257_v6 = vadd.f32 %v5256_v8, %v11661_v41  ;;  %v9626_v20 = vpop.f32.mrb[69].mxu1  ;;  %v9646_v37 = vpop.f32.mrb[75].mxu0  ;;  %9684 = vmatprep.mubr.msk.f32.mxu0 %vm10155_vm2, %v10154_v49  ;;  %v5549_v22 = vadd.f32 %v5548_v17, %v11661_v41  ;;  %v11716_v52 = vadd.f32 %v5777_v39, %v11369_v30 }
 0x3c4   :  { %v5775_v42 = vmax.f32 %v5257_v6, 0.0  ;;  %9678 = vmatpush3.msra.mxu1 %v11699_v55  ;;  %v5779_v57 = vmax.f32 %v5549_v22, 0.0 }
 0x3c5   :  { %v5329_v7 = vpop.f32.mrb[70].mxu1  ;;  %v5694_v15 = vpop.f32.mrb[76].mxu0  ;;  %9680 = vmatmul.mubr.msk.f32.vlgmr.msra.gmra.mrb[80].mxu1 %vm736_vm1, %v11667_v18  ;;  %9687 = vmatprep.subr.mxu1 %v10154_v49 }
 0x3c6   :  { %v11710_v13 = vadd.f32 %v5775_v42, %v11355_v40  ;;  %v5330_v62 = vadd.f32 %v5329_v7, %v11661_v41  ;;  %v9631_v43 = vpop.f32.mrb[71].mxu1  ;;  %v9656_v34 = vpop.f32.mrb[77].mxu0  ;;  %9689 = vmatprep.mubr.msk.f32.mxu1 %vm10155_vm2, %v10154_v49  ;;  %v5695_v61 = vadd.f32 %v5694_v15, %v11661_v41  ;;  %v11732_v30 = vadd.f32 %v5779_v57, %v11383_v12 }
 0x3c8   :  { %v5776_v63 = vmax.f32 %v5330_v62, 0.0  ;;  %9683 = vmatpush3.msra.mxu0 %v11710_v13  ;;  %v5781_v51 = vmax.f32 %v5695_v61, 0.0  ;;  %v4732_v61 = vld [vmem:[%s12057_s3 + $0x20] sm:$0xff] }
 0x3c9   :  { %v5475_v25 = vpop.f32.mrb[72].mxu1  ;;  %9685 = vmatmul.mubr.msk.f32.vlgmr.msra.gmra.mrb[82].mxu0 %vm736_vm1, %v11667_v18  ;;  %9692 = vmatprep.subr.mxu0 %v10154_v49 }
 0x3ca   :  { %v11724_v40 = vadd.f32 %v5776_v63, %v11364_v32  ;;  %v5476_v26 = vadd.f32 %v5475_v25, %v11661_v41  ;;  %v9641_v45 = vpop.f32.mrb[73].mxu1  ;;  %9693 = vmatpush3.msra.mxu0 %v11716_v52  ;;  %9694 = vmatprep.mubr.msk.f32.mxu0 %vm10155_vm2, %v10154_v49  ;;  %v11750_v8 = vadd.f32 %v5781_v51, %v11397_v54 }
 0x3cb   :  { %9702 = vmatprep.subr.mxu0 %v10154_v49 }
 0x3cc   :  { %v5778_v58 = vmax.f32 %v5476_v26, 0.0  ;;  %9688 = vmatpush3.msra.mxu1 %v11724_v40 }
 0x3cd   :  { %v5621_v31 = vpop.f32.mrb[74].mxu1  ;;  %9690 = vmatmul.mubr.msk.f32.vlgmr.msra.gmra.mrb[82].mxu1 %vm736_vm1, %v11667_v18  ;;  %9695 = vmatmul.mubr.msk.f32.vlgmr.msra.gmra.mrb[84].mxu0 %vm736_vm1, %v11667_v18 }
 0x3ce   :  { %v11740_v32 = vadd.f32 %v5778_v58, %v11378_v50  ;;  %v5622_v29 = vadd.f32 %v5621_v31, %v11661_v41  ;;  %9703 = vmatpush3.msra.mxu0 %v11732_v30  ;;  %v9651_v12 = vpop.f32.mrb[75].mxu1  ;;  %9697 = vmatprep.subr.mxu1 %v10154_v49 }
 0x3cf   :  { %9699 = vmatprep.mubr.msk.f32.mxu1 %vm10155_vm2, %v10154_v49  ;;  %9704 = vmatprep.mubr.msk.f32.mxu0 %vm10155_vm2, %v10154_v49 }
 0x3d0   :  { %v5780_v17 = vmax.f32 %v5622_v29, 0.0  ;;  %9698 = vmatpush3.msra.mxu1 %v11740_v32  ;;  %9712 = vmatprep.subr.mxu0 %v10154_v49 }
 0x3d1   :  { %v5767_v50 = vpop.f32.mrb[76].mxu1  ;;  %9700 = vmatmul.mubr.msk.f32.vlgmr.msra.gmra.mrb[84].mxu1 %vm736_vm1, %v11667_v18  ;;  %9705 = vmatmul.mubr.msk.f32.vlgmr.msra.gmra.mrb[86].mxu0 %vm736_vm1, %v11667_v18 }
 0x3d2   :  { %v11759_v6 = vadd.f32 %v5780_v17, %v11392_v3  ;;  %v5768_v20 = vadd.f32 %v5767_v50, %v11661_v41  ;;  %9713 = vmatpush3.msra.mxu0 %v11750_v8  ;;  %v9661_v54 = vpop.f32.mrb[77].mxu1  ;;  %9707 = vmatprep.subr.mxu1 %v10154_v49 }
 0x3d3   :  { %9709 = vmatprep.mubr.msk.f32.mxu1 %vm10155_vm2, %v10154_v49  ;;  %9714 = vmatprep.mubr.msk.f32.mxu0 %vm10155_vm2, %v10154_v49 }
 0x3d4   :  { %v5782_v37 = vmax.f32 %v5768_v20, 0.0  ;;  %9708 = vmatpush3.msra.mxu1 %v11759_v6  ;;  %9722 = vmatprep.subr.mxu0 %v10154_v49 }
 0x3d5   :  { %9710 = vmatmul.mubr.msk.f32.vlgmr.msra.gmra.mrb[86].mxu1 %vm736_vm1, %v11667_v18  ;;  %9715 = vmatmul.mubr.msk.f32.vlgmr.msra.gmra.mrb[88].mxu0 %vm736_vm1, %v11667_v18 }
 0x3d6   :  { %v11775_v3 = vadd.f32 %v5782_v37, %v11406_v36  ;;  %9717 = vmatprep.subr.mxu1 %v10154_v49  ;;  %9719 = vmatprep.mubr.msk.f32.mxu1 %vm10155_vm2, %v10154_v49 }
 0x3d7   :  { %9724 = vmatprep.mubr.msk.f32.mxu0 %vm10155_vm2, %v10154_v49 }
 0x3d8   :  { %9718 = vmatpush3.msra.mxu1 %v11775_v3 }
 0x3d9   :  { %9723 = vmatpush3.xpose.msk.msra.mxu0 %vm736_vm1, %v11618_v1  ;;  %9720 = vmatmul.mubr.msk.f32.vlgmr.msra.gmra.mrb[88].mxu1 %vm736_vm1, %v11667_v18 }
 0x3da   :  { %9727 = vmatprep.subr.mxu1 %v10154_v49  ;;  %9732 = vmatprep.subr.mxu0 %v10154_v49 }
 0x3db   :  { %9729 = vmatprep.mubr.msk.f32.mxu1 %vm10155_vm2, %v10154_v49 }
 0x3df   :  { %9728 = vmatpush3.xpose.msk.msra.mxu1 %vm736_vm1, %v11610_v35 }
 0x3e0   :  { %9737 = vmatprep.subr.mxu1 %v10154_v49 }
 0x48c   :  { %v5864_v36 = vpop.f32.mrb[78].mxu0 }
 0x48d   :  { %9725 = vmatmul.mubr.msk.f32.vlgmr.msra.gmra.mrb[90].mxu0 %vm736_vm1, %v5864_v36  ;;  %v9666_v41 = vpop.f32.mrb[79].mxu0 }
 0x48e   :  { %9733 = vmatpush3.xpose.msk.msra.mxu0 %vm736_vm1, %v11634_v2  ;;  %9734 = vmatprep.mubr.msk.f32.mxu0 %vm10155_vm2, %v10154_v49 }
 0x48f   :  { %9742 = vmatprep.subr.mxu0 %v10154_v49 }
 0x490   :  { %v5934_v1 = vpop.f32.mrb[78].mxu1 }
 0x491   :  { %9730 = vmatmul.mubr.msk.f32.vlgmr.msra.gmra.mrb[90].mxu1 %vm736_vm1, %v5934_v1  ;;  %v9671_v18 = vpop.f32.mrb[79].mxu1 }
 0x492   :  { %9738 = vmatpush3.xpose.msk.msra.mxu1 %vm736_vm1, %v11626_v9  ;;  %9739 = vmatprep.mubr.msk.f32.mxu1 %vm10155_vm2, %v10154_v49 }
 0x493   :  { %9747 = vmatprep.subr.mxu1 %v10154_v49 }
 0x494   :  { %v6004_v35 = vpop.f32.mrb[80].mxu0 }
 0x495   :  { %9735 = vmatmul.mubr.msk.f32.vlgmr.msra.gmra.mrb[92].mxu0 %vm736_vm1, %v6004_v35  ;;  %v9676_v2 = vpop.f32.mrb[81].mxu0 }
 0x496   :  { %9743 = vmatpush3.xpose.msk.msra.mxu0 %vm736_vm1, %v11647_v14  ;;  %9744 = vmatprep.mubr.msk.f32.mxu0 %vm10155_vm2, %v10154_v49 }
 0x497   :  { %9752 = vmatprep.subr.mxu0 %v10154_v49 }
 0x498   :  { %v6074_v39 = vpop.f32.mrb[80].mxu1 }
 0x499   :  { %9740 = vmatmul.mubr.msk.f32.vlgmr.msra.gmra.mrb[92].mxu1 %vm736_vm1, %v6074_v39  ;;  %v9681_v9 = vpop.f32.mrb[81].mxu1 }
 0x49a   :  { %9748 = vmatpush3.xpose.msk.msra.mxu1 %vm736_vm1, %v11641_v48  ;;  %9749 = vmatprep.mubr.msk.f32.mxu1 %vm10155_vm2, %v10154_v49 }
 0x49b   :  { %9757 = vmatprep.subr.mxu1 %v10154_v49 }
 0x49c   :  { %v6144_v42 = vpop.f32.mrb[82].mxu0 }
 0x49d   :  { %9745 = vmatmul.mubr.msk.f32.vlgmr.msra.gmra.mrb[94].mxu0 %vm736_vm1, %v6144_v42  ;;  %v9686_v14 = vpop.f32.mrb[83].mxu0 }
 0x49e   :  { %9753 = vmatpush3.xpose.msk.msra.mxu0 %vm736_vm1, %v11620_v28  ;;  %9754 = vmatprep.mubr.msk.f32.mxu0 %vm10155_vm2, %v10154_v49 }
 0x49f   :  { %9762 = vmatprep.subr.mxu0 %v10154_v49 }
 0x4a0   :  { %v6214_v22 = vpop.f32.mrb[82].mxu1  ;;  %v6284_v7 = vpop.f32.mrb[84].mxu0 }
 0x4a1   :  { %9750 = vmatmul.mubr.msk.f32.vlgmr.msra.gmra.mrb[94].mxu1 %vm736_vm1, %v6214_v22  ;;  %9755 = vmatmul.mubr.msk.f32.vlgmr.msra.gmra.mrb[96].mxu0 %vm736_vm1, %v6284_v7  ;;  %v9691_v48 = vpop.f32.mrb[83].mxu1  ;;  %v9696_v15 = vpop.f32.mrb[85].mxu0 }
 0x4a2   :  { %9758 = vmatpush3.xpose.msk.msra.mxu1 %vm736_vm1, %v11612_v59  ;;  %9763 = vmatpush3.xpose.msk.msra.mxu0 %vm736_vm1, %v11636_v23 }
 0x4a3   :  { %9759 = vmatprep.mubr.msk.f32.mxu1 %vm10155_vm2, %v10154_v49  ;;  %9764 = vmatprep.mubr.msk.f32.mxu0 %vm10155_vm2, %v10154_v49 }
 0x4a4   :  { %v6354_v28 = vpop.f32.mrb[84].mxu1  ;;  %v6424_v62 = vpop.f32.mrb[86].mxu0  ;;  %9767 = vmatprep.subr.mxu1 %v10154_v49  ;;  %9772 = vmatprep.subr.mxu0 %v10154_v49 }
 0x4a5   :  { %9760 = vmatmul.mubr.msk.f32.vlgmr.msra.gmra.mrb[96].mxu1 %vm736_vm1, %v6354_v28  ;;  %9765 = vmatmul.mubr.msk.f32.vlgmr.msra.gmra.mrb[98].mxu0 %vm736_vm1, %v6424_v62  ;;  %v9701_v59 = vpop.f32.mrb[85].mxu1  ;;  %v9706_v43 = vpop.f32.mrb[87].mxu0 }
 0x4a6   :  { %9768 = vmatpush3.xpose.msk.msra.mxu1 %vm736_vm1, %v11628_v53  ;;  %9773 = vmatpush3.xpose.msk.msra.mxu0 %vm736_vm1, %v11649_v33 }
 0x4a7   :  { %9769 = vmatprep.mubr.msk.f32.mxu1 %vm10155_vm2, %v10154_v49  ;;  %9774 = vmatprep.mubr.msk.f32.mxu0 %vm10155_vm2, %v10154_v49 }
 0x4a8   :  { %v6494_v23 = vpop.f32.mrb[86].mxu1  ;;  %v6564_v34 = vpop.f32.mrb[88].mxu0  ;;  %9777 = vmatprep.subr.mxu1 %v10154_v49  ;;  %9782 = vmatprep.subr.mxu0 %v4732_v61 }
 0x4a9   :  { %9770 = vmatmul.mubr.msk.f32.vlgmr.msra.gmra.mrb[98].mxu1 %vm736_vm1, %v6494_v23  ;;  %9775 = vmatmul.mubr.msk.f32.vlgmr.msra.gmra.mrb[100].mxu0 %vm736_vm1, %v6564_v34  ;;  %v9711_v57 = vpop.f32.mrb[87].mxu1  ;;  %v9716_v63 = vpop.f32.mrb[89].mxu0 }
 0x4aa   :  { %9778 = vmatpush3.xpose.msk.msra.mxu1 %vm736_vm1, %v11643_v56  ;;  %9779 = vmatprep.mubr.msk.f32.mxu1 %vm10155_vm2, %v10154_v49  ;;  %v11864_v56 = vld [vmem:[%s12057_s3 + $0x18] sm:$0xff] }
 0x4ab   :  { %9802 = vmatprep.subr.mxu1 %v10154_v49  ;;  %9783 = vmatpush3.msra.mxu0 %v4732_v61 }
 0x4ac   :  { %v6634_v53 = vpop.f32.mrb[88].mxu1  ;;  %9832 = vmatprep.subr.mxu0 %v10154_v49 }
 0x4ad   :  { %9780 = vmatmul.mubr.msk.f32.vlgmr.msra.gmra.mrb[100].mxu1 %vm736_vm1, %v6634_v53  ;;  %v9721_v33 = vpop.f32.mrb[89].mxu1 }
 0x4ae   :  { %9804 = vmatprep.mubr.msk.f32.mxu1 %vm10155_vm2, %v10154_v49 }
 0x560   :  { %v6710_v25 = vpop.f32.mrb[90].mxu0 }
 0x561   :  { %v6711_v26 = vadd.f32 %v6710_v25, %v11864_v56  ;;  %v9726_v45 = vpop.f32.mrb[91].mxu0 }
 0x563   :  { %v7550_v51 = vmax.f32 %v6711_v26, 0.0 }
 0x564   :  { %v6786_v58 = vpop.f32.mrb[90].mxu1 }
 0x565   :  { %v11868_v31 = vadd.f32 %v7550_v51, %v11670_v38  ;;  %v6787_v29 = vadd.f32 %v6786_v58, %v11864_v56  ;;  %v9731_v12 = vpop.f32.mrb[91].mxu1 }
 0x567   :  { %v7551_v17 = vmax.f32 %v6787_v29, 0.0  ;;  %9784 = vmatprep.mubr.msk.f32.mxu0 %vm736_vm1, %v11868_v31 }
 0x568   :  { %v6862_v50 = vpop.f32.mrb[92].mxu0 }
 0x569   :  { %v11874_v20 = vadd.f32 %v7551_v17, %v11678_v47  ;;  %v6863_v54 = vadd.f32 %v6862_v50, %v11864_v56  ;;  %v9736_v37 = vpop.f32.mrb[93].mxu0 }
 0x56b   :  { %v7552_v36 = vmax.f32 %v6863_v54, 0.0  ;;  %9785 = vmatmul.mubr.msk.f32.vlgmr.msra.gmra.mrb[102].mxu0 %vm736_vm1, %v11874_v20 }
 0x56c   :  { %v6938_v38 = vpop.f32.mrb[92].mxu1 }
 0x56d   :  { %v11880_v41 = vadd.f32 %v7552_v36, %v11688_v0  ;;  %v6939_v1 = vadd.f32 %v6938_v38, %v11864_v56  ;;  %v9741_v18 = vpop.f32.mrb[93].mxu1 }
 0x56f   :  { %v7553_v35 = vmax.f32 %v6939_v1, 0.0  ;;  %9787 = vmatprep.mubr.msk.f32.mxu0 %vm736_vm1, %v11880_v41 }
 0x570   :  { %v7014_v47 = vpop.f32.mrb[94].mxu0 }
 0x571   :  { %v11886_v2 = vadd.f32 %v7553_v35, %v11699_v55  ;;  %v7015_v39 = vadd.f32 %v7014_v47, %v11864_v56  ;;  %v9746_v9 = vpop.f32.mrb[95].mxu0 }
 0x573   :  { %v7554_v42 = vmax.f32 %v7015_v39, 0.0  ;;  %9788 = vmatmul.mubr.msk.f32.gmra.mrb[104].mxu0 %vm736_vm1, %v11886_v2 }
 0x574   :  { %v7090_v0 = vpop.f32.mrb[94].mxu1  ;;  %v7166_v14 = vpop.f32.mrb[96].mxu0 }
 0x575   :  { %v11892_v22 = vadd.f32 %v7554_v42, %v11710_v13  ;;  %v7091_v7 = vadd.f32 %v7090_v0, %v11864_v56  ;;  %v7167_v48 = vadd.f32 %v7166_v14, %v11864_v56  ;;  %v9751_v15 = vpop.f32.mrb[95].mxu1  ;;  %v9756_v28 = vpop.f32.mrb[97].mxu0 }
 0x577   :  { %v7555_v55 = vmax.f32 %v7091_v7, 0.0  ;;  %v7556_v62 = vmax.f32 %v7167_v48, 0.0  ;;  %9790 = vmatprep.mubr.msk.f32.mxu0 %vm736_vm1, %v11892_v22 }
 0x578   :  { %v7242_v59 = vpop.f32.mrb[96].mxu1  ;;  %v7318_v43 = vpop.f32.mrb[98].mxu0 }
 0x579   :  { %v11899_v23 = vadd.f32 %v7555_v55, %v11724_v40  ;;  %v11902_v34 = vadd.f32 %v7556_v62, %v11716_v52  ;;  %v7243_v13 = vadd.f32 %v7242_v59, %v11864_v56  ;;  %v7319_v57 = vadd.f32 %v7318_v43, %v11864_v56  ;;  %v9761_v63 = vpop.f32.mrb[97].mxu1  ;;  %v9766_v53 = vpop.f32.mrb[99].mxu0 }
 0x57b   :  { %v7557_v33 = vmax.f32 %v7243_v13, 0.0  ;;  %v7558_v61 = vmax.f32 %v7319_v57, 0.0  ;;  %9791 = vmatmul.mubr.msk.f32.gmra.mrb[106].mxu0 %vm736_vm1, %v11899_v23 }
 0x57c   :  { %v7394_v25 = vpop.f32.mrb[98].mxu1  ;;  %v7470_v26 = vpop.f32.mrb[100].mxu0  ;;  %9793 = vmatprep.mubr.msk.f32.mxu0 %vm736_vm1, %v11902_v34 }
 0x57d   :  { %v11911_v40 = vadd.f32 %v7557_v33, %v11740_v32  ;;  %v11914_v52 = vadd.f32 %v7558_v61, %v11732_v30  ;;  %v7395_v45 = vadd.f32 %v7394_v25, %v11864_v56  ;;  %v7471_v51 = vadd.f32 %v7470_v26, %v11864_v56  ;;  %v9771_v58 = vpop.f32.mrb[99].mxu1  ;;  %v9776_v29 = vpop.f32.mrb[101].mxu0 }
 0x57f   :  { %v7559_v12 = vmax.f32 %v7395_v45, 0.0  ;;  %v7560_v17 = vmax.f32 %v7471_v51, 0.0  ;;  %9794 = vmatmul.mubr.msk.f32.gmra.mrb[108].mxu0 %vm736_vm1, %v11911_v40 }
 0x580   :  { %v7546_v50 = vpop.f32.mrb[100].mxu1  ;;  %9796 = vmatprep.mubr.msk.f32.mxu0 %vm736_vm1, %v11914_v52 }
 0x581   :  { %v11923_v32 = vadd.f32 %v7559_v12, %v11759_v6  ;;  %v11926_v30 = vadd.f32 %v7560_v17, %v11750_v8  ;;  %v7547_v54 = vadd.f32 %v7546_v50, %v11864_v56  ;;  %v9781_v37 = vpop.f32.mrb[101].mxu1 }
 0x583   :  { %v7561_v36 = vmax.f32 %v7547_v54, 0.0  ;;  %9797 = vmatmul.mubr.msk.f32.gmra.mrb[110].mxu0 %vm736_vm1, %v11923_v32 }
 0x584   :  { %9799 = vmatprep.mubr.msk.f32.mxu0 %vm736_vm1, %v11926_v30 }
 0x585   :  { %v11934_v38 = vadd.f32 %v7561_v36, %v11775_v3 }
 0x587   :  { %9800 = vmatmul.mubr.msk.f32.gmra.mrb[112].mxu0 %vm736_vm1, %v11934_v38 }
 0x588   :  { %9834 = vmatprep.mubr.msk.f32.mxu0 %vm10155_vm2, %v10154_v49 }
 0x63e   :  { %v9786_v8 = vpop.f32.mrb[102].mxu0 }
 0x63f   :  { %v7676_v6 = vpop.f32.mrb[103].mxu0 }
 0x640   :  { %9803 = vmatpush3.msra.mxu1 %v7676_v6 }
 0x641   :  { %9805 = vmatmul.mubr.msk.f32.vlgmr.msra.gmra.mrb[102].mxu1 %vm736_vm1, %v11468_v46  ;;  %9807 = vmatprep.subr.mxu1 %v10154_v49 }
 0x642   :  { %9808 = vmatpush3.msra.mxu1 %v9786_v8  ;;  %9809 = vmatprep.mubr.msk.f32.mxu1 %vm10155_vm2, %v10154_v49 }
 0x643   :  { %9812 = vmatprep.subr.mxu1 %v10154_v49 }
 0x645   :  { %9810 = vmatmul.mubr.msk.f32.vlgmr.msra.gmra.mrb[104].mxu1 %vm736_vm1, %v11471_v19 }
 0x646   :  { %v9789_v3 = vpop.f32.mrb[104].mxu0  ;;  %9814 = vmatprep.mubr.msk.f32.mxu1 %vm10155_vm2, %v10154_v49 }
 0x647   :  { %v7686_v56 = vpop.f32.mrb[105].mxu0 }
 0x648   :  { %9813 = vmatpush3.msra.mxu1 %v7686_v56 }
 0x649   :  { %9815 = vmatmul.mubr.msk.f32.vlgmr.msra.gmra.mrb[106].mxu1 %vm736_vm1, %v11474_v60  ;;  %9817 = vmatprep.subr.mxu1 %v10154_v49 }
 0x64a   :  { %9818 = vmatpush3.msra.mxu1 %v9789_v3  ;;  %9819 = vmatprep.mubr.msk.f32.mxu1 %vm10155_vm2, %v10154_v49 }
 0x64b   :  { %9822 = vmatprep.subr.mxu1 %v10154_v49 }
 0x64d   :  { %9820 = vmatmul.mubr.msk.f32.vlgmr.msra.gmra.mrb[108].mxu1 %vm736_vm1, %v11477_v11 }
 0x64e   :  { %v9792_v46 = vpop.f32.mrb[106].mxu0  ;;  %9824 = vmatprep.mubr.msk.f32.mxu1 %vm10155_vm2, %v10154_v49 }
 0x64f   :  { %v7696_v19 = vpop.f32.mrb[107].mxu0 }
 0x650   :  { %9823 = vmatpush3.msra.mxu1 %v7696_v19 }
 0x651   :  { %9825 = vmatmul.mubr.msk.f32.vlgmr.msra.gmra.mrb[110].mxu1 %vm736_vm1, %v11501_v21  ;;  %9827 = vmatprep.subr.mxu1 %v10154_v49 }
 0x652   :  { %v9795_v60 = vpop.f32.mrb[108].mxu0  ;;  %9828 = vmatpush3.msra.mxu1 %v9792_v46  ;;  %9829 = vmatprep.mubr.msk.f32.mxu1 %vm10155_vm2, %v10154_v49 }
 0x653   :  { %v7706_v1 = vpop.f32.mrb[109].mxu0  ;;  %9837 = vmatprep.subr.mxu1 %v10154_v49 }
 0x654   :  { %9833 = vmatpush3.msra.mxu0 %v7706_v1 }
 0x655   :  { %9830 = vmatmul.mubr.msk.f32.vlgmr.msra.gmra.mrb[112].mxu1 %vm736_vm1, %v11487_v5  ;;  %9835 = vmatmul.mubr.msk.f32.vlgmr.msra.gmra.mrb[114].mxu0 %vm736_vm1, %v11459_v4 }
 0x656   :  { %9838 = vmatpush3.msra.mxu1 %v9795_v60  ;;  %v9798_v11 = vpop.f32.mrb[110].mxu0  ;;  %9842 = vmatprep.subr.mxu0 %v10154_v49 }
 0x657   :  { %v7716_v21 = vpop.f32.mrb[111].mxu0  ;;  %9839 = vmatprep.mubr.msk.f32.mxu1 %vm10155_vm2, %v10154_v49  ;;  %9844 = vmatprep.mubr.msk.f32.mxu0 %vm10155_vm2, %v10154_v49 }
 0x658   :  { %9843 = vmatpush3.msra.mxu0 %v7716_v21  ;;  %9847 = vmatprep.subr.mxu1 %v10154_v49  ;;  %v8636_v21 = vld [vmem:[%s12059_s4 + $0x8] sm:$0xff] }
 0x659   :  { %9840 = vmatmul.mubr.msk.f32.vlgmr.msra.gmra.mrb[114].mxu1 %vm736_vm1, %v11480_v24  ;;  %9845 = vmatmul.mubr.msk.f32.vlgmr.msra.gmra.mrb[116].mxu0 %vm736_vm1, %v11490_v27  ;;  %v8635_v24 = vld [vmem:[%s12059_s4] sm:$0xff]  ;;  %v12002_v27 = vld [vmem:[%s12057_s3 + $0x28] sm:$0xff] }
 0x65a   :  { %9848 = vmatpush3.msra.mxu1 %v9798_v11  ;;  %v9801_v4 = vpop.f32.mrb[112].mxu0  ;;  %9852 = vmatprep.subr.mxu0 %v10154_v49 }
 0x65b   :  { %v7726_v5 = vpop.f32.mrb[113].mxu0  ;;  %9849 = vmatprep.mubr.msk.f32.mxu1 %vm10155_vm2, %v10154_v49  ;;  %9854 = vmatprep.mubr.msk.f32.mxu0 %vm10155_vm2, %v10154_v49 }
 0x65c   :  { %9853 = vmatpush3.msra.mxu0 %v7726_v5  ;;  %9857 = vmatprep.subr.mxu1 %v10154_v49 }
 0x65d   :  { %9850 = vmatmul.mubr.msk.f32.vlgmr.msra.gmra.mrb[116].mxu1 %vm736_vm1, %v11493_v16  ;;  %9855 = vmatmul.mubr.msk.f32.vlgmr.msra.gmra.mrb[118].mxu0 %vm736_vm1, %v11504_v44 }
 0x65e   :  { %9858 = vmatpush3.msra.mxu1 %v9801_v4  ;;  %9859 = vmatprep.mubr.msk.f32.mxu1 %vm10155_vm2, %v10154_v49 }
 0x65f   :  { %9874 = vmatprep.mubr.msk.f32.mxu0 %vm8639_vm3, %v8635_v24 }
 0x661   :  { %9860 = vmatmul.mubr.msk.f32.vlgmr.msra.gmra.mrb[118].mxu1 %vm736_vm1, %v11496_v10 }
 0x662   :  { %9889 = vmatprep.mubr.msk.f32.mxu1 %vm8639_vm3, %v8635_v24 }
 0x714   :  { %v7804_v16 = vpop.f32.mrb[102].mxu1 }
 0x715   :  { %v7805_v49 = vadd.f32 %v7804_v16, %v12002_v27  ;;  %v9806_v44 = vpop.f32.mrb[103].mxu1 }
 0x717   :  { %v8611_v10 = vmax.f32 %v7805_v49, 0.0 }
 0x718   :  { %v7877_v18 = vpop.f32.mrb[104].mxu1 }
 0x719   :  { %v7878_v35 = vadd.f32 %v7877_v18, %v12002_v27  ;;  %v9811_v47 = vpop.f32.mrb[105].mxu1  ;;  %v8623_v42 = vadd.f32 %v8611_v10, %v11868_v31 }
 0x71b   :  { %v8612_v39 = vmax.f32 %v7878_v35, 0.0 }
 0x71c   :  { %v7950_v9 = vpop.f32.mrb[106].mxu1 }
 0x71d   :  { %v8624_v0 = vadd.f32 %v8612_v39, %v11874_v20  ;;  %v7951_v14 = vadd.f32 %v7950_v9, %v12002_v27  ;;  %v9816_v7 = vpop.f32.mrb[107].mxu1 }
 0x71f   :  { %v9924_v48 = vpack.c.bf16 %v8624_v0, %v8623_v42  ;;  %v8613_v28 = vmax.f32 %v7951_v14, 0.0 }
 0x720   :  { %v8023_v15 = vpop.f32.mrb[108].mxu1 }
 0x721   :  { %v8024_v55 = vadd.f32 %v8023_v15, %v12002_v27  ;;  %v9821_v62 = vpop.f32.mrb[109].mxu1  ;;  %9925 = vmatprep.subr.bf16.mxu0 %v9924_v48  ;;  %v8625_v13 = vadd.f32 %v8613_v28, %v11880_v41 }
 0x722   :  { %9927 = vmatpush3.bf16.msra.mxu0 %v9924_v48 }
 0x723   :  { %v8614_v59 = vmax.f32 %v8024_v55, 0.0 }
 0x724   :  { %v8096_v43 = vpop.f32.mrb[110].mxu1 }
 0x725   :  { %v8626_v57 = vadd.f32 %v8614_v59, %v11886_v2  ;;  %v8097_v31 = vadd.f32 %v8096_v43, %v12002_v27  ;;  %v9826_v20 = vpop.f32.mrb[111].mxu1 }
 0x727   :  { %v9928_v63 = vpack.c.bf16 %v8626_v57, %v8625_v13  ;;  %v8615_v61 = vmax.f32 %v8097_v31, 0.0 }
 0x728   :  { %v8169_v53 = vpop.f32.mrb[112].mxu1  ;;  %v8242_v33 = vpop.f32.mrb[114].mxu0 }
 0x729   :  { %v8170_v25 = vadd.f32 %v8169_v53, %v12002_v27  ;;  %v8243_v26 = vadd.f32 %v8242_v33, %v12002_v27  ;;  %v9831_v45 = vpop.f32.mrb[113].mxu1  ;;  %v9836_v51 = vpop.f32.mrb[115].mxu0  ;;  %9929 = vmatprep.subr.bf16.mxu0 %v9928_v63  ;;  %v8627_v2 = vadd.f32 %v8615_v61, %v11892_v22 }
 0x72a   :  { %9931 = vmatpush3.bf16.msra.mxu0 %v9928_v63 }
 0x72b   :  { %v8616_v58 = vmax.f32 %v8170_v25, 0.0  ;;  %v8617_v29 = vmax.f32 %v8243_v26, 0.0 }
 0x72c   :  { %v8315_v41 = vpop.f32.mrb[114].mxu1  ;;  %v8388_v12 = vpop.f32.mrb[116].mxu0 }
 0x72d   :  { %v8628_v17 = vadd.f32 %v8616_v58, %v11899_v23  ;;  %v8316_v50 = vadd.f32 %v8315_v41, %v12002_v27  ;;  %v8389_v54 = vadd.f32 %v8388_v12, %v12002_v27  ;;  %v9841_v37 = vpop.f32.mrb[115].mxu1  ;;  %v9846_v36 = vpop.f32.mrb[117].mxu0  ;;  %v8629_v3 = vadd.f32 %v8617_v29, %v11902_v34 }
 0x72f   :  { %v8618_v8 = vmax.f32 %v8316_v50, 0.0  ;;  %v9932_v6 = vpack.c.bf16 %v8628_v17, %v8627_v2  ;;  %v8619_v60 = vmax.f32 %v8389_v54, 0.0 }
 0x730   :  { %v8461_v56 = vpop.f32.mrb[116].mxu1  ;;  %v8534_v46 = vpop.f32.mrb[118].mxu0 }
 0x731   :  { %v8630_v19 = vadd.f32 %v8618_v8, %v11911_v40  ;;  %v8462_v1 = vadd.f32 %v8461_v56, %v12002_v27  ;;  %v8535_v22 = vadd.f32 %v8534_v46, %v12002_v27  ;;  %v9851_v23 = vpop.f32.mrb[117].mxu1  ;;  %v9856_v11 = vpop.f32.mrb[119].mxu0  ;;  %9933 = vmatprep.subr.bf16.mxu0 %v9932_v6  ;;  %v8631_v24 = vadd.f32 %v8619_v60, %v11914_v52  ;;  %v8638_v52 = vld [vmem:[%s12060_s5 + $0x8] sm:$0xff] }
 0x732   :  { %9935 = vmatpush3.bf16.msra.mxu0 %v9932_v6 }
 0x733   :  { %v8620_v4 = vmax.f32 %v8462_v1, 0.0  ;;  %v9936_v5 = vpack.c.bf16 %v8630_v19, %v8629_v3  ;;  %v8621_v16 = vmax.f32 %v8535_v22, 0.0 }
 0x734   :  { %v8607_v34 = vpop.f32.mrb[118].mxu1 }
 0x735   :  { %v8632_v40 = vadd.f32 %v8620_v4, %v11923_v32  ;;  %v8608_v49 = vadd.f32 %v8607_v34, %v12002_v27  ;;  %v9861_v44 = vpop.f32.mrb[119].mxu1  ;;  %9937 = vmatprep.subr.bf16.mxu1 %v9936_v5  ;;  %9875 = vmatmul.mubr.msk.f32.vlgmr.msra.gmra.mrb[120].mxu0 %vm8639_vm3, %v8636_v21  ;;  %v8633_v35 = vadd.f32 %v8621_v16, %v11926_v30  ;;  %v8637_v32 = vld [vmem:[%s12060_s5] sm:$0xff] }
 0x736   :  { %9939 = vmatpush3.bf16.msra.mxu1 %v9936_v5 }
 0x737   :  { %v8622_v18 = vmax.f32 %v8608_v49, 0.0  ;;  %v9940_v10 = vpack.c.bf16 %v8632_v40, %v8631_v24 }
 0x739   :  { %v8634_v47 = vadd.f32 %v8622_v18, %v11934_v38  ;;  %9941 = vmatprep.subr.bf16.mxu1 %v9940_v10 }
 0x73a   :  { %9943 = vmatpush3.bf16.msra.mxu1 %v9940_v10 }
 0x73b   :  { %v9944_v39 = vpack.c.bf16 %v8634_v47, %v8633_v35 }
 0x73d   :  { %9945 = vmatprep.subr.bf16.mxu1 %v9944_v39 }
 0x73e   :  { %9947 = vmatpush3.bf16.msra.mxu1 %v9944_v39 }
 0x741   :  { %9890 = vmatmul.mubr.msk.f32.vlgmr.msra.gmra.mrb[120].mxu1 %vm8639_vm3, %v8636_v21 }
 0x808   :  { %v9876_v27 = vpop.f32.mrb[120].mxu0 }
 0x809   :  { %v8718_v9 = vadd.f32 %v9876_v27, %v8638_v52  ;;  %v8712_v30 = vpop.f32.mrb[121].mxu0 }
 0x80a   :  { %v8713_v42 = vadd.f32 %v8712_v30, %v8637_v32 }
 0x80b   :  { %8797 = vst.msk [vmem:[%s12061_s6 + $0x8] sm:$0xff] %vm736_vm1, %v8718_v9 }
 0x80c   :  { %8796 = vst.msk [vmem:[%s12061_s6] sm:$0xff] %vm736_vm1, %v8713_v42 }
 0x814   :  { %v9891_v38 = vpop.f32.mrb[120].mxu1 }
 0x815   :  { %v8793_v0 = vadd.f32 %v9891_v38, %v8638_v52  ;;  %v8787_v14 = vpop.f32.mrb[121].mxu1 }
 0x816   :  { %v8788_v7 = vadd.f32 %v8787_v14, %v8637_v32 }
 0x817   :  { %8799 = vst.msk [vmem:[%s12061_s6 + $0x18] sm:$0xff] %vm736_vm1, %v8793_v0 }
 0x818   :  { %8798 = vst.msk [vmem:[%s12061_s6 + $0x10] sm:$0xff] %vm736_vm1, %v8788_v7 }

</bundles_post_ra>
